<compile_context>
chip_gen: v6e
topology: v6e:2x2x1
jax: 0.10.0
libtpu: 0.0.40
codegen_flags: <defaults>
</compile_context>

<pallas_src>
import jax
import jax.numpy as jnp
from jax.experimental import pallas as pl
from jax.experimental.pallas import tpu as pltpu

LEAKY_SLOPE = 0.05
KSIZE = 4  # every conv in the module (incl. the fc with image_size//16 == 4)


# ---------------------------------------------------------------------------
# Pallas kernel: whole Discriminator forward, one sample per grid step
# ---------------------------------------------------------------------------
def _disc_kernel(x_ref, tags_ref,
                 sel1_ref, w1_ref, b1_ref,
                 sel2_ref, w2_ref, b2_ref,
                 sel3_ref, w3_ref, b3_ref,
                 sel4_ref, w4_ref, b4_ref,
                 wfc_ref, wtag_ref, bfc_ref,
                 out_ref,
                 buf2, buf3, buf4):

    def conv_layer(src, sel_ref, w_ref, b_ref):
        # src: (H_pad, W_pad*Cin) bf16 row-flattened padded activation.
        oh = sel_ref.shape[1]
        owc = w_ref.shape[2]
        acc = jnp.zeros((oh, owc), jnp.float32)
        for kh in range(KSIZE):                               # static unroll
            # Stride-2 row selection (rows 2*i + kh) as a dense MXU matmul.
            rows = jnp.dot(sel_ref[kh], src,
                           preferred_element_type=jnp.float32)
            # Toeplitz-expanded kernel row: folds kw loop + column stride.
            acc = acc + jnp.dot(rows.astype(jnp.bfloat16), w_ref[kh],
                                preferred_element_type=jnp.float32)
        y = acc + b_ref[...]                                  # f32 bias
        return jnp.where(y >= 0.0, y, LEAKY_SLOPE * y)        # leaky_relu(0.05)

    def store_padded(dst_ref, y):
        # Write y=(OH, OW*Cout) into the next layer's padded row-flattened
        # input buffer (OH+2, (OW+2)*Cout); borders stay zero (= conv pad=1).
        pad_c = (dst_ref.shape[1] - y.shape[1]) // 2
        dst_ref[...] = jnp.zeros_like(dst_ref)
        dst_ref[1:1 + y.shape[0], pad_c:pad_c + y.shape[1]] = y.astype(dst_ref.dtype)

    y1 = conv_layer(x_ref[0], sel1_ref, w1_ref, b1_ref)       # (32, 256)
    store_padded(buf2, y1)
    y2 = conv_layer(buf2[...], sel2_ref, w2_ref, b2_ref)      # (16, 256)
    store_padded(buf3, y2)
    y3 = conv_layer(buf3[...], sel3_ref, w3_ref, b3_ref)      # (8, 256)
    store_padded(buf4, y3)
    y4 = conv_layer(buf4[...], sel4_ref, w4_ref, b4_ref)      # (4, 256)

    # fc layer (4x4 conv, stride 1, pad 0 -> one scalar), with the replicated
    # tag channels folded in analytically (they are constant over the window).
    conv_part = jnp.sum(jnp.sum(y4 * wfc_ref[...], axis=1, keepdims=True),
                        axis=0, keepdims=True)                # (1, 1)
    tag_part = jnp.sum(tags_ref[0] * wtag_ref[...],
                       axis=1, keepdims=True)                 # (1, 1)
    out_ref[0] = conv_part + tag_part + bfc_ref[...]


# ---------------------------------------------------------------------------
# One-time parameter re-layout (hoisted out of the forward pass)
# ---------------------------------------------------------------------------
def _build_sel(h_in):
    """sel[kh, i, h] = 1.0 iff h == 2*i + kh  (padded-row selector)."""
    h_pad, oh = h_in + 2, h_in // 2
    kh = jnp.arange(KSIZE)[:, None, None]
    i = jnp.arange(oh)[None, :, None]
    h = jnp.arange(h_pad)[None, None, :]
    return (h == 2 * i + kh).astype(jnp.bfloat16)             # (4, oh, h_pad)


def _build_toeplitz(w_oihw, w_in):
    """T[kh, w*Cin+c, j*Cout+co] = W[co, c, kh, w-2j] (0 outside the kernel)."""
    cout, cin, kh_sz, kw_sz = w_oihw.shape
    w_pad, ow = w_in + 2, w_in // 2
    wt = jnp.transpose(w_oihw, (2, 3, 1, 0))                  # (kh, kw, cin, cout)
    w_idx = jnp.arange(w_pad)[:, None]
    j_idx = jnp.arange(ow)[None, :]
    kw_rel = w_idx - 2 * j_idx                                # (w_pad, ow)
    valid = ((kw_rel >= 0) & (kw_rel < kw_sz)).astype(wt.dtype)
    kw_clip = jnp.clip(kw_rel, 0, kw_sz - 1)
    t = wt[:, kw_clip, :, :]                                  # (kh, w_pad, ow, cin, cout)
    t = t * valid[None, :, :, None, None]
    t = jnp.transpose(t, (0, 1, 3, 2, 4))                     # (kh, w_pad, cin, ow, cout)
    return t.reshape(kh_sz, w_pad * cin, ow * cout).astype(jnp.bfloat16)


def prepare_params(params, image_size=64):
    """Transform PyTorch OIHW weights into the kernel layout (done once)."""
    convs = []
    h_in = image_size
    for wn, bn in (("w1", "b1"), ("w2", "b2"), ("w3", "b3"), ("w4", "b4")):
        w, b = params[wn], params[bn]
        assert w.shape[2] == KSIZE and w.shape[3] == KSIZE
        sel = _build_sel(h_in)
        tw = _build_toeplitz(w, h_in)
        bt = jnp.tile(b, h_in // 2).reshape(1, -1).astype(jnp.float32)
        convs.append((sel, tw, bt))
        h_in //= 2
    wf, bf = params["wf"], params["bf"]
    assert wf.shape[2] == 4 and wf.shape[3] == 4               # hard-coded in module
    n_conv_ch = params["w4"].shape[0]                          # 8 * conv_dim
    # fc weights over conv channels, laid out to match y4[h, w*C + c].
    wfc = jnp.transpose(wf[0, :n_conv_ch], (1, 2, 0)).reshape(wf.shape[2], -1)
    # fc weights over the spatially replicated tag channels: sum over (h, w).
    wtag = jnp.sum(wf[0, n_conv_ch:], axis=(1, 2)).reshape(1, -1)
    return {
        "convs": convs,
        "wfc": wfc.astype(jnp.float32),
        "wtag": wtag.astype(jnp.float32),
        "bfc": bf.reshape(1, 1).astype(jnp.float32),
    }


# ---------------------------------------------------------------------------
# Forward pass: one fused pallas_call
# ---------------------------------------------------------------------------
@jax.jit
def discriminator_forward(prep, x_nchw, tags):
    n = x_nchw.shape[0]
    # NCHW -> padded, row-flattened NHWC: (N, H+2, (W+2)*C), bf16 for the MXU.
    x = jnp.transpose(x_nchw, (0, 2, 3, 1))
    x = jnp.pad(x, ((0, 0), (1, 1), (1, 1), (0, 0)))
    _, hp, wp, c = x.shape
    x = x.reshape(n, hp, wp * c).astype(jnp.bfloat16)
    tags3 = tags[:, None, :].astype(jnp.float32)               # (N, 1, T)

    operands = [x, tags3]
    in_specs = [
        pl.BlockSpec((1, hp, wp * c), lambda i: (i, 0, 0)),
        pl.BlockSpec((1, 1, tags3.shape[2]), lambda i: (i, 0, 0)),
    ]

    def add_full(a):                                           # weight operand
        operands.append(a)
        in_specs.append(pl.BlockSpec(a.shape, lambda i, _z=(0,) * a.ndim: _z))

    for sel, tw, bt in prep["convs"]:
        add_full(sel)
        add_full(tw)
        add_full(bt)
    add_full(prep["wfc"])
    add_full(prep["wtag"])
    add_full(prep["bfc"])

    # Inter-layer VMEM buffers == next layer's padded row-flattened input.
    convs = prep["convs"]
    buf_shapes = [(convs[i + 1][0].shape[2], convs[i + 1][1].shape[1])
                  for i in range(3)]

    flops = 0
    for sel, tw, _ in convs:
        _, oh, hpad = sel.shape
        _, k, owc = tw.shape
        flops += KSIZE * (2 * oh * hpad * k + 2 * oh * k * owc)
    flops = n * (flops + 2 * prep["wfc"].size + 2 * prep["wtag"].size)
    bytes_accessed = sum(int(a.size) * a.dtype.itemsize for a in operands) + n * 4

    out = pl.pallas_call(
        _disc_kernel,
        out_shape=jax.ShapeDtypeStruct((n, 1, 1), jnp.float32),
        grid=(n,),
        in_specs=in_specs,
        out_specs=pl.BlockSpec((1, 1, 1), lambda i: (i, 0, 0)),
        scratch_shapes=[pltpu.VMEM(s, jnp.bfloat16) for s in buf_shapes],
        compiler_params=pltpu.CompilerParams(
            dimension_semantics=("parallel",)),
        cost_estimate=pl.CostEstimate(flops=flops, transcendentals=0,
                                      bytes_accessed=bytes_accessed),
    )(*operands)
    return jnp.squeeze(out)                                    # matches torch .squeeze()


# ---------------------------------------------------------------------------
# Deterministic synthetic parameters (PyTorch OIHW layout) + f32 reference
# ---------------------------------------------------------------------------
def init_params(key, conv_dim=8, num_tags=5, image_size=64):
    shapes = [
        ("w1", "b1", (conv_dim,      3,            4, 4)),
        ("w2", "b2", (conv_dim * 2,  conv_dim,     4, 4)),
        ("w3", "b3", (conv_dim * 4,  conv_dim * 2, 4, 4)),
        ("w4", "b4", (conv_dim * 8,  conv_dim * 4, 4, 4)),
        ("wf", "bf", (1, conv_dim * 8 + num_tags,
                      image_size // 16, image_size // 16)),
    ]
    ks = jax.random.split(key, 2 * len(shapes))
    params = {}
    for i, (wn, bn, shp) in enumerate(shapes):
        params[wn] = jax.random.normal(ks[2 * i],     shp,       jnp.float32) * 0.05
        params[bn] = jax.random.normal(ks[2 * i + 1], (shp[0],), jnp.float32) * 0.05
    return params


def reference_forward(params, x, tags):
    """Pure-XLA float32 reference, used only as an in-script sanity check."""
    def convl(v, w, b, stride, pad):
        y = jax.lax.conv_general_dilated(
            v, w, window_strides=(stride, stride),
            padding=[(pad, pad), (pad, pad)],
            dimension_numbers=("NCHW", "OIHW", "NCHW"))
        return y + b[None, :, None, None]

    out = jax.nn.leaky_relu(convl(x,   params["w1"], params["b1"], 2, 1), LEAKY_SLOPE)
    out = jax.nn.leaky_relu(convl(out, params["w2"], params["b2"], 2, 1), LEAKY_SLOPE)
    out = jax.nn.leaky_relu(convl(out, params["w3"], params["b3"], 2, 1), LEAKY_SLOPE)
    out = jax.nn.leaky_relu(convl(out, params["w4"], params["b4"], 2, 1), LEAKY_SLOPE)
    n, t = tags.shape
    rep = jnp.broadcast_to(tags[:, :, None, None], (n, t, 4, 4))
    out = jnp.concatenate([out, rep], axis=1)
    out = convl(out, params["wf"], params["bf"], 1, 0)
    return jnp.squeeze(out)


if __name__ == "__main__":
    key = jax.random.PRNGKey(0)
    kx, kt, kp = jax.random.split(key, 3)

    conv_dim, num_tags, image_size, batch = 8, 5, 64, 2
    x = jax.random.normal(kx, (batch, 3, image_size, image_size), jnp.float32)
    tags = jax.random.normal(kt, (batch, num_tags), jnp.float32)
    params = init_params(kp, conv_dim=conv_dim, num_tags=num_tags,
                         image_size=image_size)

    prep = prepare_params(params, image_size=image_size)       # one-time re-layout
    out = discriminator_forward(prep, x, tags)                  # shape (batch,)
    out = jax.block_until_ready(out)
    assert out.shape == (batch,)

    # Loose tolerance: kernel matmuls run in bf16 (f32 accumulation/epilogue).
    ref = reference_forward(params, x, tags)
    assert float(jnp.max(jnp.abs(out - ref))) < 0.15

    print("KERNEL_OK")
</pallas_src>

<mosaic_0001>
module attributes {stable_mosaic.version = 11 : i64} {
  func.func @_disc_kernel(%arg0: i32, %arg1: memref<1x66x198xbf16, #tpu.memory_space<vmem>>, %arg2: memref<1x1x5xf32, #tpu.memory_space<vmem>>, %arg3: memref<4x32x66xbf16, #tpu.memory_space<vmem>>, %arg4: memref<4x198x256xbf16, #tpu.memory_space<vmem>>, %arg5: memref<1x256xf32, #tpu.memory_space<vmem>>, %arg6: memref<4x16x34xbf16, #tpu.memory_space<vmem>>, %arg7: memref<4x272x256xbf16, #tpu.memory_space<vmem>>, %arg8: memref<1x256xf32, #tpu.memory_space<vmem>>, %arg9: memref<4x8x18xbf16, #tpu.memory_space<vmem>>, %arg10: memref<4x288x256xbf16, #tpu.memory_space<vmem>>, %arg11: memref<1x256xf32, #tpu.memory_space<vmem>>, %arg12: memref<4x4x10xbf16, #tpu.memory_space<vmem>>, %arg13: memref<4x320x256xbf16, #tpu.memory_space<vmem>>, %arg14: memref<1x256xf32, #tpu.memory_space<vmem>>, %arg15: memref<4x256xf32, #tpu.memory_space<vmem>>, %arg16: memref<1x5xf32, #tpu.memory_space<vmem>>, %arg17: memref<1x1xf32, #tpu.memory_space<vmem>>, %arg18: memref<1x1x1xf32, #tpu.memory_space<vmem>>, %arg19: memref<34x272xbf16, #tpu.memory_space<vmem>>, %arg20: memref<18x288xbf16, #tpu.memory_space<vmem>>, %arg21: memref<10x320xbf16, #tpu.memory_space<vmem>>) attributes {dimension_semantics = [#tpu.dimension_semantics<parallel>], iteration_bounds = array<i64: 2>, scalar_prefetch = 0 : i64, scratch_operands = 3 : i64, tpu.core_type = #tpu.core_type<tc>, window_params = [{transform_indices = @transform_0, window_bounds = array<i64: 1, 66, 198>}, {transform_indices = @transform_1, window_bounds = array<i64: 1, 1, 5>}, {pipeline_mode = #tpu.pipeline_mode<synchronous>, transform_indices = @transform_2, window_bounds = array<i64: 4, 32, 66>}, {pipeline_mode = #tpu.pipeline_mode<synchronous>, transform_indices = @transform_3, window_bounds = array<i64: 4, 198, 256>}, {pipeline_mode = #tpu.pipeline_mode<synchronous>, transform_indices = @transform_4, window_bounds = array<i64: 1, 256>}, {pipeline_mode = #tpu.pipeline_mode<synchronous>, transform_indices = @transform_5, window_bounds = array<i64: 4, 16, 34>}, {pipeline_mode = #tpu.pipeline_mode<synchronous>, transform_indices = @transform_6, window_bounds = array<i64: 4, 272, 256>}, {pipeline_mode = #tpu.pipeline_mode<synchronous>, transform_indices = @transform_7, window_bounds = array<i64: 1, 256>}, {pipeline_mode = #tpu.pipeline_mode<synchronous>, transform_indices = @transform_8, window_bounds = array<i64: 4, 8, 18>}, {pipeline_mode = #tpu.pipeline_mode<synchronous>, transform_indices = @transform_9, window_bounds = array<i64: 4, 288, 256>}, {pipeline_mode = #tpu.pipeline_mode<synchronous>, transform_indices = @transform_10, window_bounds = array<i64: 1, 256>}, {pipeline_mode = #tpu.pipeline_mode<synchronous>, transform_indices = @transform_11, window_bounds = array<i64: 4, 4, 10>}, {pipeline_mode = #tpu.pipeline_mode<synchronous>, transform_indices = @transform_12, window_bounds = array<i64: 4, 320, 256>}, {pipeline_mode = #tpu.pipeline_mode<synchronous>, transform_indices = @transform_13, window_bounds = array<i64: 1, 256>}, {pipeline_mode = #tpu.pipeline_mode<synchronous>, transform_indices = @transform_14, window_bounds = array<i64: 4, 256>}, {pipeline_mode = #tpu.pipeline_mode<synchronous>, transform_indices = @transform_15, window_bounds = array<i64: 1, 5>}, {pipeline_mode = #tpu.pipeline_mode<synchronous>, transform_indices = @transform_16, window_bounds = array<i64: 1, 1>}, {transform_indices = @transform_17, window_bounds = array<i64: 1, 1, 1>}]} {
    %c0 = arith.constant 0 : index
    %c0_0 = arith.constant 0 : index
    %c0_1 = arith.constant 0 : index
    %0 = vector.load %arg1[%c0, %c0_0, %c0_1] : memref<1x66x198xbf16, #tpu.memory_space<vmem>>, vector<1x66x198xbf16>
    %1 = vector.shape_cast %0 : vector<1x66x198xbf16> to vector<66x198xbf16>
    %cst = arith.constant 0.000000e+00 : f32
    %2 = vector.broadcast %cst : f32 to vector<32x256xf32>
    %c0_2 = arith.constant 0 : index
    %c0_3 = arith.constant 0 : index
    %c0_4 = arith.constant 0 : index
    %3 = vector.load %arg3[%c0_2, %c0_3, %c0_4] : memref<4x32x66xbf16, #tpu.memory_space<vmem>>, vector<1x32x66xbf16>
    %4 = vector.shape_cast %3 : vector<1x32x66xbf16> to vector<32x66xbf16>
    %cst_5 = arith.constant dense<0.000000e+00> : vector<32x198xf32>
    %5 = tpu.matmul %4, %1, %cst_5 {dimension_numbers = #tpu.dot_dimension_numbers<[1], [0], [0], [1], [0, 0, 1, 1], [], []>} : vector<32x66xbf16>, vector<66x198xbf16>, vector<32x198xf32> -> vector<32x198xf32>
    %6 = arith.truncf %5 : vector<32x198xf32> to vector<32x198xbf16>
    %c0_6 = arith.constant 0 : index
    %c0_7 = arith.constant 0 : index
    %c0_8 = arith.constant 0 : index
    %7 = vector.load %arg4[%c0_6, %c0_7, %c0_8] : memref<4x198x256xbf16, #tpu.memory_space<vmem>>, vector<1x198x256xbf16>
    %8 = vector.shape_cast %7 : vector<1x198x256xbf16> to vector<198x256xbf16>
    %cst_9 = arith.constant dense<0.000000e+00> : vector<32x256xf32>
    %9 = tpu.matmul %6, %8, %cst_9 {dimension_numbers = #tpu.dot_dimension_numbers<[1], [0], [0], [1], [0, 0, 1, 1], [], []>} : vector<32x198xbf16>, vector<198x256xbf16>, vector<32x256xf32> -> vector<32x256xf32>
    %10 = arith.addf %2, %9 : vector<32x256xf32>
    %c1 = arith.constant 1 : index
    %c0_10 = arith.constant 0 : index
    %c0_11 = arith.constant 0 : index
    %11 = vector.load %arg3[%c1, %c0_10, %c0_11] : memref<4x32x66xbf16, #tpu.memory_space<vmem>>, vector<1x32x66xbf16>
    %12 = vector.shape_cast %11 : vector<1x32x66xbf16> to vector<32x66xbf16>
    %cst_12 = arith.constant dense<0.000000e+00> : vector<32x198xf32>
    %13 = tpu.matmul %12, %1, %cst_12 {dimension_numbers = #tpu.dot_dimension_numbers<[1], [0], [0], [1], [0, 0, 1, 1], [], []>} : vector<32x66xbf16>, vector<66x198xbf16>, vector<32x198xf32> -> vector<32x198xf32>
    %14 = arith.truncf %13 : vector<32x198xf32> to vector<32x198xbf16>
    %c1_13 = arith.constant 1 : index
    %c0_14 = arith.constant 0 : index
    %c0_15 = arith.constant 0 : index
    %15 = vector.load %arg4[%c1_13, %c0_14, %c0_15] : memref<4x198x256xbf16, #tpu.memory_space<vmem>>, vector<1x198x256xbf16>
    %16 = vector.shape_cast %15 : vector<1x198x256xbf16> to vector<198x256xbf16>
    %cst_16 = arith.constant dense<0.000000e+00> : vector<32x256xf32>
    %17 = tpu.matmul %14, %16, %cst_16 {dimension_numbers = #tpu.dot_dimension_numbers<[1], [0], [0], [1], [0, 0, 1, 1], [], []>} : vector<32x198xbf16>, vector<198x256xbf16>, vector<32x256xf32> -> vector<32x256xf32>
    %18 = arith.addf %10, %17 : vector<32x256xf32>
    %c2 = arith.constant 2 : index
    %c0_17 = arith.constant 0 : index
    %c0_18 = arith.constant 0 : index
    %19 = vector.load %arg3[%c2, %c0_17, %c0_18] : memref<4x32x66xbf16, #tpu.memory_space<vmem>>, vector<1x32x66xbf16>
    %20 = vector.shape_cast %19 : vector<1x32x66xbf16> to vector<32x66xbf16>
    %cst_19 = arith.constant dense<0.000000e+00> : vector<32x198xf32>
    %21 = tpu.matmul %20, %1, %cst_19 {dimension_numbers = #tpu.dot_dimension_numbers<[1], [0], [0], [1], [0, 0, 1, 1], [], []>} : vector<32x66xbf16>, vector<66x198xbf16>, vector<32x198xf32> -> vector<32x198xf32>
    %22 = arith.truncf %21 : vector<32x198xf32> to vector<32x198xbf16>
    %c2_20 = arith.constant 2 : index
    %c0_21 = arith.constant 0 : index
    %c0_22 = arith.constant 0 : index
    %23 = vector.load %arg4[%c2_20, %c0_21, %c0_22] : memref<4x198x256xbf16, #tpu.memory_space<vmem>>, vector<1x198x256xbf16>
    %24 = vector.shape_cast %23 : vector<1x198x256xbf16> to vector<198x256xbf16>
    %cst_23 = arith.constant dense<0.000000e+00> : vector<32x256xf32>
    %25 = tpu.matmul %22, %24, %cst_23 {dimension_numbers = #tpu.dot_dimension_numbers<[1], [0], [0], [1], [0, 0, 1, 1], [], []>} : vector<32x198xbf16>, vector<198x256xbf16>, vector<32x256xf32> -> vector<32x256xf32>
    %26 = arith.addf %18, %25 : vector<32x256xf32>
    %c3 = arith.constant 3 : index
    %c0_24 = arith.constant 0 : index
    %c0_25 = arith.constant 0 : index
    %27 = vector.load %arg3[%c3, %c0_24, %c0_25] : memref<4x32x66xbf16, #tpu.memory_space<vmem>>, vector<1x32x66xbf16>
    %28 = vector.shape_cast %27 : vector<1x32x66xbf16> to vector<32x66xbf16>
    %cst_26 = arith.constant dense<0.000000e+00> : vector<32x198xf32>
    %29 = tpu.matmul %28, %1, %cst_26 {dimension_numbers = #tpu.dot_dimension_numbers<[1], [0], [0], [1], [0, 0, 1, 1], [], []>} : vector<32x66xbf16>, vector<66x198xbf16>, vector<32x198xf32> -> vector<32x198xf32>
    %30 = arith.truncf %29 : vector<32x198xf32> to vector<32x198xbf16>
    %c3_27 = arith.constant 3 : index
    %c0_28 = arith.constant 0 : index
    %c0_29 = arith.constant 0 : index
    %31 = vector.load %arg4[%c3_27, %c0_28, %c0_29] : memref<4x198x256xbf16, #tpu.memory_space<vmem>>, vector<1x198x256xbf16>
    %32 = vector.shape_cast %31 : vector<1x198x256xbf16> to vector<198x256xbf16>
    %cst_30 = arith.constant dense<0.000000e+00> : vector<32x256xf32>
    %33 = tpu.matmul %30, %32, %cst_30 {dimension_numbers = #tpu.dot_dimension_numbers<[1], [0], [0], [1], [0, 0, 1, 1], [], []>} : vector<32x198xbf16>, vector<198x256xbf16>, vector<32x256xf32> -> vector<32x256xf32>
    %34 = arith.addf %26, %33 : vector<32x256xf32>
    %c0_31 = arith.constant 0 : index
    %c0_32 = arith.constant 0 : index
    %35 = vector.load %arg5[%c0_31, %c0_32] : memref<1x256xf32, #tpu.memory_space<vmem>>, vector<1x256xf32>
    %36 = vector.broadcast %35 : vector<1x256xf32> to vector<32x256xf32>
    %37 = arith.addf %34, %36 : vector<32x256xf32>
    %cst_33 = arith.constant 0.000000e+00 : f32
    %38 = vector.broadcast %cst_33 : f32 to vector<32x256xf32>
    %39 = arith.cmpf oge, %37, %38 : vector<32x256xf32>
    %cst_34 = arith.constant 5.000000e-02 : f32
    %40 = vector.broadcast %cst_34 : f32 to vector<32x256xf32>
    %41 = arith.mulf %40, %37 : vector<32x256xf32>
    %42 = arith.select %39, %37, %41 : vector<32x256xi1>, vector<32x256xf32>
    %cst_35 = arith.constant 0.000000e+00 : bf16
    %43 = vector.broadcast %cst_35 : bf16 to vector<34x272xbf16>
    %c0_36 = arith.constant 0 : index
    %c0_37 = arith.constant 0 : index
    %44 = vector.load %arg19[%c0_36, %c0_37] : memref<34x272xbf16, #tpu.memory_space<vmem>>, vector<34x272xbf16>
    tpu.vector_store %arg19[%c0_36, %c0_37], %43 {strides = array<i32>} : memref<34x272xbf16, #tpu.memory_space<vmem>>, vector<34x272xbf16>,
    %45 = arith.truncf %42 : vector<32x256xf32> to vector<32x256xbf16>
    %c1_38 = arith.constant 1 : index
    %c8 = arith.constant 8 : index
    %46 = vector.load %arg19[%c1_38, %c8] : memref<34x272xbf16, #tpu.memory_space<vmem>>, vector<32x256xbf16>
    tpu.vector_store %arg19[%c1_38, %c8], %45 {strides = array<i32>} : memref<34x272xbf16, #tpu.memory_space<vmem>>, vector<32x256xbf16>,
    %c0_39 = arith.constant 0 : index
    %c0_40 = arith.constant 0 : index
    %47 = vector.load %arg19[%c0_39, %c0_40] : memref<34x272xbf16, #tpu.memory_space<vmem>>, vector<34x272xbf16>
    %cst_41 = arith.constant 0.000000e+00 : f32
    %48 = vector.broadcast %cst_41 : f32 to vector<16x256xf32>
    %c0_42 = arith.constant 0 : index
    %c0_43 = arith.constant 0 : index
    %c0_44 = arith.constant 0 : index
    %49 = vector.load %arg6[%c0_42, %c0_43, %c0_44] : memref<4x16x34xbf16, #tpu.memory_space<vmem>>, vector<1x16x34xbf16>
    %50 = vector.shape_cast %49 : vector<1x16x34xbf16> to vector<16x34xbf16>
    %cst_45 = arith.constant dense<0.000000e+00> : vector<16x272xf32>
    %51 = tpu.matmul %50, %47, %cst_45 {dimension_numbers = #tpu.dot_dimension_numbers<[1], [0], [0], [1], [0, 0, 1, 1], [], []>} : vector<16x34xbf16>, vector<34x272xbf16>, vector<16x272xf32> -> vector<16x272xf32>
    %52 = arith.truncf %51 : vector<16x272xf32> to vector<16x272xbf16>
    %c0_46 = arith.constant 0 : index
    %c0_47 = arith.constant 0 : index
    %c0_48 = arith.constant 0 : index
    %53 = vector.load %arg7[%c0_46, %c0_47, %c0_48] : memref<4x272x256xbf16, #tpu.memory_space<vmem>>, vector<1x272x256xbf16>
    %54 = vector.shape_cast %53 : vector<1x272x256xbf16> to vector<272x256xbf16>
    %cst_49 = arith.constant dense<0.000000e+00> : vector<16x256xf32>
    %55 = tpu.matmul %52, %54, %cst_49 {dimension_numbers = #tpu.dot_dimension_numbers<[1], [0], [0], [1], [0, 0, 1, 1], [], []>} : vector<16x272xbf16>, vector<272x256xbf16>, vector<16x256xf32> -> vector<16x256xf32>
    %56 = arith.addf %48, %55 : vector<16x256xf32>
    %c1_50 = arith.constant 1 : index
    %c0_51 = arith.constant 0 : index
    %c0_52 = arith.constant 0 : index
    %57 = vector.load %arg6[%c1_50, %c0_51, %c0_52] : memref<4x16x34xbf16, #tpu.memory_space<vmem>>, vector<1x16x34xbf16>
    %58 = vector.shape_cast %57 : vector<1x16x34xbf16> to vector<16x34xbf16>
    %cst_53 = arith.constant dense<0.000000e+00> : vector<16x272xf32>
    %59 = tpu.matmul %58, %47, %cst_53 {dimension_numbers = #tpu.dot_dimension_numbers<[1], [0], [0], [1], [0, 0, 1, 1], [], []>} : vector<16x34xbf16>, vector<34x272xbf16>, vector<16x272xf32> -> vector<16x272xf32>
    %60 = arith.truncf %59 : vector<16x272xf32> to vector<16x272xbf16>
    %c1_54 = arith.constant 1 : index
    %c0_55 = arith.constant 0 : index
    %c0_56 = arith.constant 0 : index
    %61 = vector.load %arg7[%c1_54, %c0_55, %c0_56] : memref<4x272x256xbf16, #tpu.memory_space<vmem>>, vector<1x272x256xbf16>
    %62 = vector.shape_cast %61 : vector<1x272x256xbf16> to vector<272x256xbf16>
    %cst_57 = arith.constant dense<0.000000e+00> : vector<16x256xf32>
    %63 = tpu.matmul %60, %62, %cst_57 {dimension_numbers = #tpu.dot_dimension_numbers<[1], [0], [0], [1], [0, 0, 1, 1], [], []>} : vector<16x272xbf16>, vector<272x256xbf16>, vector<16x256xf32> -> vector<16x256xf32>
    %64 = arith.addf %56, %63 : vector<16x256xf32>
    %c2_58 = arith.constant 2 : index
    %c0_59 = arith.constant 0 : index
    %c0_60 = arith.constant 0 : index
    %65 = vector.load %arg6[%c2_58, %c0_59, %c0_60] : memref<4x16x34xbf16, #tpu.memory_space<vmem>>, vector<1x16x34xbf16>
    %66 = vector.shape_cast %65 : vector<1x16x34xbf16> to vector<16x34xbf16>
    %cst_61 = arith.constant dense<0.000000e+00> : vector<16x272xf32>
    %67 = tpu.matmul %66, %47, %cst_61 {dimension_numbers = #tpu.dot_dimension_numbers<[1], [0], [0], [1], [0, 0, 1, 1], [], []>} : vector<16x34xbf16>, vector<34x272xbf16>, vector<16x272xf32> -> vector<16x272xf32>
    %68 = arith.truncf %67 : vector<16x272xf32> to vector<16x272xbf16>
    %c2_62 = arith.constant 2 : index
    %c0_63 = arith.constant 0 : index
    %c0_64 = arith.constant 0 : index
    %69 = vector.load %arg7[%c2_62, %c0_63, %c0_64] : memref<4x272x256xbf16, #tpu.memory_space<vmem>>, vector<1x272x256xbf16>
    %70 = vector.shape_cast %69 : vector<1x272x256xbf16> to vector<272x256xbf16>
    %cst_65 = arith.constant dense<0.000000e+00> : vector<16x256xf32>
    %71 = tpu.matmul %68, %70, %cst_65 {dimension_numbers = #tpu.dot_dimension_numbers<[1], [0], [0], [1], [0, 0, 1, 1], [], []>} : vector<16x272xbf16>, vector<272x256xbf16>, vector<16x256xf32> -> vector<16x256xf32>
    %72 = arith.addf %64, %71 : vector<16x256xf32>
    %c3_66 = arith.constant 3 : index
    %c0_67 = arith.constant 0 : index
    %c0_68 = arith.constant 0 : index
    %73 = vector.load %arg6[%c3_66, %c0_67, %c0_68] : memref<4x16x34xbf16, #tpu.memory_space<vmem>>, vector<1x16x34xbf16>
    %74 = vector.shape_cast %73 : vector<1x16x34xbf16> to vector<16x34xbf16>
    %cst_69 = arith.constant dense<0.000000e+00> : vector<16x272xf32>
    %75 = tpu.matmul %74, %47, %cst_69 {dimension_numbers = #tpu.dot_dimension_numbers<[1], [0], [0], [1], [0, 0, 1, 1], [], []>} : vector<16x34xbf16>, vector<34x272xbf16>, vector<16x272xf32> -> vector<16x272xf32>
    %76 = arith.truncf %75 : vector<16x272xf32> to vector<16x272xbf16>
    %c3_70 = arith.constant 3 : index
    %c0_71 = arith.constant 0 : index
    %c0_72 = arith.constant 0 : index
    %77 = vector.load %arg7[%c3_70, %c0_71, %c0_72] : memref<4x272x256xbf16, #tpu.memory_space<vmem>>, vector<1x272x256xbf16>
    %78 = vector.shape_cast %77 : vector<1x272x256xbf16> to vector<272x256xbf16>
    %cst_73 = arith.constant dense<0.000000e+00> : vector<16x256xf32>
    %79 = tpu.matmul %76, %78, %cst_73 {dimension_numbers = #tpu.dot_dimension_numbers<[1], [0], [0], [1], [0, 0, 1, 1], [], []>} : vector<16x272xbf16>, vector<272x256xbf16>, vector<16x256xf32> -> vector<16x256xf32>
    %80 = arith.addf %72, %79 : vector<16x256xf32>
    %c0_74 = arith.constant 0 : index
    %c0_75 = arith.constant 0 : index
    %81 = vector.load %arg8[%c0_74, %c0_75] : memref<1x256xf32, #tpu.memory_space<vmem>>, vector<1x256xf32>
    %82 = vector.broadcast %81 : vector<1x256xf32> to vector<16x256xf32>
    %83 = arith.addf %80, %82 : vector<16x256xf32>
    %cst_76 = arith.constant 0.000000e+00 : f32
    %84 = vector.broadcast %cst_76 : f32 to vector<16x256xf32>
    %85 = arith.cmpf oge, %83, %84 : vector<16x256xf32>
    %cst_77 = arith.constant 5.000000e-02 : f32
    %86 = vector.broadcast %cst_77 : f32 to vector<16x256xf32>
    %87 = arith.mulf %86, %83 : vector<16x256xf32>
    %88 = arith.select %85, %83, %87 : vector<16x256xi1>, vector<16x256xf32>
    %cst_78 = arith.constant 0.000000e+00 : bf16
    %89 = vector.broadcast %cst_78 : bf16 to vector<18x288xbf16>
    %c0_79 = arith.constant 0 : index
    %c0_80 = arith.constant 0 : index
    %90 = vector.load %arg20[%c0_79, %c0_80] : memref<18x288xbf16, #tpu.memory_space<vmem>>, vector<18x288xbf16>
    tpu.vector_store %arg20[%c0_79, %c0_80], %89 {strides = array<i32>} : memref<18x288xbf16, #tpu.memory_space<vmem>>, vector<18x288xbf16>,
    %91 = arith.truncf %88 : vector<16x256xf32> to vector<16x256xbf16>
    %c1_81 = arith.constant 1 : index
    %c16 = arith.constant 16 : index
    %92 = vector.load %arg20[%c1_81, %c16] : memref<18x288xbf16, #tpu.memory_space<vmem>>, vector<16x256xbf16>
    tpu.vector_store %arg20[%c1_81, %c16], %91 {strides = array<i32>} : memref<18x288xbf16, #tpu.memory_space<vmem>>, vector<16x256xbf16>,
    %c0_82 = arith.constant 0 : index
    %c0_83 = arith.constant 0 : index
    %93 = vector.load %arg20[%c0_82, %c0_83] : memref<18x288xbf16, #tpu.memory_space<vmem>>, vector<18x288xbf16>
    %cst_84 = arith.constant 0.000000e+00 : f32
    %94 = vector.broadcast %cst_84 : f32 to vector<8x256xf32>
    %c0_85 = arith.constant 0 : index
    %c0_86 = arith.constant 0 : index
    %c0_87 = arith.constant 0 : index
    %95 = vector.load %arg9[%c0_85, %c0_86, %c0_87] : memref<4x8x18xbf16, #tpu.memory_space<vmem>>, vector<1x8x18xbf16>
    %96 = vector.shape_cast %95 : vector<1x8x18xbf16> to vector<8x18xbf16>
    %cst_88 = arith.constant dense<0.000000e+00> : vector<8x288xf32>
    %97 = tpu.matmul %96, %93, %cst_88 {dimension_numbers = #tpu.dot_dimension_numbers<[1], [0], [0], [1], [0, 0, 1, 1], [], []>} : vector<8x18xbf16>, vector<18x288xbf16>, vector<8x288xf32> -> vector<8x288xf32>
    %98 = arith.truncf %97 : vector<8x288xf32> to vector<8x288xbf16>
    %c0_89 = arith.constant 0 : index
    %c0_90 = arith.constant 0 : index
    %c0_91 = arith.constant 0 : index
    %99 = vector.load %arg10[%c0_89, %c0_90, %c0_91] : memref<4x288x256xbf16, #tpu.memory_space<vmem>>, vector<1x288x256xbf16>
    %100 = vector.shape_cast %99 : vector<1x288x256xbf16> to vector<288x256xbf16>
    %cst_92 = arith.constant dense<0.000000e+00> : vector<8x256xf32>
    %101 = tpu.matmul %98, %100, %cst_92 {dimension_numbers = #tpu.dot_dimension_numbers<[1], [0], [0], [1], [0, 0, 1, 1], [], []>} : vector<8x288xbf16>, vector<288x256xbf16>, vector<8x256xf32> -> vector<8x256xf32>
    %102 = arith.addf %94, %101 : vector<8x256xf32>
    %c1_93 = arith.constant 1 : index
    %c0_94 = arith.constant 0 : index
    %c0_95 = arith.constant 0 : index
    %103 = vector.load %arg9[%c1_93, %c0_94, %c0_95] : memref<4x8x18xbf16, #tpu.memory_space<vmem>>, vector<1x8x18xbf16>
    %104 = vector.shape_cast %103 : vector<1x8x18xbf16> to vector<8x18xbf16>
    %cst_96 = arith.constant dense<0.000000e+00> : vector<8x288xf32>
    %105 = tpu.matmul %104, %93, %cst_96 {dimension_numbers = #tpu.dot_dimension_numbers<[1], [0], [0], [1], [0, 0, 1, 1], [], []>} : vector<8x18xbf16>, vector<18x288xbf16>, vector<8x288xf32> -> vector<8x288xf32>
    %106 = arith.truncf %105 : vector<8x288xf32> to vector<8x288xbf16>
    %c1_97 = arith.constant 1 : index
    %c0_98 = arith.constant 0 : index
    %c0_99 = arith.constant 0 : index
    %107 = vector.load %arg10[%c1_97, %c0_98, %c0_99] : memref<4x288x256xbf16, #tpu.memory_space<vmem>>, vector<1x288x256xbf16>
    %108 = vector.shape_cast %107 : vector<1x288x256xbf16> to vector<288x256xbf16>
    %cst_100 = arith.constant dense<0.000000e+00> : vector<8x256xf32>
    %109 = tpu.matmul %106, %108, %cst_100 {dimension_numbers = #tpu.dot_dimension_numbers<[1], [0], [0], [1], [0, 0, 1, 1], [], []>} : vector<8x288xbf16>, vector<288x256xbf16>, vector<8x256xf32> -> vector<8x256xf32>
    %110 = arith.addf %102, %109 : vector<8x256xf32>
    %c2_101 = arith.constant 2 : index
    %c0_102 = arith.constant 0 : index
    %c0_103 = arith.constant 0 : index
    %111 = vector.load %arg9[%c2_101, %c0_102, %c0_103] : memref<4x8x18xbf16, #tpu.memory_space<vmem>>, vector<1x8x18xbf16>
    %112 = vector.shape_cast %111 : vector<1x8x18xbf16> to vector<8x18xbf16>
    %cst_104 = arith.constant dense<0.000000e+00> : vector<8x288xf32>
    %113 = tpu.matmul %112, %93, %cst_104 {dimension_numbers = #tpu.dot_dimension_numbers<[1], [0], [0], [1], [0, 0, 1, 1], [], []>} : vector<8x18xbf16>, vector<18x288xbf16>, vector<8x288xf32> -> vector<8x288xf32>
    %114 = arith.truncf %113 : vector<8x288xf32> to vector<8x288xbf16>
    %c2_105 = arith.constant 2 : index
    %c0_106 = arith.constant 0 : index
    %c0_107 = arith.constant 0 : index
    %115 = vector.load %arg10[%c2_105, %c0_106, %c0_107] : memref<4x288x256xbf16, #tpu.memory_space<vmem>>, vector<1x288x256xbf16>
    %116 = vector.shape_cast %115 : vector<1x288x256xbf16> to vector<288x256xbf16>
    %cst_108 = arith.constant dense<0.000000e+00> : vector<8x256xf32>
    %117 = tpu.matmul %114, %116, %cst_108 {dimension_numbers = #tpu.dot_dimension_numbers<[1], [0], [0], [1], [0, 0, 1, 1], [], []>} : vector<8x288xbf16>, vector<288x256xbf16>, vector<8x256xf32> -> vector<8x256xf32>
    %118 = arith.addf %110, %117 : vector<8x256xf32>
    %c3_109 = arith.constant 3 : index
    %c0_110 = arith.constant 0 : index
    %c0_111 = arith.constant 0 : index
    %119 = vector.load %arg9[%c3_109, %c0_110, %c0_111] : memref<4x8x18xbf16, #tpu.memory_space<vmem>>, vector<1x8x18xbf16>
    %120 = vector.shape_cast %119 : vector<1x8x18xbf16> to vector<8x18xbf16>
    %cst_112 = arith.constant dense<0.000000e+00> : vector<8x288xf32>
    %121 = tpu.matmul %120, %93, %cst_112 {dimension_numbers = #tpu.dot_dimension_numbers<[1], [0], [0], [1], [0, 0, 1, 1], [], []>} : vector<8x18xbf16>, vector<18x288xbf16>, vector<8x288xf32> -> vector<8x288xf32>
    %122 = arith.truncf %121 : vector<8x288xf32> to vector<8x288xbf16>
    %c3_113 = arith.constant 3 : index
    %c0_114 = arith.constant 0 : index
    %c0_115 = arith.constant 0 : index
    %123 = vector.load %arg10[%c3_113, %c0_114, %c0_115] : memref<4x288x256xbf16, #tpu.memory_space<vmem>>, vector<1x288x256xbf16>
    %124 = vector.shape_cast %123 : vector<1x288x256xbf16> to vector<288x256xbf16>
    %cst_116 = arith.constant dense<0.000000e+00> : vector<8x256xf32>
    %125 = tpu.matmul %122, %124, %cst_116 {dimension_numbers = #tpu.dot_dimension_numbers<[1], [0], [0], [1], [0, 0, 1, 1], [], []>} : vector<8x288xbf16>, vector<288x256xbf16>, vector<8x256xf32> -> vector<8x256xf32>
    %126 = arith.addf %118, %125 : vector<8x256xf32>
    %c0_117 = arith.constant 0 : index
    %c0_118 = arith.constant 0 : index
    %127 = vector.load %arg11[%c0_117, %c0_118] : memref<1x256xf32, #tpu.memory_space<vmem>>, vector<1x256xf32>
    %128 = vector.broadcast %127 : vector<1x256xf32> to vector<8x256xf32>
    %129 = arith.addf %126, %128 : vector<8x256xf32>
    %cst_119 = arith.constant 0.000000e+00 : f32
    %130 = vector.broadcast %cst_119 : f32 to vector<8x256xf32>
    %131 = arith.cmpf oge, %129, %130 : vector<8x256xf32>
    %cst_120 = arith.constant 5.000000e-02 : f32
    %132 = vector.broadcast %cst_120 : f32 to vector<8x256xf32>
    %133 = arith.mulf %132, %129 : vector<8x256xf32>
    %134 = arith.select %131, %129, %133 : vector<8x256xi1>, vector<8x256xf32>
    %cst_121 = arith.constant 0.000000e+00 : bf16
    %135 = vector.broadcast %cst_121 : bf16 to vector<10x320xbf16>
    %c0_122 = arith.constant 0 : index
    %c0_123 = arith.constant 0 : index
    %136 = vector.load %arg21[%c0_122, %c0_123] : memref<10x320xbf16, #tpu.memory_space<vmem>>, vector<10x320xbf16>
    tpu.vector_store %arg21[%c0_122, %c0_123], %135 {strides = array<i32>} : memref<10x320xbf16, #tpu.memory_space<vmem>>, vector<10x320xbf16>,
    %137 = arith.truncf %134 : vector<8x256xf32> to vector<8x256xbf16>
    %c1_124 = arith.constant 1 : index
    %c32 = arith.constant 32 : index
    %138 = vector.load %arg21[%c1_124, %c32] : memref<10x320xbf16, #tpu.memory_space<vmem>>, vector<8x256xbf16>
    tpu.vector_store %arg21[%c1_124, %c32], %137 {strides = array<i32>} : memref<10x320xbf16, #tpu.memory_space<vmem>>, vector<8x256xbf16>,
    %c0_125 = arith.constant 0 : index
    %c0_126 = arith.constant 0 : index
    %139 = vector.load %arg21[%c0_125, %c0_126] : memref<10x320xbf16, #tpu.memory_space<vmem>>, vector<10x320xbf16>
    %cst_127 = arith.constant 0.000000e+00 : f32
    %140 = vector.broadcast %cst_127 : f32 to vector<4x256xf32>
    %c0_128 = arith.constant 0 : index
    %c0_129 = arith.constant 0 : index
    %c0_130 = arith.constant 0 : index
    %141 = vector.load %arg12[%c0_128, %c0_129, %c0_130] : memref<4x4x10xbf16, #tpu.memory_space<vmem>>, vector<1x4x10xbf16>
    %142 = vector.shape_cast %141 : vector<1x4x10xbf16> to vector<4x10xbf16>
    %cst_131 = arith.constant dense<0.000000e+00> : vector<4x320xf32>
    %143 = tpu.matmul %142, %139, %cst_131 {dimension_numbers = #tpu.dot_dimension_numbers<[1], [0], [0], [1], [0, 0, 1, 1], [], []>} : vector<4x10xbf16>, vector<10x320xbf16>, vector<4x320xf32> -> vector<4x320xf32>
    %144 = arith.truncf %143 : vector<4x320xf32> to vector<4x320xbf16>
    %c0_132 = arith.constant 0 : index
    %c0_133 = arith.constant 0 : index
    %c0_134 = arith.constant 0 : index
    %145 = vector.load %arg13[%c0_132, %c0_133, %c0_134] : memref<4x320x256xbf16, #tpu.memory_space<vmem>>, vector<1x320x256xbf16>
    %146 = vector.shape_cast %145 : vector<1x320x256xbf16> to vector<320x256xbf16>
    %cst_135 = arith.constant dense<0.000000e+00> : vector<4x256xf32>
    %147 = tpu.matmul %144, %146, %cst_135 {dimension_numbers = #tpu.dot_dimension_numbers<[1], [0], [0], [1], [0, 0, 1, 1], [], []>} : vector<4x320xbf16>, vector<320x256xbf16>, vector<4x256xf32> -> vector<4x256xf32>
    %148 = arith.addf %140, %147 : vector<4x256xf32>
    %c1_136 = arith.constant 1 : index
    %c0_137 = arith.constant 0 : index
    %c0_138 = arith.constant 0 : index
    %149 = vector.load %arg12[%c1_136, %c0_137, %c0_138] : memref<4x4x10xbf16, #tpu.memory_space<vmem>>, vector<1x4x10xbf16>
    %150 = vector.shape_cast %149 : vector<1x4x10xbf16> to vector<4x10xbf16>
    %cst_139 = arith.constant dense<0.000000e+00> : vector<4x320xf32>
    %151 = tpu.matmul %150, %139, %cst_139 {dimension_numbers = #tpu.dot_dimension_numbers<[1], [0], [0], [1], [0, 0, 1, 1], [], []>} : vector<4x10xbf16>, vector<10x320xbf16>, vector<4x320xf32> -> vector<4x320xf32>
    %152 = arith.truncf %151 : vector<4x320xf32> to vector<4x320xbf16>
    %c1_140 = arith.constant 1 : index
    %c0_141 = arith.constant 0 : index
    %c0_142 = arith.constant 0 : index
    %153 = vector.load %arg13[%c1_140, %c0_141, %c0_142] : memref<4x320x256xbf16, #tpu.memory_space<vmem>>, vector<1x320x256xbf16>
    %154 = vector.shape_cast %153 : vector<1x320x256xbf16> to vector<320x256xbf16>
    %cst_143 = arith.constant dense<0.000000e+00> : vector<4x256xf32>
    %155 = tpu.matmul %152, %154, %cst_143 {dimension_numbers = #tpu.dot_dimension_numbers<[1], [0], [0], [1], [0, 0, 1, 1], [], []>} : vector<4x320xbf16>, vector<320x256xbf16>, vector<4x256xf32> -> vector<4x256xf32>
    %156 = arith.addf %148, %155 : vector<4x256xf32>
    %c2_144 = arith.constant 2 : index
    %c0_145 = arith.constant 0 : index
    %c0_146 = arith.constant 0 : index
    %157 = vector.load %arg12[%c2_144, %c0_145, %c0_146] : memref<4x4x10xbf16, #tpu.memory_space<vmem>>, vector<1x4x10xbf16>
    %158 = vector.shape_cast %157 : vector<1x4x10xbf16> to vector<4x10xbf16>
    %cst_147 = arith.constant dense<0.000000e+00> : vector<4x320xf32>
    %159 = tpu.matmul %158, %139, %cst_147 {dimension_numbers = #tpu.dot_dimension_numbers<[1], [0], [0], [1], [0, 0, 1, 1], [], []>} : vector<4x10xbf16>, vector<10x320xbf16>, vector<4x320xf32> -> vector<4x320xf32>
    %160 = arith.truncf %159 : vector<4x320xf32> to vector<4x320xbf16>
    %c2_148 = arith.constant 2 : index
    %c0_149 = arith.constant 0 : index
    %c0_150 = arith.constant 0 : index
    %161 = vector.load %arg13[%c2_148, %c0_149, %c0_150] : memref<4x320x256xbf16, #tpu.memory_space<vmem>>, vector<1x320x256xbf16>
    %162 = vector.shape_cast %161 : vector<1x320x256xbf16> to vector<320x256xbf16>
    %cst_151 = arith.constant dense<0.000000e+00> : vector<4x256xf32>
    %163 = tpu.matmul %160, %162, %cst_151 {dimension_numbers = #tpu.dot_dimension_numbers<[1], [0], [0], [1], [0, 0, 1, 1], [], []>} : vector<4x320xbf16>, vector<320x256xbf16>, vector<4x256xf32> -> vector<4x256xf32>
    %164 = arith.addf %156, %163 : vector<4x256xf32>
    %c3_152 = arith.constant 3 : index
    %c0_153 = arith.constant 0 : index
    %c0_154 = arith.constant 0 : index
    %165 = vector.load %arg12[%c3_152, %c0_153, %c0_154] : memref<4x4x10xbf16, #tpu.memory_space<vmem>>, vector<1x4x10xbf16>
    %166 = vector.shape_cast %165 : vector<1x4x10xbf16> to vector<4x10xbf16>
    %cst_155 = arith.constant dense<0.000000e+00> : vector<4x320xf32>
    %167 = tpu.matmul %166, %139, %cst_155 {dimension_numbers = #tpu.dot_dimension_numbers<[1], [0], [0], [1], [0, 0, 1, 1], [], []>} : vector<4x10xbf16>, vector<10x320xbf16>, vector<4x320xf32> -> vector<4x320xf32>
    %168 = arith.truncf %167 : vector<4x320xf32> to vector<4x320xbf16>
    %c3_156 = arith.constant 3 : index
    %c0_157 = arith.constant 0 : index
    %c0_158 = arith.constant 0 : index
    %169 = vector.load %arg13[%c3_156, %c0_157, %c0_158] : memref<4x320x256xbf16, #tpu.memory_space<vmem>>, vector<1x320x256xbf16>
    %170 = vector.shape_cast %169 : vector<1x320x256xbf16> to vector<320x256xbf16>
    %cst_159 = arith.constant dense<0.000000e+00> : vector<4x256xf32>
    %171 = tpu.matmul %168, %170, %cst_159 {dimension_numbers = #tpu.dot_dimension_numbers<[1], [0], [0], [1], [0, 0, 1, 1], [], []>} : vector<4x320xbf16>, vector<320x256xbf16>, vector<4x256xf32> -> vector<4x256xf32>
    %172 = arith.addf %164, %171 : vector<4x256xf32>
    %c0_160 = arith.constant 0 : index
    %c0_161 = arith.constant 0 : index
    %173 = vector.load %arg14[%c0_160, %c0_161] : memref<1x256xf32, #tpu.memory_space<vmem>>, vector<1x256xf32>
    %174 = vector.broadcast %173 : vector<1x256xf32> to vector<4x256xf32>
    %175 = arith.addf %172, %174 : vector<4x256xf32>
    %cst_162 = arith.constant 0.000000e+00 : f32
    %176 = vector.broadcast %cst_162 : f32 to vector<4x256xf32>
    %177 = arith.cmpf oge, %175, %176 : vector<4x256xf32>
    %cst_163 = arith.constant 5.000000e-02 : f32
    %178 = vector.broadcast %cst_163 : f32 to vector<4x256xf32>
    %179 = arith.mulf %178, %175 : vector<4x256xf32>
    %180 = arith.select %177, %175, %179 : vector<4x256xi1>, vector<4x256xf32>
    %c0_164 = arith.constant 0 : index
    %c0_165 = arith.constant 0 : index
    %181 = vector.load %arg15[%c0_164, %c0_165] : memref<4x256xf32, #tpu.memory_space<vmem>>, vector<4x256xf32>
    %182 = arith.mulf %180, %181 : vector<4x256xf32>
    %cst_166 = arith.constant dense<0.000000e+00> : vector<4xf32>
    %183 = vector.multi_reduction <add>, %182, %cst_166 [1] : vector<4x256xf32> to vector<4xf32>
    %184 = vector.shape_cast %183 : vector<4xf32> to vector<4x1xf32>
    %cst_167 = arith.constant dense<0.000000e+00> : vector<1xf32>
    %185 = vector.multi_reduction <add>, %184, %cst_167 [0] : vector<4x1xf32> to vector<1xf32>
    %186 = vector.shape_cast %185 : vector<1xf32> to vector<1x1xf32>
    %c0_168 = arith.constant 0 : index
    %c0_169 = arith.constant 0 : index
    %c0_170 = arith.constant 0 : index
    %187 = vector.load %arg2[%c0_168, %c0_169, %c0_170] : memref<1x1x5xf32, #tpu.memory_space<vmem>>, vector<1x1x5xf32>
    %188 = vector.shape_cast %187 : vector<1x1x5xf32> to vector<1x5xf32>
    %c0_171 = arith.constant 0 : index
    %c0_172 = arith.constant 0 : index
    %189 = vector.load %arg16[%c0_171, %c0_172] : memref<1x5xf32, #tpu.memory_space<vmem>>, vector<1x5xf32>
    %190 = arith.mulf %188, %189 : vector<1x5xf32>
    %cst_173 = arith.constant dense<0.000000e+00> : vector<1xf32>
    %191 = vector.multi_reduction <add>, %190, %cst_173 [1] : vector<1x5xf32> to vector<1xf32>
    %192 = vector.shape_cast %191 : vector<1xf32> to vector<1x1xf32>
    %193 = arith.addf %186, %192 : vector<1x1xf32>
    %c0_174 = arith.constant 0 : index
    %c0_175 = arith.constant 0 : index
    %194 = vector.load %arg17[%c0_174, %c0_175] : memref<1x1xf32, #tpu.memory_space<vmem>>, vector<1x1xf32>
    %195 = arith.addf %193, %194 : vector<1x1xf32>
    %c0_176 = arith.constant 0 : index
    %c0_177 = arith.constant 0 : index
    %c0_178 = arith.constant 0 : index
    %196 = vector.load %arg18[%c0_176, %c0_177, %c0_178] : memref<1x1x1xf32, #tpu.memory_space<vmem>>, vector<1x1x1xf32>
    %197 = vector.shape_cast %196 : vector<1x1x1xf32> to vector<1x1xf32>
    %198 = vector.shape_cast %195 : vector<1x1xf32> to vector<1x1x1xf32>
    tpu.vector_store %arg18[%c0_176, %c0_177, %c0_178], %198 {strides = array<i32>} : memref<1x1x1xf32, #tpu.memory_space<vmem>>, vector<1x1x1xf32>,
    return
  }
  func.func @transform_0(%arg0: i32) -> (i32, i32, i32) {
    %c0_i32 = arith.constant 0 : i32
    %c0_i32_0 = arith.constant 0 : i32
    %c0_i32_1 = arith.constant 0 : i32
    return %arg0, %c0_i32, %c0_i32_0 : i32, i32, i32
  }
  func.func @transform_1(%arg0: i32) -> (i32, i32, i32) {
    %c0_i32 = arith.constant 0 : i32
    %c0_i32_0 = arith.constant 0 : i32
    %c0_i32_1 = arith.constant 0 : i32
    return %arg0, %c0_i32, %c0_i32_0 : i32, i32, i32
  }
  func.func @transform_2(%arg0: i32) -> (i32, i32, i32) {
    %c0_i32 = arith.constant 0 : i32
    %c0_i32_0 = arith.constant 0 : i32
    %c0_i32_1 = arith.constant 0 : i32
    %c0_i32_2 = arith.constant 0 : i32
    return %c0_i32, %c0_i32_0, %c0_i32_1 : i32, i32, i32
  }
  func.func @transform_3(%arg0: i32) -> (i32, i32, i32) {
    %c0_i32 = arith.constant 0 : i32
    %c0_i32_0 = arith.constant 0 : i32
    %c0_i32_1 = arith.constant 0 : i32
    %c0_i32_2 = arith.constant 0 : i32
    return %c0_i32, %c0_i32_0, %c0_i32_1 : i32, i32, i32
  }
  func.func @transform_4(%arg0: i32) -> (i32, i32) {
    %c0_i32 = arith.constant 0 : i32
    %c0_i32_0 = arith.constant 0 : i32
    %c0_i32_1 = arith.constant 0 : i32
    return %c0_i32, %c0_i32_0 : i32, i32
  }
  func.func @transform_5(%arg0: i32) -> (i32, i32, i32) {
    %c0_i32 = arith.constant 0 : i32
    %c0_i32_0 = arith.constant 0 : i32
    %c0_i32_1 = arith.constant 0 : i32
    %c0_i32_2 = arith.constant 0 : i32
    return %c0_i32, %c0_i32_0, %c0_i32_1 : i32, i32, i32
  }
  func.func @transform_6(%arg0: i32) -> (i32, i32, i32) {
    %c0_i32 = arith.constant 0 : i32
    %c0_i32_0 = arith.constant 0 : i32
    %c0_i32_1 = arith.constant 0 : i32
    %c0_i32_2 = arith.constant 0 : i32
    return %c0_i32, %c0_i32_0, %c0_i32_1 : i32, i32, i32
  }
  func.func @transform_7(%arg0: i32) -> (i32, i32) {
    %c0_i32 = arith.constant 0 : i32
    %c0_i32_0 = arith.constant 0 : i32
    %c0_i32_1 = arith.constant 0 : i32
    return %c0_i32, %c0_i32_0 : i32, i32
  }
  func.func @transform_8(%arg0: i32) -> (i32, i32, i32) {
    %c0_i32 = arith.constant 0 : i32
    %c0_i32_0 = arith.constant 0 : i32
    %c0_i32_1 = arith.constant 0 : i32
    %c0_i32_2 = arith.constant 0 : i32
    return %c0_i32, %c0_i32_0, %c0_i32_1 : i32, i32, i32
  }
  func.func @transform_9(%arg0: i32) -> (i32, i32, i32) {
    %c0_i32 = arith.constant 0 : i32
    %c0_i32_0 = arith.constant 0 : i32
    %c0_i32_1 = arith.constant 0 : i32
    %c0_i32_2 = arith.constant 0 : i32
    return %c0_i32, %c0_i32_0, %c0_i32_1 : i32, i32, i32
  }
  func.func @transform_10(%arg0: i32) -> (i32, i32) {
    %c0_i32 = arith.constant 0 : i32
    %c0_i32_0 = arith.constant 0 : i32
    %c0_i32_1 = arith.constant 0 : i32
    return %c0_i32, %c0_i32_0 : i32, i32
  }
  func.func @transform_11(%arg0: i32) -> (i32, i32, i32) {
    %c0_i32 = arith.constant 0 : i32
    %c0_i32_0 = arith.constant 0 : i32
    %c0_i32_1 = arith.constant 0 : i32
    %c0_i32_2 = arith.constant 0 : i32
    return %c0_i32, %c0_i32_0, %c0_i32_1 : i32, i32, i32
  }
  func.func @transform_12(%arg0: i32) -> (i32, i32, i32) {
    %c0_i32 = arith.constant 0 : i32
    %c0_i32_0 = arith.constant 0 : i32
    %c0_i32_1 = arith.constant 0 : i32
    %c0_i32_2 = arith.constant 0 : i32
    return %c0_i32, %c0_i32_0, %c0_i32_1 : i32, i32, i32
  }
  func.func @transform_13(%arg0: i32) -> (i32, i32) {
    %c0_i32 = arith.constant 0 : i32
    %c0_i32_0 = arith.constant 0 : i32
    %c0_i32_1 = arith.constant 0 : i32
    return %c0_i32, %c0_i32_0 : i32, i32
  }
  func.func @transform_14(%arg0: i32) -> (i32, i32) {
    %c0_i32 = arith.constant 0 : i32
    %c0_i32_0 = arith.constant 0 : i32
    %c0_i32_1 = arith.constant 0 : i32
    return %c0_i32, %c0_i32_0 : i32, i32
  }
  func.func @transform_15(%arg0: i32) -> (i32, i32) {
    %c0_i32 = arith.constant 0 : i32
    %c0_i32_0 = arith.constant 0 : i32
    %c0_i32_1 = arith.constant 0 : i32
    return %c0_i32, %c0_i32_0 : i32, i32
  }
  func.func @transform_16(%arg0: i32) -> (i32, i32) {
    %c0_i32 = arith.constant 0 : i32
    %c0_i32_0 = arith.constant 0 : i32
    %c0_i32_1 = arith.constant 0 : i32
    return %c0_i32, %c0_i32_0 : i32, i32
  }
  func.func @transform_17(%arg0: i32) -> (i32, i32, i32) {
    %c0_i32 = arith.constant 0 : i32
    %c0_i32_0 = arith.constant 0 : i32
    %c0_i32_1 = arith.constant 0 : i32
    return %arg0, %c0_i32, %c0_i32_0 : i32, i32, i32
  }
}

</mosaic_0001>

<bundles_post_ra>
// kernel: discriminator_forward.1
= control target key start
LH: loop header
LB: loop body
LE: loop exit
PB: predicated region body
PF: predicated region fallthrough
CT: control target
= control target key end

     0   :  { %s11635_s0 = inlined_call_operand.vmem [shape: bf16[2,66,198], index: 0, kind: input, shape index: {}]   ;;  %s11636_s1 = inlined_call_operand.vmem [shape: f32[2,1,5], index: 1, kind: input, shape index: {}]   ;;  %s11637_s2 = inlined_call_operand.hbm [shape: bf16[4,32,66], index: 2, kind: input, shape index: {}]   ;;  %s11638_s3 = inlined_call_operand.vmem [shape: bf16[4,198,256], index: 3, kind: input, shape index: {}]   ;;  %s11639_s4 = inlined_call_operand.vmem [shape: f32[1,256], index: 4, kind: input, shape index: {}]   ;;  %s11640_s5 = inlined_call_operand.vmem [shape: bf16[4,16,34], index: 5, kind: input, shape index: {}]   ;;  %s11641_s6 = inlined_call_operand.hbm [shape: bf16[4,272,256], index: 6, kind: input, shape index: {}]   ;;  %s11642_s7 = inlined_call_operand.vmem [shape: f32[1,256], index: 7, kind: input, shape index: {}]   ;;  %s11643_s8 = inlined_call_operand.vmem [shape: bf16[4,8,18], index: 8, kind: input, shape index: {}]   ;;  %s11644_s9 = inlined_call_operand.vmem [shape: bf16[4,288,256], index: 9, kind: input, shape index: {}]   ;;  %s11645_s10 = inlined_call_operand.hbm [shape: f32[1,256], index: 10, kind: input, shape index: {}]   ;;  %s11646_s11 = inlined_call_operand.vmem [shape: bf16[4,4,10], index: 11, kind: input, shape index: {}]   ;;  %s11647_s12 = inlined_call_operand.vmem [shape: bf16[4,320,256], index: 12, kind: input, shape index: {}]   ;;  %s11648_s13 = inlined_call_operand.hbm [shape: f32[1,256], index: 13, kind: input, shape index: {}]   ;;  %s11649_s14 = inlined_call_operand.hbm [shape: f32[4,256], index: 14, kind: input, shape index: {}]   ;;  %s11650_s15 = inlined_call_operand.hbm [shape: f32[1,5], index: 15, kind: input, shape index: {}]   ;;  %s11651_s16 = inlined_call_operand.<no memory space> [shape: f32[1,1], index: 16, kind: input, shape index: {}]   ;;  %s11652_s17 = inlined_call_operand.vmem [shape: f32[2,1,1], index: 17, kind: output, shape index: {}]  }
   0x1   :  { %11661 = sst [smem:[#allocation20_spill]] %s11635_s0  ;;  %v22_v0 = vstv %s11651_s16 }
   0x2   :  { %11662 = sst [smem:[#allocation21_spill]] %s11636_s1  ;;  %23 = vst [vmem:[#allocation5] sm:$0x1] %v22_v0 }
   0x3   :  { %24 = vsyncpa [#allocation7], 0 }
   0x4   :  { %25 = vsyncpa [#allocation9], 0 }
   0x5   :  { %26 = vsyncpa [#allocation12], 0 }
   0x6   :  { %27 = vsyncpa [#allocation15], 0  ;;  %s9732_s26 = smov 0  }
   0x7 LB: > { %s9623_s27 = smov [#allocation8]   ;;  %s9738_s29 = sadd.s32 4294967295, %s9621_s26   ;;  %s9621_s26 = sphi %s9732_s26, %s33_s26  }
   0x8   : > { %s465_s28 = sshll.u32 %s9623_s27, 4  ;;  %p7366_p0 = scmp.ge.s32.totalorder %s9621_s26, 1  ;;  %s466_s28 = int_to_ptr.vmem [resolvable:$true] %s465_s28 }
   0x9   : > { %p431_p1 = scmp.lt.s32.totalorder %s9621_s26, 3  ;;  %p11653_p2 = scmp.eq.s32.totalorder %s9738_s29, 0 }
   0xa   : > { %s9624_s0 = smov [#allocation11]   ;;  %s9625_s19 = smov [#allocation6]  }
   0xb   : > { %p9743_p3 = pnand %p7366_p0, %p431_p1  ;;  %s505_s30 = sshll.u32 %s9624_s0, 4  ;;  %s506_s30 = int_to_ptr.vmem [resolvable:$true] %s505_s30 }
   0xc   : > { %s443_s1 = sshll.u32 %s9625_s19, 4  ;;  %s9454_s21 = scalar_lea.vmem %s466_s28, 17408  ;;  %s9755_s1 = int_to_ptr.vmem [resolvable:$true] %s443_s1 }
   0xd   : > { %s11663_s16 = scalar_select %p9743_p3, 1, 0 }
   0xe   : > { %p8526_p4 = pneg %p9743_p3  ;;  %p9455_p7 = scmp.ne.s32.totalorder %s466_s28, %s9454_s21 }
   0xf   : > { %p9462_p10 = scmp.lt.s32.totalorder %s466_s28, %s466_s28  ;;  %p9463_p11 = scmp.lt.s32.totalorder %s9454_s21, %s9454_s21 }
  0x10   : > { %p9751_p5 = pnand %p11653_p2, %p8526_p4 }
  0x11   : > { %p9464_p12 = por %p9463_p11, %p9462_p10 }
  0x12   : > { %p9759_p6 = pneg %p9751_p5 }
  0x14   : > { %p9457_p8 = pnand %p9455_p7, %p9759_p6 }
  0x16   : > { %p9458_p9 = pneg %p9457_p8 }
  0x18   : > { %p9465_p13 = pnand %p9464_p12, %p9458_p9 }
  0x1a   : > { %9468 = shalt.err (!%p9465_p13)
}
  0x1b   : > { %s9626_s22 = smov 128   ;;  %s9627_s23 = smov 8  }
  0x1c   : > { %8532 = dma.hbm_to_vmem [thread:$0]  (!%p9751_p5), %s11641_s6, 17408, %s466_s28, [#allocation9], %s9626_s22, %s9626_s22, %s9627_s23  }
  0x1d   : > { %s9480_s27 = scalar_lea.vmem %s506_s30, 32  ;;  %p9488_p7 = scmp.lt.s32.totalorder %s506_s30, %s506_s30 }
  0x1e   : > { %p9481_p0 = scmp.ne.s32.totalorder %s506_s30, %s9480_s27  ;;  %p9489_p8 = scmp.lt.s32.totalorder %s9480_s27, %s9480_s27 }
  0x20   : > { %p9483_p1 = pnand %p9481_p0, %p9759_p6  ;;  %p9490_p2 = por %p9489_p8, %p9488_p7 }
  0x22   : > { %p9484_p4 = pneg %p9483_p1 }
  0x24   : > { %p9491_p10 = pnand %p9490_p2, %p9484_p4 }
  0x26   : > { %9494 = shalt.err (!%p9491_p10)
}
  0x27   : > { %8538 = dma.hbm_to_vmem [thread:$0]  (!%p9751_p5), %s11648_s13, 32, %s506_s30, [#allocation12]  }
  0x28   : > { %s9506_s28 = scalar_lea.vmem %s9755_s1, 1024  ;;  %p9514_p13 = scmp.lt.s32.totalorder %s9755_s1, %s9755_s1 }
  0x29   : > { %p9507_p9 = scmp.ne.s32.totalorder %s9755_s1, %s9506_s28  ;;  %p9515_p0 = scmp.lt.s32.totalorder %s9506_s28, %s9506_s28 }
  0x2b   : > { %p9509_p11 = pnand %p9507_p9, %p9759_p6  ;;  %p9516_p2 = por %p9515_p0, %p9514_p13 }
  0x2d   : > { %p9510_p12 = pneg %p9509_p11 }
  0x2f   : > { %p9517_p1 = pnand %p9516_p2, %p9510_p12 }
  0x31   : > { %9520 = shalt.err (!%p9517_p1)
}
  0x32   : > { %s9628_s21 = smov 64   ;;  %s9629_s22 = smov 4  }
  0x33   : > { %8529 = dma.hbm_to_vmem [thread:$0]  (!%p9751_p5), %s11637_s2, 1024, %s9755_s1, [#allocation7], %s9628_s21, %s9628_s21, %s9629_s22  }
  0x34   : > { %s9630_s30 = smov [#allocation10]   ;;  %s9631_s27 = smov [#allocation13]  }
  0x35   : > { %s488_s25 = sshll.u32 %s9630_s30, 4  ;;  %s516_s0 = sshll.u32 %s9631_s27, 4  ;;  %s489_s25 = int_to_ptr.vmem [resolvable:$true] %s488_s25  ;;  %s517_s0 = int_to_ptr.vmem [resolvable:$true] %s516_s0 }
  0x36   : > { %s9532_s19 = scalar_lea.vmem %s489_s25, 32  ;;  %p9540_p10 = scmp.lt.s32.totalorder %s489_s25, %s489_s25 }
  0x37   : > { %p9533_p4 = scmp.ne.s32.totalorder %s489_s25, %s9532_s19  ;;  %p9541_p9 = scmp.lt.s32.totalorder %s9532_s19, %s9532_s19 }
  0x39   : > { %p9535_p7 = pnand %p9533_p4, %p9759_p6  ;;  %p9542_p11 = por %p9541_p9, %p9540_p10 }
  0x3b   : > { %p9536_p8 = pneg %p9535_p7 }
  0x3d   : > { %p9543_p12 = pnand %p9542_p11, %p9536_p8 }
  0x3f   : > { %9546 = shalt.err (!%p9543_p12)
}
  0x40   : > { %8535 = dma.hbm_to_vmem [thread:$0]  (!%p9751_p5), %s11645_s10, 32, %s489_s25, [#allocation9]  }
  0x41   : > { %s9558_s21 = scalar_lea.vmem %s517_s0, 128  ;;  %p9566_p1 = scmp.lt.s32.totalorder %s517_s0, %s517_s0 }
  0x42   : > { %p9559_p13 = scmp.ne.s32.totalorder %s517_s0, %s9558_s21  ;;  %p9567_p4 = scmp.lt.s32.totalorder %s9558_s21, %s9558_s21 }
  0x44   : > { %p9561_p0 = pnand %p9559_p13, %p9759_p6  ;;  %p9568_p7 = por %p9567_p4, %p9566_p1 }
  0x46   : > { %p9562_p2 = pneg %p9561_p0 }
  0x48   : > { %p9569_p3 = pnand %p9568_p7, %p9562_p2 }
  0x4a   : > { %9572 = shalt.err (!%p9569_p3)
}
  0x4b   : > { %8541 = dma.hbm_to_vmem [thread:$0]  (!%p9751_p5), %s11649_s14, 128, %s517_s0, [#allocation12]  }
  0x4c   : > { %s9632_s24 = smov [#allocation14]  }
  0x4d   : > { %s527_s30 = sshll.u32 %s9632_s24, 4  ;;  %s528_s30 = int_to_ptr.vmem [resolvable:$true] %s527_s30 }
  0x4e   : > { %s9584_s25 = scalar_lea.vmem %s528_s30, 16  ;;  %s9591_s27 = scalar_lea.vmem %s528_s30, 32 }
  0x4f   : > { %p9585_p8 = scmp.ne.s32.totalorder %s528_s30, %s9584_s25  ;;  %p9592_p11 = scmp.lt.s32.totalorder %s528_s30, %s528_s30 }
  0x50   : > { %p9593_p12 = scmp.lt.s32.totalorder %s9591_s27, %s9584_s25 }
  0x51   : > { %p9587_p10 = pnand %p9585_p8, %p9759_p6 }
  0x52   : > { %p9594_p13 = por %p9593_p12, %p9592_p11 }
  0x53   : > { %p9588_p9 = pneg %p9587_p10 }
  0x55   : > { %p9595_p3 = pnand %p9594_p13, %p9588_p9 }
  0x57   : > { %9598 = shalt.err (!%p9595_p3)
}
  0x58   : > { %8544 = dma.hbm_to_vmem [thread:$0]  (!%p9751_p5), %s11650_s15, 16, %s528_s30, [#allocation15]  }
  0x59   : > { %p11666_p0 = scmp.ne.s32.totalorder %s11663_s16, 0 }
  0x5a   : > { %p11667_p2 = scmp.eq.s32.totalorder (!%p11666_p0), %s9738_s29, 0 }
  0x5b   : > { %557 = sbr.rel (%p11666_p0) target bundleno = 4046 (0xfce), region = 88 }
  0x60   : > { %9604 = dma.done.wait (%p11667_p2), [#allocation7], 1024   ;;  %p11668_p6 = pmov %p11667_p2 }
  0x61   : > { %p11669_p1 = pmov %p11667_p2 }
  0x62   : > { %9606 = vsyncadd (%p11668_p6), [#allocation7], 4294966272 }
  0x63   : > { %9608 = dma.done.wait (%p11669_p1), [#allocation9], 17440   ;;  %p11670_p4 = pmov %p11669_p1 }
  0x64   : > { %p11671_p7 = pmov %p11669_p1 }
  0x65   : > { %9610 = vsyncadd (%p11670_p4), [#allocation9], 4294949856 }
  0x66   : > { %9612 = dma.done.wait (%p11671_p7), [#allocation12], 160   ;;  %p11672_p5 = pmov %p11669_p1 }
  0x67   : > { %p11673_p8 = pmov %p11669_p1 }
  0x68   : > { %9614 = vsyncadd (%p11672_p5), [#allocation12], 4294967136 }
  0x69   : > { %9616 = dma.done.wait (%p11673_p8), [#allocation15], 16   ;;  %p11674_p10 = pmov %p11669_p1 }
  0x6a   : > { %p630_p9 = scmp.lt.s32.totalorder %s9738_s29, 1  ;;  %v9633_v1 = vmov 0   ;;  %s11675_s0 = sld [smem:[#allocation20_spill]]  ;;  %vm717_vm0 = vcmask 1040384   ;;  %v8601_v14 = vld [vmem:[%s11638_s3 + $0x13c] ss:$8 sps:$4 sm:$0xff]  }
  0x6b   : > { %9618 = vsyncadd (%p11674_p10), [#allocation15], 4294967280  ;;  %756 = vmatprep.mubr.bf16.mxu0 %v9633_v1  ;;  %1943 = vst [vmem:[#allocation2 + $0xc] sm:$0xff] %v9633_v1  ;;  %859 = vmatprep.mubr.bf16.mxu1 %v9633_v1  ;;  %v8604_v15 = vld [vmem:[%s11638_s3 + $0x74] ss:$8 sps:$4 sm:$0xff]   ;;  %v8596_v17 = vld [vmem:[#allocation6 + $0x10] sm:$0xff]  }
  0x6c   : > { %1945 = vst [vmem:[#allocation2 + $0x18] sm:$0xff] %v9633_v1  ;;  %1947 = vst [vmem:[#allocation2 + $0x24] sm:$0xff] %v9633_v1  ;;  %s11700_s29 = smov (!%p630_p9, %s9738_s29), 1  ;;  %v8595_v16 = vld [vmem:[#allocation6] sm:$0xff]   ;;  %vm710_vm1 = vcmask 539648   ;;  %v8597_v22 = vld [vmem:[#allocation6 + $0x8] sm:$0xff]  }
  0x6d   : > { %1949 = vst [vmem:[#allocation2 + $0x30] sm:$0x11] %v9633_v1  ;;  %3746 = vst [vmem:[#allocation3 + $0xc] sm:$0xff] %v9633_v1  ;;  %s8501_s16 = smul.u32 72, %s11700_s29  ;;  %v8599_v18 = vld [vmem:[%s11638_s3 + $0x138] ss:$8 sps:$4 sm:$0xff]   ;;  %s640_s21 = scalar_lea.vmem %s11652_s17, %s11700_s29 }
  0x6e   : > { %3748 = vst [vmem:[#allocation3 + $0x18] sm:$0x11] %v9633_v1  ;;  %5453 = vst [vmem:[#allocation4 + $0xc] sm:$0x11] %v9633_v1  ;;  %v8602_v19 = vld [vmem:[%s11638_s3 + $0x70] ss:$8 sps:$4 sm:$0xff]  }
  0x6f   : > { %v8607_v20 = vld [vmem:[%s11638_s3 + $0x12c] ss:$8 sps:$4 sm:$0xff]   ;;  %v8605_v23 = vld [vmem:[%s11638_s3 + $0x128] ss:$8 sps:$4 sm:$0xff]   ;;  %v8613_v25 = vld [vmem:[%s11638_s3 + $0x11c] ss:$8 sps:$4 sm:$0xff]  }
  0x70   : > { %s9836_s1 = scalar_lea.vmem %s11675_s0, %s8501_s16  ;;  %v8610_v21 = vld [vmem:[%s11638_s3 + $0x64] ss:$8 sps:$4 sm:$0xff]   ;;  %v8608_v24 = vld [vmem:[%s11638_s3 + $0x60] ss:$8 sps:$4 sm:$0xff]   ;;  %v8616_v26 = vld [vmem:[%s11638_s3 + $0x54] ss:$8 sps:$4 sm:$0xff]  }
  0x71   : > { %v650_v2 = vld [vmem:[%s9836_s1 + $0x40] sm:$0x11]  ;;  %v8583_v5 = vld [vmem:[%s9836_s1 + $0x34] ss:$8 sps:$4 sm:$0xff]   ;;  %v8585_v7 = vld [vmem:[%s9836_s1 + $0x30] ss:$8 sps:$4 sm:$0xff]  }
  0x72   : > { %v9839_v3 = vcombine.high %v650_v2, %v650_v2  ;;  %v7392_v4 = vcombine.low %v650_v2, %v650_v2  ;;  %v8586_v8 = vld [vmem:[%s9836_s1 + $0x24] ss:$8 sps:$4 sm:$0xff]   ;;  %v8588_v9 = vld [vmem:[%s9836_s1 + $0x20] ss:$8 sps:$4 sm:$0xff]   ;;  %v8589_v10 = vld [vmem:[%s9836_s1 + $0x14] ss:$8 sps:$4 sm:$0xff]  }
  0x73   : > { %v8591_v11 = vld [vmem:[%s9836_s1 + $0x10] ss:$8 sps:$4 sm:$0xff]   ;;  %v8592_v12 = vld [vmem:[%s9836_s1 + $0x4] ss:$8 sps:$4 sm:$0xff]   ;;  %v8594_v13 = vld [vmem:[%s9836_s1] ss:$8 sps:$4 sm:$0xff]  }
  0x74   : > { %7394 = vmatprep.subr.msk.bf16.mxu0 %vm717_vm0, %v9839_v3  ;;  %7399 = vmatprep.subr.msk.bf16.mxu1 %vm717_vm0, %v9839_v3  ;;  %v9847_v6 = vsel %vm717_vm0, %v7392_v4, 0  ;;  %v8598_v27 = vld [vmem:[#allocation6 + $0x18] sm:$0xff]   ;;  %v8622_v31 = vld [vmem:[%s11638_s3 + $0x44] ss:$8 sps:$4 sm:$0xff]   ;;  %v8620_v33 = vld [vmem:[%s11638_s3 + $0x40] ss:$8 sps:$4 sm:$0xff]  }
  0x75   : > { %731 = vmatpush1.bf16.msra.mxu0 %v9847_v6  ;;  %834 = vmatpush1.bf16.msra.mxu1 %v9847_v6  ;;  %v8611_v28 = vld [vmem:[%s11638_s3 + $0x118] ss:$8 sps:$4 sm:$0xff]   ;;  %v8619_v30 = vld [vmem:[%s11638_s3 + $0x10c] ss:$8 sps:$4 sm:$0xff]   ;;  %v8617_v32 = vld [vmem:[%s11638_s3 + $0x108] ss:$8 sps:$4 sm:$0xff]  }
  0x76   : > { %732 = vmatprep.subr.bf16.mxu0 %v8583_v5  ;;  %835 = vmatprep.subr.bf16.mxu1 %v8583_v5  ;;  %v8614_v29 = vld [vmem:[%s11638_s3 + $0x50] ss:$8 sps:$4 sm:$0xff]   ;;  %v8625_v34 = vld [vmem:[%s11638_s3 + $0xfc] ss:$8 sps:$4 sm:$0xff]   ;;  %v8631_v38 = vld [vmem:[%s11638_s3 + $0xec] ss:$8 sps:$4 sm:$0xff]  }
  0x77   : > { %v8628_v35 = vld [vmem:[%s11638_s3 + $0x34] ss:$8 sps:$4 sm:$0xff]   ;;  %v8623_v36 = vld [vmem:[%s11638_s3 + $0xf8] ss:$8 sps:$4 sm:$0xff]   ;;  %v8634_v39 = vld [vmem:[%s11638_s3 + $0x24] ss:$8 sps:$4 sm:$0xff]  }
  0x78   : > { %v8626_v37 = vld [vmem:[%s11638_s3 + $0x30] ss:$8 sps:$4 sm:$0xff]   ;;  %v8632_v41 = vld [vmem:[%s11638_s3 + $0x20] ss:$8 sps:$4 sm:$0xff]   ;;  %v8637_v42 = vld [vmem:[%s11638_s3 + $0xdc] ss:$8 sps:$4 sm:$0xff]  }
  0x79   : > { %733 = vmatpush1.bf16.msra.mxu0 %v8585_v7  ;;  %836 = vmatpush1.bf16.msra.mxu1 %v8585_v7  ;;  %v8629_v40 = vld [vmem:[%s11638_s3 + $0xe8] ss:$8 sps:$4 sm:$0xff]   ;;  %v8640_v43 = vld [vmem:[%s11638_s3 + $0x14] ss:$8 sps:$4 sm:$0xff]   ;;  %v8635_v44 = vld [vmem:[%s11638_s3 + $0xd8] ss:$8 sps:$4 sm:$0xff]  }
  0x7a   : > { %734 = vmatprep.subr.bf16.mxu0 %v8586_v8  ;;  %837 = vmatprep.subr.bf16.mxu1 %v8586_v8  ;;  %v8638_v45 = vld [vmem:[%s11638_s3 + $0x10] ss:$8 sps:$4 sm:$0xff]   ;;  %v8643_v46 = vld [vmem:[%s11638_s3 + $0xcc] ss:$8 sps:$4 sm:$0xff]   ;;  %v805_v49 = vld [vmem:[%s11638_s3 + $0xc0] sm:$0x77] }
  0x7b   : > { %v8646_v47 = vld [vmem:[%s11638_s3 + $0x4] ss:$8 sps:$4 sm:$0xff]   ;;  %v8641_v50 = vld [vmem:[%s11638_s3 + $0xc8] ss:$8 sps:$4 sm:$0xff]   ;;  %v7481_v54 = vcombine.high %v805_v49, %v805_v49  ;;  %v7480_v55 = vcombine.low %v805_v49, %v805_v49  ;;  %vm1042_vm2 = vcmask 1042432   ;;  %vm1035_vm3 = vcmask 572416  }
  0x7c   : > { %v7426_v48 = vld [vmem:[%s11638_s3 + $0x188] sm:$0x77]  ;;  %v8653_v56 = vld [vmem:[%s11638_s3 + $0x17c] ss:$8 sps:$4 sm:$0xff]   ;;  %v8651_v60 = vld [vmem:[%s11638_s3 + $0x178] ss:$8 sps:$4 sm:$0xff]  }
  0x7d   : > { %735 = vmatpush1.bf16.msra.mxu0 %v8588_v9  ;;  %838 = vmatpush1.bf16.msra.mxu1 %v8588_v9  ;;  %v8644_v51 = vld [vmem:[%s11638_s3] ss:$8 sps:$4 sm:$0xff]   ;;  %v7452_v52 = vcombine.high %v7426_v48, %v7426_v48  ;;  %v7451_v53 = vcombine.low %v7426_v48, %v7426_v48  ;;  %v8656_v57 = vld [vmem:[%s11638_s3 + $0xb4] ss:$8 sps:$4 sm:$0xff]   ;;  %v1234_v59 = vsel %vm1042_vm2, %v7480_v55, 0  ;;  %vm11655_vm4 = vcmask 122880  }
  0x7e   : > { %736 = vmatprep.subr.bf16.mxu0 %v8589_v10  ;;  %839 = vmatprep.subr.bf16.mxu1 %v8589_v10  ;;  %v8654_v61 = vld [vmem:[%s11638_s3 + $0xb0] ss:$8 sps:$4 sm:$0xff]   ;;  %v8659_v62 = vld [vmem:[%s11638_s3 + $0x16c] ss:$8 sps:$4 sm:$0xff]   ;;  %v8665_v2 = vld [vmem:[%s11638_s3 + $0x15c] ss:$8 sps:$4 sm:$0xff]  }
  0x7f   : > { %v1044_v58 = vsel %vm1042_vm2, %v7451_v53, 0  ;;  %v8662_v63 = vld [vmem:[%s11638_s3 + $0xa4] ss:$8 sps:$4 sm:$0xff]   ;;  %v8657_v0 = vld [vmem:[%s11638_s3 + $0x168] ss:$8 sps:$4 sm:$0xff]   ;;  %v8675_v55 = vld [vmem:[#allocation6 + $0x20] sm:$0xff]  }
  0x80   : > { %v8663_v4 = vld [vmem:[%s11638_s3 + $0x158] ss:$8 sps:$4 sm:$0xff]   ;;  %v8668_v5 = vld [vmem:[%s11638_s3 + $0x94] ss:$8 sps:$4 sm:$0xff]   ;;  %v8669_v9 = vld [vmem:[%s11638_s3 + $0x148] ss:$8 sps:$4 sm:$0xff]  }
  0x81   : > { %737 = vmatpush1.bf16.msra.mxu0 %v8591_v11  ;;  %840 = vmatpush1.bf16.msra.mxu1 %v8591_v11  ;;  %v8666_v7 = vld [vmem:[%s11638_s3 + $0x90] ss:$8 sps:$4 sm:$0xff]   ;;  %v8671_v8 = vld [vmem:[%s11638_s3 + $0x14c] ss:$8 sps:$4 sm:$0xff]   ;;  %v8672_v11 = vld [vmem:[%s11638_s3 + $0x80] ss:$8 sps:$4 sm:$0xff]  }
  0x82   : > { %738 = vmatprep.subr.bf16.mxu0 %v8592_v12  ;;  %841 = vmatprep.subr.bf16.mxu1 %v8592_v12  ;;  %v8674_v10 = vld [vmem:[%s11638_s3 + $0x84] ss:$8 sps:$4 sm:$0xff]   ;;  %v9438_v48 = vld [vmem:[%s9836_s1 + $0x14] ss:$8 sps:$4 sm:$0xff]   ;;  %v8688_v49 = vld [vmem:[%s11638_s3 + $0x1d0] ss:$8 sps:$4 sm:$0xff]  }
  0x83   : > { %v8681_v12 = vld [vmem:[%s11638_s3 + $0x204] ss:$8 sps:$4 sm:$0xff]   ;;  %v8691_v53 = vld [vmem:[%s11638_s3 + $0x1c0] ss:$8 sps:$4 sm:$0xff]   ;;  %vm1972_vm11 = vsmask.f32 256 }
  0x84   : > { %vm1973_vm12 = vsmask.f32 4368  ;;  %vm11656_vm13 = vcmask 125952   ;;  %s9634_s22 = smov 8   ;;  %s9637_s20 = smov 16  }
  0x85   : > { %739 = vmatpush1.bf16.msra.mxu0 %v8594_v13  ;;  %842 = vmatpush1.bf16.msra.mxu1 %v8594_v13  ;;  %s11698_s16 = sld [smem:[#allocation21_spill]] }
  0x86   : > { %1049 = vmatprep.subr.bf16.mxu0 %v8601_v14  ;;  %1239 = vmatprep.subr.bf16.mxu1 %v8604_v15 }
  0x88   : > { %7395 = vmatmul.mubr.msk.bf16.vlgmr.msra.gmra.mxu0 %vm710_vm1, %v8595_v16  ;;  %7400 = vmatmul.mubr.msk.bf16.vlgmr.msra.gmra.mxu1 %vm710_vm1, %v8596_v17 }
  0x89   : > { %766 = vmatprep.mubr.bf16.mxu0 %v9633_v1  ;;  %869 = vmatprep.mubr.bf16.mxu1 %v9633_v1  ;;  %v8660_v1 = vld [vmem:[%s11638_s3 + $0xa0] ss:$8 sps:$4 sm:$0xff]  }
  0x8a   : > { %1050 = vmatpush1.bf16.msra.mxu0 %v8599_v18  ;;  %1240 = vmatpush1.bf16.msra.mxu1 %v8602_v19 }
  0x8b   : > { %1051 = vmatprep.subr.bf16.mxu0 %v8607_v20  ;;  %1241 = vmatprep.subr.bf16.mxu1 %v8610_v21  ;;  %s637_s18 = scalar_lea.vmem %s11698_s16, %s11700_s29 }
  0x8e   : > { %1052 = vmatpush1.bf16.msra.mxu0 %v8605_v23  ;;  %1242 = vmatpush1.bf16.msra.mxu1 %v8608_v24  ;;  %v8679_v24 = vld [vmem:[%s11638_s3 + $0x200] ss:$8 sps:$4 sm:$0xff]  }
  0x8f   : > { %1053 = vmatprep.subr.bf16.mxu0 %v8613_v25  ;;  %1243 = vmatprep.subr.bf16.mxu1 %v8616_v26 }
  0x90   : > { %7396 = vmatmul.mubr.msk.bf16.gmra.mxu0 %vm710_vm1, %v8597_v22  ;;  %7401 = vmatmul.mubr.msk.bf16.gmra.mxu1 %vm710_vm1, %v8598_v27 }
  0x92   : > { %1054 = vmatpush1.bf16.msra.mxu0 %v8611_v28  ;;  %1244 = vmatpush1.bf16.msra.mxu1 %v8614_v29  ;;  %v8684_v28 = vld [vmem:[%s11638_s3 + $0x1f4] ss:$8 sps:$4 sm:$0xff]  }
  0x93   : > { %1055 = vmatprep.subr.bf16.mxu0 %v8619_v30  ;;  %1245 = vmatprep.subr.bf16.mxu1 %v8622_v31  ;;  %v8682_v31 = vld [vmem:[%s11638_s3 + $0x1f0] ss:$8 sps:$4 sm:$0xff]  }
  0x96   : > { %1056 = vmatpush1.bf16.msra.mxu0 %v8617_v32  ;;  %1246 = vmatpush1.bf16.msra.mxu1 %v8620_v33 }
  0x97   : > { %1057 = vmatprep.subr.bf16.mxu0 %v8625_v34  ;;  %1247 = vmatprep.subr.bf16.mxu1 %v8628_v35  ;;  %v9433_v34 = vld [vmem:[%s9836_s1 + $0x34] ss:$8 sps:$4 sm:$0xff]   ;;  %v8687_v35 = vld [vmem:[%s11638_s3 + $0x1e4] ss:$8 sps:$4 sm:$0xff]  }
  0x9a   : > { %1058 = vmatpush1.bf16.msra.mxu0 %v8623_v36  ;;  %1248 = vmatpush1.bf16.msra.mxu1 %v8626_v37 }
  0x9b   : > { %1059 = vmatprep.subr.bf16.mxu0 %v8631_v38  ;;  %1249 = vmatprep.subr.bf16.mxu1 %v8634_v39 }
  0x9e   : > { %1060 = vmatpush1.bf16.msra.mxu0 %v8629_v40  ;;  %1250 = vmatpush1.bf16.msra.mxu1 %v8632_v41  ;;  %v9434_v41 = vld [vmem:[%s9836_s1 + $0x30] ss:$8 sps:$4 sm:$0xff]  }
  0x9f   : > { %1061 = vmatprep.subr.bf16.mxu0 %v8637_v42  ;;  %1251 = vmatprep.subr.bf16.mxu1 %v8640_v43  ;;  %v9435_v43 = vld [vmem:[%s9836_s1 + $0x24] ss:$8 sps:$4 sm:$0xff]  }
  0xa2   : > { %1062 = vmatpush1.bf16.msra.mxu0 %v8635_v44  ;;  %1252 = vmatpush1.bf16.msra.mxu1 %v8638_v45  ;;  %v8685_v44 = vld [vmem:[%s11638_s3 + $0x1e0] ss:$8 sps:$4 sm:$0xff]   ;;  %v8690_v45 = vld [vmem:[%s11638_s3 + $0x1d4] ss:$8 sps:$4 sm:$0xff]  }
  0xa3   : > { %1063 = vmatprep.subr.bf16.mxu0 %v8643_v46  ;;  %1253 = vmatprep.subr.bf16.mxu1 %v8646_v47  ;;  %v9436_v46 = vld [vmem:[%s9836_s1 + $0x20] ss:$8 sps:$4 sm:$0xff]   ;;  %v10048_v47 = vld [vmem:[#allocation2 + $0xc] sm:$0xff] }
  0xa4   : > { %1951 = vst.msk [vmem:[#allocation2 + $0x38] sm:$0x1] %vm11655_vm4, %v10048_v47 }
  0xa5   : > { %1948 = vst.msk [vmem:[#allocation2 + $0x2c] sm:$0xf] %vm11656_vm13, %v10048_v47  ;;  %1942 = vst.msk [vmem:[#allocation2 + $0x8] sm:$0xf] %vm11656_vm13, %v10048_v47 }
  0xa6   : > { %1064 = vmatpush1.bf16.msra.mxu0 %v8641_v50  ;;  %1254 = vmatpush1.bf16.msra.mxu1 %v8644_v51  ;;  %v8693_v50 = vld [vmem:[%s11638_s3 + $0x1c4] ss:$8 sps:$4 sm:$0xff]   ;;  %v9439_v51 = vld [vmem:[%s9836_s1 + $0x10] ss:$8 sps:$4 sm:$0xff]   ;;  %1944 = vst.msk [vmem:[#allocation2 + $0x14] sm:$0xf] %vm11656_vm13, %v10048_v47 }
  0xa7   : > { %7453 = vmatprep.subr.msk.bf16.mxu0 %vm1042_vm2, %v7452_v52  ;;  %7482 = vmatprep.subr.msk.bf16.mxu1 %vm1042_vm2, %v7481_v54  ;;  %v9440_v52 = vld [vmem:[%s9836_s1 + $0x4] ss:$8 sps:$4 sm:$0xff]   ;;  %v8696_v54 = vld [vmem:[%s11638_s3 + $0x1b4] ss:$8 sps:$4 sm:$0xff]   ;;  %1946 = vst.msk [vmem:[#allocation2 + $0x20] sm:$0xf] %vm11656_vm13, %v10048_v47 }
  0xaa   : > { %1072 = vmatpush2.bf16.msra.mxu0 %v1044_v58  ;;  %1262 = vmatpush2.bf16.msra.mxu1 %v1234_v59  ;;  %v8676_v58 = vld [vmem:[#allocation6 + $0x28] sm:$0xff]  }
  0xab   : > { %1073 = vmatprep.subr.bf16.mxu0 %v8653_v56  ;;  %1263 = vmatprep.subr.bf16.mxu1 %v8656_v57  ;;  %v9441_v56 = vld [vmem:[%s9836_s1] ss:$8 sps:$4 sm:$0xff]   ;;  %v8694_v57 = vld [vmem:[%s11638_s3 + $0x1b0] ss:$8 sps:$4 sm:$0xff]  }
  0xac   : > { %v8697_v59 = vld [vmem:[%s11638_s3 + $0x2c8] ss:$8 sps:$4 sm:$0xff]  }
  0xae   : > { %1074 = vmatpush2.bf16.msra.mxu0 %v8651_v60  ;;  %1264 = vmatpush2.bf16.msra.mxu1 %v8654_v61  ;;  %v8678_v60 = vld [vmem:[#allocation6 + $0x38] sm:$0xff]   ;;  %v8702_v61 = vld [vmem:[%s11638_s3 + $0x1a4] ss:$8 sps:$4 sm:$0xff]  }
  0xaf   : > { %1075 = vmatprep.subr.bf16.mxu0 %v8659_v62  ;;  %1265 = vmatprep.subr.bf16.mxu1 %v8662_v63  ;;  %v8705_v62 = vld [vmem:[%s11638_s3 + $0x2bc] ss:$8 sps:$4 sm:$0xff]   ;;  %v8700_v63 = vld [vmem:[%s11638_s3 + $0x1a0] ss:$8 sps:$4 sm:$0xff]  }
  0xb2   : > { %1076 = vmatpush2.bf16.msra.mxu0 %v8657_v0  ;;  %1266 = vmatpush2.bf16.msra.mxu1 %v8660_v1  ;;  %v8703_v0 = vld [vmem:[%s11638_s3 + $0x2b8] ss:$8 sps:$4 sm:$0xff]   ;;  %v8708_v1 = vld [vmem:[%s11638_s3 + $0x194] ss:$8 sps:$4 sm:$0xff]  }
  0xb3   : > { %1077 = vmatprep.subr.bf16.mxu0 %v8665_v2  ;;  %1267 = vmatprep.subr.bf16.mxu1 %v8668_v5  ;;  %v8711_v2 = vld [vmem:[%s11638_s3 + $0x2ac] ss:$8 sps:$4 sm:$0xff]   ;;  %v8709_v5 = vld [vmem:[%s11638_s3 + $0x2a8] ss:$8 sps:$4 sm:$0xff]  }
  0xb6   : > { %1078 = vmatpush2.bf16.msra.mxu0 %v8663_v4  ;;  %1268 = vmatpush2.bf16.msra.mxu1 %v8666_v7  ;;  %v8706_v4 = vld [vmem:[%s11638_s3 + $0x190] ss:$8 sps:$4 sm:$0xff]  }
  0xb7   : > { %1079 = vmatprep.subr.bf16.mxu0 %v8671_v8  ;;  %1269 = vmatprep.subr.bf16.mxu1 %v8674_v10  ;;  %v7514_v7 = vld [vmem:[%s11638_s3 + $0x250] sm:$0x77] }
  0xb8   : > { %v7540_v8 = vcombine.high %v7514_v7, %v7514_v7  ;;  %v7539_v10 = vcombine.low %v7514_v7, %v7514_v7 }
  0xba   : > { %1080 = vmatpush2.bf16.msra.mxu0 %v8669_v9  ;;  %1270 = vmatpush2.bf16.msra.mxu1 %v8672_v11  ;;  %v8715_v9 = vld [vmem:[%s11638_s3 + $0x29c] ss:$8 sps:$4 sm:$0xff]   ;;  %v8713_v11 = vld [vmem:[%s11638_s3 + $0x298] ss:$8 sps:$4 sm:$0xff]  }
  0xbb   : > { %7487 = vmatprep.subr.msk.bf16.mxu0 %vm717_vm0, %v9839_v3  ;;  %1533 = vmatprep.subr.bf16.mxu1 %v8681_v12  ;;  %v1528_v12 = vsel %vm1042_vm2, %v7539_v10, 0  ;;  %v8755_v10 = vld [vmem:[#allocation8 + $0x180] ss:$8 sps:$4 sm:$0xff]  }
 0x148   : > { %v758_v13 = vpop.f32.mrf.mxu0  ;;  %v861_v14 = vpop.f32.mrf.mxu1 }
 0x14a   : > { %v760_v15 = vpop.f32.mrf.mxu0  ;;  %v863_v16 = vpop.f32.mrf.mxu1 }
 0x14c   : > { %v762_v17 = vpop.f32.mrf.mxu0  ;;  %v865_v18 = vpop.f32.mrf.mxu1 }
 0x14d   : > { %v777_v19 = vpack.c.bf16 %v762_v17, %v758_v13  ;;  %v880_v25 = vpack.c.bf16 %v865_v18, %v861_v14  ;;  %v8719_v13 = vld [vmem:[%s11638_s3 + $0x244] ss:$8 sps:$4 sm:$0xff]   ;;  %v8723_v17 = vld [vmem:[%s11638_s3 + $0x230] ss:$8 sps:$4 sm:$0xff]   ;;  %v8725_v18 = vld [vmem:[%s11638_s3 + $0x234] ss:$8 sps:$4 sm:$0xff]  }
 0x14e   : > { %v764_v20 = vpop.f32.mrf.mxu0  ;;  %v867_v21 = vpop.f32.mrf.mxu1  ;;  %v8722_v14 = vld [vmem:[%s11638_s3 + $0x28c] ss:$8 sps:$4 sm:$0xff]  }
 0x14f   : > { %v778_v22 = vpack.c.bf16 %v764_v20, %v760_v15  ;;  %v881_v23 = vpack.c.bf16 %v867_v21, %v863_v16  ;;  %v8717_v15 = vld [vmem:[%s11638_s3 + $0x240] ss:$8 sps:$4 sm:$0xff]   ;;  %v8728_v20 = vld [vmem:[%s11638_s3 + $0x27c] ss:$8 sps:$4 sm:$0xff]  }
 0x150   : > { %v768_v26 = vpop.f32.mrf.mxu0  ;;  %v871_v27 = vpop.f32.mrf.mxu1  ;;  %v8720_v16 = vld [vmem:[%s11638_s3 + $0x288] ss:$8 sps:$4 sm:$0xff]   ;;  %v8731_v21 = vld [vmem:[%s11638_s3 + $0x224] ss:$8 sps:$4 sm:$0xff]  }
 0x151   : > { %7454 = vmatprep.mubr.msk.bf16.mxu0 %vm1035_vm3, %v881_v23  ;;  %7483 = vmatprep.mubr.msk.bf16.mxu1 %vm1035_vm3, %v778_v22  ;;  %v8734_v22 = vld [vmem:[%s11638_s3 + $0x26c] ss:$8 sps:$4 sm:$0xff]   ;;  %v8729_v23 = vld [vmem:[%s11638_s3 + $0x220] ss:$8 sps:$4 sm:$0xff]  }
 0x152   : > { %v770_v29 = vpop.f32.mrf.mxu0  ;;  %v873_v30 = vpop.f32.mrf.mxu1  ;;  %1082 = vmatmul.mubr.bf16.vlgmr.msra.gmra.mxu0 %v880_v25  ;;  %1272 = vmatmul.mubr.bf16.vlgmr.msra.gmra.mxu1 %v777_v19  ;;  %v8726_v19 = vld [vmem:[%s11638_s3 + $0x278] ss:$8 sps:$4 sm:$0xff]   ;;  %v8737_v25 = vld [vmem:[%s11638_s3 + $0x214] ss:$8 sps:$4 sm:$0xff]  }
 0x153   : > { %1320 = vmatpush1.bf16.msra.mxu0 %v9847_v6  ;;  %1534 = vmatpush1.bf16.msra.mxu1 %v8679_v24  ;;  %v8732_v24 = vld [vmem:[%s11638_s3 + $0x268] ss:$8 sps:$4 sm:$0xff]  }
 0x154   : > { %v772_v32 = vpop.f32.mrf.mxu0  ;;  %v875_v33 = vpop.f32.mrf.mxu1  ;;  %1321 = vmatprep.subr.bf16.mxu0 %v9433_v34  ;;  %1535 = vmatprep.subr.bf16.mxu1 %v8684_v28  ;;  %v8738_v28 = vld [vmem:[%s11638_s3 + $0x258] ss:$8 sps:$4 sm:$0xff]  }
 0x155   : > { %v779_v36 = vpack.c.bf16 %v772_v32, %v768_v26  ;;  %v882_v42 = vpack.c.bf16 %v875_v33, %v871_v27  ;;  %v8740_v26 = vld [vmem:[%s11638_s3 + $0x25c] ss:$8 sps:$4 sm:$0xff]   ;;  %v8735_v27 = vld [vmem:[%s11638_s3 + $0x210] ss:$8 sps:$4 sm:$0xff]   ;;  %v8745_v33 = vld [vmem:[%s11638_s3 + $0x30c] ss:$8 sps:$4 sm:$0xff]  }
 0x156   : > { %v774_v37 = vpop.f32.mrf.mxu0  ;;  %v877_v38 = vpop.f32.mrf.mxu1 }
 0x157   : > { %v780_v39 = vpack.c.bf16 %v774_v37, %v770_v29  ;;  %v883_v40 = vpack.c.bf16 %v877_v38, %v873_v30  ;;  %1322 = vmatpush1.bf16.msra.mxu0 %v9434_v41  ;;  %1536 = vmatpush1.bf16.msra.mxu1 %v8682_v31  ;;  %v7573_v29 = vld [vmem:[%s11638_s3 + $0x318] sm:$0x77]  ;;  %v8751_v37 = vld [vmem:[%s11638_s3 + $0x2ec] ss:$8 sps:$4 sm:$0xff]   ;;  %v8749_v38 = vld [vmem:[%s11638_s3 + $0x2e8] ss:$8 sps:$4 sm:$0xff]  }
 0x158   : > { %1323 = vmatprep.subr.bf16.mxu0 %v9435_v43  ;;  %1537 = vmatprep.subr.bf16.mxu1 %v8687_v35  ;;  %v7599_v30 = vcombine.high %v7573_v29, %v7573_v29  ;;  %v7598_v31 = vcombine.low %v7573_v29, %v7573_v29  ;;  %v8748_v35 = vld [vmem:[%s11638_s3 + $0x2fc] ss:$8 sps:$4 sm:$0xff]   ;;  %v8782_v29 = vld [vmem:[#allocation8 + $0x1f0] ss:$8 sps:$4 sm:$0xff]  }
 0x159   : > { %7455 = vmatprep.mubr.msk.bf16.mxu0 %vm1035_vm3, %v883_v40  ;;  %7484 = vmatprep.mubr.msk.bf16.mxu1 %vm1035_vm3, %v780_v39  ;;  %v8754_v39 = vld [vmem:[%s11638_s3 + $0x2dc] ss:$8 sps:$4 sm:$0xff]   ;;  %v8752_v40 = vld [vmem:[%s11638_s3 + $0x2d8] ss:$8 sps:$4 sm:$0xff]  }
 0x15a   : > { %1092 = vmatmul.mubr.bf16.gmra.mxu0 %v882_v42  ;;  %1282 = vmatmul.mubr.bf16.gmra.mxu1 %v779_v36  ;;  %v1830_v32 = vsel %vm1042_vm2, %v7598_v31, 0  ;;  %v8746_v36 = vld [vmem:[%s11638_s3 + $0x2f8] ss:$8 sps:$4 sm:$0xff]  }
 0x15b   : > { %1324 = vmatpush1.bf16.msra.mxu0 %v9436_v46  ;;  %1345 = vmatprep.mubr.bf16.mxu0 %v10048_v47  ;;  %v8785_v31 = vld [vmem:[#allocation8 + $0x1e0] ss:$8 sps:$4 sm:$0xff]  }
 0x15c   : > { %1325 = vmatprep.subr.bf16.mxu0 %v9438_v48  ;;  %1538 = vmatpush1.bf16.msra.mxu1 %v8685_v44 }
 0x15d   : > { %1539 = vmatprep.subr.bf16.mxu1 %v8690_v45 }
 0x15f   : > { %1326 = vmatpush1.bf16.msra.mxu0 %v9439_v51 }
 0x160   : > { %1327 = vmatprep.subr.bf16.mxu0 %v9440_v52  ;;  %1540 = vmatpush1.bf16.msra.mxu1 %v8688_v49 }
 0x161   : > { %1541 = vmatprep.subr.bf16.mxu1 %v8693_v50 }
 0x163   : > { %1328 = vmatpush1.bf16.msra.mxu0 %v9441_v56 }
 0x164   : > { %7546 = vmatprep.subr.msk.bf16.mxu0 %vm717_vm0, %v9839_v3  ;;  %1542 = vmatpush1.bf16.msra.mxu1 %v8691_v53  ;;  %v8699_v3 = vld [vmem:[%s11638_s3 + $0x2cc] ss:$8 sps:$4 sm:$0xff]  }
 0x165   : > { %1543 = vmatprep.subr.bf16.mxu1 %v8696_v54 }
 0x166   : > { %7488 = vmatmul.mubr.msk.bf16.vlgmr.msra.gmra.mxu0 %vm710_vm1, %v8675_v55 }
 0x167   : > { %1622 = vmatpush1.bf16.msra.mxu0 %v9847_v6  ;;  %1355 = vmatprep.mubr.bf16.mxu0 %v10048_v47  ;;  %v8677_v6 = vld [vmem:[#allocation6 + $0x30] sm:$0xff]  }
 0x168   : > { %1623 = vmatprep.subr.bf16.mxu0 %v9433_v34  ;;  %1544 = vmatpush1.bf16.msra.mxu1 %v8694_v57  ;;  %v8743_v34 = vld [vmem:[%s11638_s3 + $0x308] ss:$8 sps:$4 sm:$0xff]  }
 0x169   : > { %1545 = vmatprep.subr.bf16.mxu1 %v8702_v61 }
 0x16b   : > { %1624 = vmatpush1.bf16.msra.mxu0 %v9434_v41 }
 0x16c   : > { %1625 = vmatprep.subr.bf16.mxu0 %v9435_v43  ;;  %1546 = vmatpush1.bf16.msra.mxu1 %v8700_v63 }
 0x16d   : > { %1547 = vmatprep.subr.bf16.mxu1 %v8708_v1 }
 0x16e   : > { %7489 = vmatmul.mubr.msk.bf16.gmra.mxu0 %vm710_vm1, %v8676_v58 }
 0x16f   : > { %1626 = vmatpush1.bf16.msra.mxu0 %v9436_v46  ;;  %1647 = vmatprep.mubr.bf16.mxu0 %v10048_v47 }
 0x170   : > { %1627 = vmatprep.subr.bf16.mxu0 %v9438_v48  ;;  %1548 = vmatpush1.bf16.msra.mxu1 %v8706_v4 }
 0x171   : > { %7541 = vmatprep.subr.msk.bf16.mxu1 %vm1042_vm2, %v7540_v8 }
 0x173   : > { %1628 = vmatpush1.bf16.msra.mxu0 %v9439_v51 }
 0x174   : > { %1629 = vmatprep.subr.bf16.mxu0 %v9440_v52  ;;  %1556 = vmatpush2.bf16.msra.mxu1 %v1528_v12  ;;  %v8760_v12 = vld [vmem:[#allocation8 + $0x174] ss:$8 sps:$4 sm:$0xff]  }
 0x175   : > { %1557 = vmatprep.subr.bf16.mxu1 %v8719_v13  ;;  %v8758_v13 = vld [vmem:[#allocation8 + $0x170] ss:$8 sps:$4 sm:$0xff]  }
 0x177   : > { %1630 = vmatpush1.bf16.msra.mxu0 %v9441_v56 }
 0x178   : > { %1835 = vmatprep.subr.bf16.mxu0 %v8699_v3  ;;  %1558 = vmatpush2.bf16.msra.mxu1 %v8717_v15  ;;  %v8761_v15 = vld [vmem:[#allocation8 + $0x160] ss:$8 sps:$4 sm:$0xff]  }
 0x179   : > { %1559 = vmatprep.subr.bf16.mxu1 %v8725_v18  ;;  %v8769_v18 = vld [vmem:[#allocation8 + $0x144] ss:$8 sps:$4 sm:$0xff]  }
 0x17a   : > { %7547 = vmatmul.mubr.msk.bf16.vlgmr.msra.gmra.mxu0 %vm710_vm1, %v8677_v6 }
 0x17b   : > { %1657 = vmatprep.mubr.bf16.mxu0 %v10048_v47  ;;  %1836 = vmatpush1.bf16.msra.mxu0 %v8697_v59 }
 0x17c   : > { %1837 = vmatprep.subr.bf16.mxu0 %v8705_v62  ;;  %1560 = vmatpush2.bf16.msra.mxu1 %v8723_v17  ;;  %v8764_v17 = vld [vmem:[#allocation8 + $0x150] ss:$8 sps:$4 sm:$0xff]  }
 0x17d   : > { %1561 = vmatprep.subr.bf16.mxu1 %v8731_v21  ;;  %v8770_v21 = vld [vmem:[#allocation8 + $0x130] ss:$8 sps:$4 sm:$0xff]  }
 0x17f   : > { %1838 = vmatpush1.bf16.msra.mxu0 %v8703_v0 }
 0x180   : > { %1839 = vmatprep.subr.bf16.mxu0 %v8711_v2  ;;  %1562 = vmatpush2.bf16.msra.mxu1 %v8729_v23  ;;  %v8773_v23 = vld [vmem:[#allocation8 + $0x120] ss:$8 sps:$4 sm:$0xff]  }
 0x181   : > { %1563 = vmatprep.subr.bf16.mxu1 %v8737_v25  ;;  %v8776_v25 = vld [vmem:[#allocation8 + $0x110] ss:$8 sps:$4 sm:$0xff]  }
 0x182   : > { %7548 = vmatmul.mubr.msk.bf16.gmra.mxu0 %vm710_vm1, %v8678_v60  ;;  %vm10257_vm1 = vmor %vm1972_vm11, %vm1973_vm12 }
 0x183   : > { %1840 = vmatpush1.bf16.msra.mxu0 %v8709_v5 }
 0x184   : > { %1841 = vmatprep.subr.bf16.mxu0 %v8715_v9  ;;  %1564 = vmatpush2.bf16.msra.mxu1 %v8735_v27  ;;  %v8779_v27 = vld [vmem:[#allocation8 + $0x200] ss:$8 sps:$4 sm:$0xff]  }
 0x187   : > { %1842 = vmatpush1.bf16.msra.mxu0 %v8713_v11  ;;  %v8757_v11 = vld [vmem:[#allocation8 + $0x184] ss:$8 sps:$4 sm:$0xff]  }
 0x188   : > { %1843 = vmatprep.subr.bf16.mxu0 %v8722_v14  ;;  %v8763_v14 = vld [vmem:[#allocation8 + $0x164] ss:$8 sps:$4 sm:$0xff]  }
 0x18b   : > { %1844 = vmatpush1.bf16.msra.mxu0 %v8720_v16  ;;  %v8766_v16 = vld [vmem:[#allocation8 + $0x154] ss:$8 sps:$4 sm:$0xff]  }
 0x18c   : > { %1845 = vmatprep.subr.bf16.mxu0 %v8728_v20  ;;  %v8772_v20 = vld [vmem:[#allocation8 + $0x134] ss:$8 sps:$4 sm:$0xff]  }
 0x18f   : > { %1846 = vmatpush1.bf16.msra.mxu0 %v8726_v19  ;;  %v8767_v19 = vld [vmem:[#allocation8 + $0x140] ss:$8 sps:$4 sm:$0xff]  }
 0x190   : > { %1847 = vmatprep.subr.bf16.mxu0 %v8734_v22  ;;  %v8775_v22 = vld [vmem:[#allocation8 + $0x124] ss:$8 sps:$4 sm:$0xff]  }
 0x193   : > { %1848 = vmatpush1.bf16.msra.mxu0 %v8732_v24  ;;  %v8778_v24 = vld [vmem:[#allocation8 + $0x114] ss:$8 sps:$4 sm:$0xff]  }
 0x194   : > { %1849 = vmatprep.subr.bf16.mxu0 %v8740_v26  ;;  %v8781_v26 = vld [vmem:[#allocation8 + $0x204] ss:$8 sps:$4 sm:$0xff]  }
 0x197   : > { %1850 = vmatpush1.bf16.msra.mxu0 %v8738_v28  ;;  %v8784_v28 = vld [vmem:[#allocation8 + $0x1f4] ss:$8 sps:$4 sm:$0xff]  }
 0x198   : > { %7600 = vmatprep.subr.msk.bf16.mxu0 %vm1042_vm2, %v7599_v30  ;;  %v8787_v30 = vld [vmem:[#allocation8 + $0x1e4] ss:$8 sps:$4 sm:$0xff]   ;;  %vm2066_vm2 = vcmask 1040448  }
 0x19b   : > { %1858 = vmatpush2.bf16.msra.mxu0 %v1830_v32  ;;  %v8790_v32 = vld [vmem:[#allocation8 + $0x1d4] ss:$8 sps:$4 sm:$0xff]  }
 0x19c   : > { %1859 = vmatprep.subr.bf16.mxu0 %v8745_v33 }
 0x19f   : > { %1860 = vmatpush2.bf16.msra.mxu0 %v8743_v34  ;;  %v8788_v34 = vld [vmem:[#allocation8 + $0x1d0] ss:$8 sps:$4 sm:$0xff]  }
 0x1a0   : > { %1861 = vmatprep.subr.bf16.mxu0 %v8748_v35 }
 0x1a3   : > { %1862 = vmatpush2.bf16.msra.mxu0 %v8746_v36 }
 0x1a4   : > { %1863 = vmatprep.subr.bf16.mxu0 %v8751_v37 }
 0x1a7   : > { %1864 = vmatpush2.bf16.msra.mxu0 %v8749_v38 }
 0x1a8   : > { %1865 = vmatprep.subr.bf16.mxu0 %v8754_v39 }
 0x1ab   : > { %1866 = vmatpush2.bf16.msra.mxu0 %v8752_v40 }
 0x1ac   : > { %2578 = vmatprep.subr.bf16.mxu0 %v8757_v11 }
 0x212   : > { %v10198_v41 = vpop.f32.mrf.mxu0  ;;  %v1273_v33 = vpop.f32.mrf.mxu1 }
 0x214   : > { %v10200_v42 = vpop.f32.mrf.mxu0  ;;  %v1275_v35 = vpop.f32.mrf.mxu1 }
 0x216   : > { %v10202_v43 = vpop.f32.mrf.mxu0  ;;  %v1277_v36 = vpop.f32.mrf.mxu1 }
 0x218   : > { %v10204_v44 = vpop.f32.mrf.mxu0  ;;  %v1279_v37 = vpop.f32.mrf.mxu1 }
 0x21a   : > { %v10206_v45 = vpop.f32.mrf.mxu0  ;;  %v1283_v38 = vpop.f32.mrf.mxu1 }
 0x21b   : > { %v1284_v11 = vadd.f32 %v1283_v38, %v10206_v45 }
 0x21c   : > { %v10208_v46 = vpop.f32.mrf.mxu0  ;;  %v1285_v39 = vpop.f32.mrf.mxu1 }
 0x21e   : > { %v10210_v48 = vpop.f32.mrf.mxu0  ;;  %v1287_v40 = vpop.f32.mrf.mxu1 }
 0x220   : > { %v10212_v49 = vpop.f32.mrf.mxu0 }
 0x226   : > { %v1347_v50 = vpop.f32.mrf.mxu0 }
 0x228   : > { %v1349_v51 = vpop.f32.mrf.mxu0 }
 0x22a   : > { %v1351_v52 = vpop.f32.mrf.mxu0 }
 0x22b   : > { %v1366_v55 = vpack.c.bf16 %v1351_v52, %v1347_v50  ;;  %v1289_v50 = vpop.f32.mrf.mxu1 }
 0x22c   : > { %v1353_v53 = vpop.f32.mrf.mxu0 }
 0x22d   : > { %v1367_v54 = vpack.c.bf16 %v1353_v53, %v1349_v51  ;;  %v1898_v53 = vlaneseq }
 0x22e   : > { %v1357_v56 = vpop.f32.mrf.mxu0 }
 0x22f   : > { %7542 = vmatprep.mubr.msk.bf16.mxu1 %vm1035_vm3, %v1367_v54 }
 0x230   : > { %v1359_v57 = vpop.f32.mrf.mxu0  ;;  %1566 = vmatmul.mubr.bf16.vlgmr.msra.gmra.mxu1 %v1366_v55  ;;  %v1899_v55 = vshrl.u32 %v1898_v53, 7 }
 0x232   : > { %v1361_v58 = vpop.f32.mrf.mxu0 }
 0x233   : > { %v1368_v59 = vpack.c.bf16 %v1361_v58, %v1357_v56  ;;  %v1896_v58 = vld [vmem:[%s11639_s4] sm:$0x3] }
 0x234   : > { %v1363_v3 = vpop.f32.mrf.mxu0 }
 0x235   : > { %v1369_v6 = vpack.c.bf16 %v1363_v3, %v1359_v57  ;;  %v10221_v57 = vsub.s32 0, %v1899_v55  ;;  %v1274_v3 = vadd.f32 %v1273_v33, %v10198_v41  ;;  %v1290_v33 = vadd.f32 %v1289_v50, %v10212_v49 }
 0x237   : > { %7543 = vmatprep.mubr.msk.bf16.mxu1 %vm1035_vm3, %v1369_v6  ;;  %v10227_v6 = vsub.s32 1, %v1899_v55 }
 0x238   : > { %1576 = vmatmul.mubr.bf16.gmra.mxu1 %v1368_v59  ;;  %v1276_v59 = vadd.f32 %v1275_v35, %v10200_v42 }
 0x239   : > { %2182 = vmatprep.mubr.bf16.mxu1 %v10048_v47 }
 0x23a   : > { %v1649_v60 = vpop.f32.mrf.mxu0 }
 0x23c   : > { %v1651_v61 = vpop.f32.mrf.mxu0 }
 0x23e   : > { %v1653_v62 = vpop.f32.mrf.mxu0 }
 0x23f   : > { %v1668_v1 = vpack.c.bf16 %v1653_v62, %v1649_v60  ;;  %v1901_v62 = vrot.slane %v1896_v58, %v10221_v57 }
 0x240   : > { %v1655_v63 = vpop.f32.mrf.mxu0 }
 0x241   : > { %v1669_v0 = vpack.c.bf16 %v1655_v63, %v1651_v61 }
 0x242   : > { %v1659_v2 = vpop.f32.mrf.mxu0 }
 0x243   : > { %7601 = vmatprep.mubr.msk.bf16.mxu0 %vm1035_vm3, %v1669_v0  ;;  %v1278_v0 = vadd.f32 %v1277_v36, %v10202_v43  ;;  %v1286_v43 = vadd.f32 %v1285_v39, %v10208_v46 }
 0x244   : > { %v1661_v4 = vpop.f32.mrf.mxu0  ;;  %1868 = vmatmul.mubr.bf16.vlgmr.msra.gmra.mxu0 %v1668_v1 }
 0x245   : > { %2579 = vmatpush1.bf16.msra.mxu0 %v8755_v10  ;;  %v1280_v10 = vadd.f32 %v1279_v37, %v10204_v44 }
 0x246   : > { %v1663_v5 = vpop.f32.mrf.mxu0  ;;  %2580 = vmatprep.subr.bf16.mxu0 %v8760_v12 }
 0x247   : > { %v1670_v9 = vpack.c.bf16 %v1663_v5, %v1659_v2 }
 0x248   : > { %v1665_v7 = vpop.f32.mrf.mxu0 }
 0x249   : > { %v1671_v8 = vpack.c.bf16 %v1665_v7, %v1661_v4  ;;  %2581 = vmatpush1.bf16.msra.mxu0 %v8758_v13  ;;  %v10233_v4 = vrot.slane %v1896_v58, %v10227_v6 }
 0x24a   : > { %2582 = vmatprep.subr.bf16.mxu0 %v8763_v14 }
 0x24b   : > { %7602 = vmatprep.mubr.msk.bf16.mxu0 %vm1035_vm3, %v1671_v8  ;;  %vm2068_vm3 = vcmask 1044484  }
 0x24c   : > { %1878 = vmatmul.mubr.bf16.gmra.mxu0 %v1670_v9 }
 0x24d   : > { %2583 = vmatpush1.bf16.msra.mxu0 %v8761_v15 }
 0x24e   : > { %2584 = vmatprep.subr.bf16.mxu0 %v8766_v16 }
 0x251   : > { %2585 = vmatpush1.bf16.msra.mxu0 %v8764_v17 }
 0x252   : > { %2586 = vmatprep.subr.bf16.mxu0 %v8769_v18 }
 0x255   : > { %2587 = vmatpush1.bf16.msra.mxu0 %v8767_v19 }
 0x256   : > { %2588 = vmatprep.subr.bf16.mxu0 %v8772_v20 }
 0x259   : > { %2589 = vmatpush1.bf16.msra.mxu0 %v8770_v21  ;;  %v1288_v21 = vadd.f32 %v1287_v40, %v10210_v48 }
 0x25a   : > { %2590 = vmatprep.subr.bf16.mxu0 %v8775_v22 }
 0x25d   : > { %2591 = vmatpush1.bf16.msra.mxu0 %v8773_v23 }
 0x25e   : > { %2592 = vmatprep.subr.bf16.mxu0 %v8778_v24 }
 0x261   : > { %2593 = vmatpush1.bf16.msra.mxu0 %v8776_v25 }
 0x262   : > { %2594 = vmatprep.subr.bf16.mxu0 %v8781_v26 }
 0x265   : > { %2595 = vmatpush2.bf16.msra.mxu0 %v8779_v27 }
 0x266   : > { %2596 = vmatprep.subr.bf16.mxu0 %v8784_v28 }
 0x269   : > { %2597 = vmatpush2.bf16.msra.mxu0 %v8782_v29 }
 0x26a   : > { %2598 = vmatprep.subr.bf16.mxu0 %v8787_v30 }
 0x26d   : > { %2599 = vmatpush2.bf16.msra.mxu0 %v8785_v31 }
 0x26e   : > { %2600 = vmatprep.subr.bf16.mxu0 %v8790_v32 }
 0x271   : > { %2601 = vmatpush2.bf16.msra.mxu0 %v8788_v34 }
 0x2f0   : > { %v1567_v51 = vpop.f32.mrf.mxu1 }
 0x2f1   : > { %v1586_v60 = vadd.f32 %v1567_v51, %v1274_v3 }
 0x2f2   : > { %v1569_v52 = vpop.f32.mrf.mxu1 }
 0x2f3   : > { %v1587_v1 = vadd.f32 %v1569_v52, %v1276_v59 }
 0x2f4   : > { %v1571_v54 = vpop.f32.mrf.mxu1 }
 0x2f5   : > { %v1588_v7 = vadd.f32 %v1571_v54, %v1278_v0 }
 0x2f6   : > { %v1573_v56 = vpop.f32.mrf.mxu1 }
 0x2f7   : > { %v1589_v15 = vadd.f32 %v1573_v56, %v1280_v10  ;;  %v8793_v56 = vld [vmem:[#allocation8 + $0x1c4] ss:$8 sps:$4 sm:$0xff]  }
 0x2f8   : > { %v1577_v61 = vpop.f32.mrf.mxu1  ;;  %2602 = vmatprep.subr.bf16.mxu0 %v8793_v56 }
 0x2f9   : > { %v1590_v17 = vadd.f32 %v1577_v61, %v1284_v11 }
 0x2fa   : > { %v1579_v8 = vpop.f32.mrf.mxu1 }
 0x2fb   : > { %v1591_v23 = vadd.f32 %v1579_v8, %v1286_v43 }
 0x2fc   : > { %v1581_v18 = vpop.f32.mrf.mxu1 }
 0x2fd   : > { %v1592_v29 = vadd.f32 %v1581_v18, %v1288_v21  ;;  %v8797_v18 = vld [vmem:[#allocation8 + $0x1a0] ss:$8 sps:$4 sm:$0xff]  }
 0x2fe   : > { %v1583_v30 = vpop.f32.mrf.mxu1 }
 0x2ff   : > { %v1593_v39 = vadd.f32 %v1583_v30, %v1290_v33  ;;  %v8816_v33 = vld [vmem:[#allocation8 + $0x70] ss:$8 sps:$4 sm:$0xff]  }
 0x304   : > { %v1869_v63 = vpop.f32.mrf.mxu0 }
 0x305   : > { %v1888_v2 = vadd.f32 %v1869_v63, %v1586_v60  ;;  %v8791_v60 = vld [vmem:[#allocation8 + $0x1c0] ss:$8 sps:$4 sm:$0xff]  }
 0x306   : > { %v1871_v5 = vpop.f32.mrf.mxu0  ;;  %2603 = vmatpush2.bf16.msra.mxu0 %v8791_v60 }
 0x307   : > { %v1908_v41 = vadd.f32 %v1901_v62, %v1888_v2  ;;  %v1889_v9 = vadd.f32 %v1871_v5, %v1587_v1 }
 0x308   : > { %v1873_v42 = vpop.f32.mrf.mxu0 }
 0x309   : > { %v1924_v12 = vmul.f32 0.05, %v1908_v41  ;;  %v1909_v13 = vadd.f32 %v10233_v4, %v1889_v9  ;;  %v1890_v14 = vadd.f32 %v1873_v42, %v1588_v7  ;;  %vm1916_vm5 = vcmp.ge.f32.partialorder %v1908_v41, 0.0  ;;  %v8796_v7 = vld [vmem:[#allocation8 + $0x1b4] ss:$8 sps:$4 sm:$0xff]  }
 0x30a   : > { %v1875_v16 = vpop.f32.mrf.mxu0  ;;  %v8794_v9 = vld [vmem:[#allocation8 + $0x1b0] ss:$8 sps:$4 sm:$0xff]   ;;  %2604 = vmatprep.subr.bf16.mxu0 %v8796_v7 }
 0x30b   : > { %vm1917_vm6 = vcmp.ge.f32.partialorder %v1909_v13, 0.0  ;;  %v1925_v19 = vmul.f32 0.05, %v1909_v13  ;;  %v1910_v20 = vadd.f32 %v1901_v62, %v1890_v14  ;;  %v1891_v44 = vadd.f32 %v1875_v16, %v1589_v15  ;;  %2605 = vmatpush2.bf16.msra.mxu0 %v8794_v9  ;;  %v8799_v16 = vld [vmem:[#allocation8 + $0x1a4] ss:$8 sps:$4 sm:$0xff]  }
 0x30c   : > { %v1879_v22 = vpop.f32.mrf.mxu0  ;;  %v1932_v45 = vsel %vm1916_vm5, %v1908_v41, %v1924_v12  ;;  %2606 = vmatprep.subr.bf16.mxu0 %v8799_v16  ;;  %vm2069_vm5 = vsmask.f32 4352 }
 0x30d   : > { %v1933_v24 = vsel %vm1917_vm6, %v1909_v13, %v1925_v19  ;;  %v1892_v25 = vadd.f32 %v1879_v22, %v1590_v17  ;;  %v1926_v26 = vmul.f32 0.05, %v1910_v20  ;;  %v1911_v27 = vadd.f32 %v10233_v4, %v1891_v44  ;;  %v8802_v44 = vld [vmem:[#allocation8 + $0x194] ss:$8 sps:$4 sm:$0xff]   ;;  %vm10269_vm6 = vmand %vm2066_vm2, %vm1972_vm11 }
 0x30e   : > { %v1881_v46 = vpop.f32.mrf.mxu0  ;;  %v10241_v28 = vpack.c.bf16 %v1933_v24, %v1932_v45  ;;  %vm1918_vm7 = vcmp.ge.f32.partialorder %v1910_v20, 0.0  ;;  %v8800_v24 = vld [vmem:[#allocation8 + $0x190] ss:$8 sps:$4 sm:$0xff]   ;;  %vm2045_vm2 = vsmask.f32 7954 }
 0x30f   : > { %v1912_v31 = vadd.f32 %v1901_v62, %v1892_v25  ;;  %v1893_v32 = vadd.f32 %v1881_v46, %v1591_v23  ;;  %vm1919_vm8 = vcmp.ge.f32.partialorder %v1911_v27, 0.0  ;;  %v1927_v48 = vmul.f32 0.05, %v1911_v27  ;;  %2607 = vmatpush2.bf16.msra.mxu0 %v8797_v18 }
 0x310   : > { %v1883_v34 = vpop.f32.mrf.mxu0  ;;  %v1976_v35 = vshrl.u32 %v10241_v28, 16  ;;  %v1934_v40 = vsel %vm1918_vm7, %v1910_v20, %v1926_v26  ;;  %2608 = vmatprep.subr.bf16.mxu0 %v8802_v44  ;;  %v1979_v26 = vshll.u32 %v10241_v28, 16  ;;  %vm10273_vm7 = vmand %vm2068_vm3, %vm2069_vm5  ;;  %v2077_v28 = vld [vmem:[#allocation2 + $0x38] sm:$0x1]  ;;  %vm2051_vm3 = vcmask 60416  }
 0x311   : > { %v1928_v36 = vmul.f32 0.05, %v1912_v31  ;;  %v1913_v37 = vadd.f32 %v10233_v4, %v1893_v32  ;;  %v1894_v38 = vadd.f32 %v1883_v34, %v1592_v29  ;;  %v1935_v51 = vsel %vm1919_vm8, %v1911_v27, %v1927_v48  ;;  %vm2071_vm12 = vmor %vm10273_vm7, %vm10269_vm6 }
 0x312   : > { %vm1920_vm9 = vcmp.ge.f32.partialorder %v1912_v31, 0.0  ;;  %v1885_v52 = vpop.f32.mrf.mxu0  ;;  %v8363_v53 = vpack.c.bf16 %v1935_v51, %v1934_v40  ;;  %v1978_v50 = vrot.slane %v1976_v35, 7  ;;  %vm2075_vm8 = vcmask 57344  }
 0x313   : > { %vm1921_vm10 = vcmp.ge.f32.partialorder %v1913_v37, 0.0  ;;  %v1929_v54 = vmul.f32 0.05, %v1913_v37  ;;  %v1914_v55 = vadd.f32 %v1901_v62, %v1894_v38  ;;  %v1895_v49 = vadd.f32 %v1885_v52, %v1593_v39  ;;  %2609 = vmatpush2.bf16.msra.mxu0 %v8800_v24  ;;  %vm2076_vm4 = vmand %vm2075_vm8, %vm1972_vm11 }
 0x314   : > { %v1936_v58 = vsel %vm1920_vm9, %v1912_v31, %v1928_v36  ;;  %v1984_v59 = vshrl.u32 %v8363_v53, 16  ;;  %v1987_v1 = vshll.u32 %v8363_v53, 16  ;;  %v1982_v8 = vrot.slane %v1978_v50, 4  ;;  %v2072_v31 = vld [vmem:[#allocation2 + $0x30] sm:$0x11] }
 0x315   : > { %v1937_v3 = vsel %vm1921_vm10, %v1913_v37, %v1929_v54  ;;  %v1930_v63 = vmul.f32 0.05, %v1914_v55  ;;  %v1915_v0 = vadd.f32 %v10233_v4, %v1895_v49  ;;  %vm1922_vm14 = vcmp.ge.f32.partialorder %v1914_v55, 0.0  ;;  %v2053_v53 = vld [vmem:[#allocation2 + $0x8] sm:$0xf] }
 0x316   : > { %v8364_v61 = vpack.c.bf16 %v1937_v3, %v1936_v58  ;;  %v1986_v62 = vrot.slane %v1984_v59, 7  ;;  %v1981_v27 = vor.u32 %v1979_v26, %v1978_v50  ;;  %vm2041_vm9 = vcmask 1043520  }
 0x317   : > { %vm1923_vm15 = vcmp.ge.f32.partialorder %v1915_v0, 0.0  ;;  %v1931_v2 = vmul.f32 0.05, %v1915_v0  ;;  %v1938_v10 = vsel %vm1922_vm14, %v1914_v55, %v1930_v63  ;;  %vm2044_vm10 = vcmask 1047556  }
 0x318   : > { %v1993_v5 = vshrl.u32 %v8364_v61, 16  ;;  %v1989_v41 = vor.u32 %v1987_v1, %v1986_v62  ;;  %v1996_v12 = vshll.u32 %v8364_v61, 16  ;;  %v1991_v43 = vrot.slane %v1986_v62, 4  ;;  %vm10284_vm5 = vmor %vm2044_vm10, %vm2041_vm9 }
 0x319   : > { %v1939_v42 = vsel %vm1923_vm15, %v1915_v0, %v1931_v2  ;;  %vm2042_vm14 = vsmask.f32 7938  ;;  %vm2025_vm15 = vcmask 64512   ;;  %vm10296_vm8 = vmand %vm2044_vm10, %vm2045_vm2  ;;  %vm11658_vm2 = vcmask 253952  }
 0x31a   : > { %v1995_v11 = vrot.slane %v1993_v5, 7  ;;  %v8365_v13 = vpack.c.bf16 %v1939_v42, %v1938_v10  ;;  %v1990_v14 = vsel %vm10257_vm1, %v1982_v8, %v1989_v41  ;;  %vm10290_vm13 = vmand %vm2041_vm9, %vm2042_vm14  ;;  %v8808_v41 = vld [vmem:[%s11640_s5] sm:$0xff]   ;;  %v9635_v10 = vmov 0.0  }
 0x31b   : > { %vm2047_vm6 = vmor %vm10296_vm8, %vm10290_vm13  ;;  %vm2137_vm13 = vcmask 277504   ;;  %vm11659_vm9 = vmmov 0  }
 0x31c   : > { %v1998_v15 = vor.u32 %v1996_v12, %v1995_v11  ;;  %v2002_v17 = vshrl.u32 %v8365_v13, 16  ;;  %v2005_v21 = vshll.u32 %v8365_v13, 16  ;;  %v2000_v23 = vrot.slane %v1995_v11, 4  ;;  %v8812_v13 = vld [vmem:[%s11640_s5 + $0x8] sm:$0xff]  }
 0x31e   : > { %v1999_v19 = vsel %vm10257_vm1, %v1991_v43, %v1998_v15  ;;  %v2004_v20 = vrot.slane %v2002_v17, 7  ;;  %v8813_v43 = vld [vmem:[#allocation8 + $0x210] ss:$8 sps:$4 sm:$0xff]   ;;  %v8818_v15 = vld [vmem:[#allocation8 + $0x74] ss:$8 sps:$4 sm:$0xff]  }
 0x320   : > { %v2009_v22 = vrot.slane %v2004_v20, 4  ;;  %v2007_v45 = vor.u32 %v2005_v21, %v2004_v20 }
 0x322   : > { %2018 = vrot.lane.b32.xlu0 %v2009_v22, %s9634_s22  ;;  %v2008_v25 = vsel %vm10257_vm1, %v2000_v23, %v2007_v45 }
 0x323   : > { %2016 = vrot.lane.b32.xlu1 %v2008_v25, %s9634_s22 }
 0x326   : > { %2014 = vrot.lane.b32.xlu0 %v1999_v19, %s9634_s22 }
 0x327   : > { %2010 = vrot.lane.b32.xlu1 %v1981_v27, %s9634_s22 }
 0x32a   : > { %2012 = vrot.lane.b32.xlu0 %v1990_v14, %s9634_s22  ;;  %v8815_v14 = vld [vmem:[#allocation8 + $0x214] ss:$8 sps:$4 sm:$0xff]   ;;  %s9638_s22 = smov 32  }
 0x394   : > { %v2019_v30 = vpop.permute.xlu0 %2018 }
 0x395   : > { %v2024_v32 = vrot.slane %v2019_v30, 4  ;;  %v2017_v48 = vpop.permute.xlu1 %2016 }
 0x396   : > { %v2023_v34 = vrot.slane %v2017_v48, 4 }
 0x397   : > { %v2030_v36 = vsel %vm2025_vm15, %v2024_v32, %v2019_v30  ;;  %v2078_v37 = vsel %vm2076_vm4, %v2024_v32, %v2077_v28  ;;  %vm2052_vm4 = vmand %vm2051_vm3, %vm2042_vm14 }
 0x398   : > { %v2073_v39 = vsel %vm2071_vm12, %v2030_v36, %v2072_v31  ;;  %2079 = vst [vmem:[#allocation2 + $0x38] sm:$0x1] %v2078_v37  ;;  %v2029_v40 = vsel %vm2025_vm15, %v2023_v34, %v2017_v48  ;;  %2065 = vst.msk [vmem:[#allocation2 + $0x2c] sm:$0xf] %vm2051_vm3, %v2023_v34  ;;  %v2015_v51 = vpop.permute.xlu0 %2014  ;;  %vm2574_vm12 = vcmask 130048   ;;  %v8819_v36 = vld [vmem:[%s11640_s5 + $0x10] sm:$0xff]  }
 0x399   : > { %2074 = vst [vmem:[#allocation2 + $0x30] sm:$0x11] %v2073_v39  ;;  %2064 = vst.msk [vmem:[#allocation2 + $0x24] sm:$0xff] %vm10284_vm5, %v2029_v40  ;;  %v2022_v52 = vrot.slane %v2015_v51, 4  ;;  %v2011_v54 = vpop.permute.xlu1 %2010  ;;  %v8822_v34 = vld [vmem:[#allocation8 + $0x64] ss:$8 sps:$4 sm:$0xff]  }
 0x39a   : > { %v2020_v55 = vrot.slane %v2011_v54, 4  ;;  %v8825_v39 = vld [vmem:[#allocation8 + $0x54] ss:$8 sps:$4 sm:$0xff]   ;;  %v8823_v40 = vld [vmem:[#allocation8 + $0x50] ss:$8 sps:$4 sm:$0xff]  }
 0x39b   : > { %v2028_v49 = vsel %vm2025_vm15, %v2022_v52, %v2015_v51  ;;  %2063 = vst.msk [vmem:[#allocation2 + $0x20] sm:$0xf] %vm2051_vm3, %v2022_v52  ;;  %v8828_v51 = vld [vmem:[#allocation8 + $0x44] ss:$8 sps:$4 sm:$0xff]   ;;  %v8826_v52 = vld [vmem:[#allocation8 + $0x40] ss:$8 sps:$4 sm:$0xff]  }
 0x39c   : > { %2062 = vst.msk [vmem:[#allocation2 + $0x18] sm:$0xff] %vm10284_vm5, %v2028_v49  ;;  %v2026_v50 = vsel %vm2025_vm15, %v2020_v55, %v2011_v54  ;;  %v2054_v56 = vsel %vm2052_vm4, %v2020_v55, %v2053_v53  ;;  %v2013_v58 = vpop.permute.xlu0 %2012  ;;  %v8831_v53 = vld [vmem:[#allocation8 + $0x324] ss:$8 sps:$4 sm:$0xff]   ;;  %v8834_v54 = vld [vmem:[#allocation8 + $0x34] ss:$8 sps:$4 sm:$0xff]  }
 0x39d   : > { %v2049_v3 = vsel %vm2047_vm6, %v2026_v50, %v10048_v47  ;;  %2055 = vst [vmem:[#allocation2 + $0x8] sm:$0xf] %v2054_v56  ;;  %v2021_v59 = vrot.slane %v2013_v58, 4  ;;  %v8829_v55 = vld [vmem:[#allocation8 + $0x320] ss:$8 sps:$4 sm:$0xff]   ;;  %v10421_v56 = vld [vmem:[#allocation3 + $0xc] sm:$0xff] }
 0x39e   : > { %v8832_v49 = vld [vmem:[#allocation8 + $0x30] ss:$8 sps:$4 sm:$0xff]   ;;  %v8837_v50 = vld [vmem:[#allocation8 + $0x24] ss:$8 sps:$4 sm:$0xff]   ;;  %3750 = vst.msk [vmem:[#allocation3 + $0x20] sm:$0x1] %vm11658_vm2, %v10421_v56 }
 0x39f   : > { %v2027_v60 = vsel %vm2025_vm15, %v2021_v59, %v2013_v58  ;;  %2061 = vst.msk [vmem:[#allocation2 + $0x14] sm:$0xf] %vm2051_vm3, %v2021_v59  ;;  %v8809_v9 = vld [vmem:[#allocation2 + $0x38] ss:$0 sps:$4 sm:$0x11]   ;;  %vm11657_vm15 = vcmask 257024  }
 0x3a0   : > { %2059 = vst.msk [vmem:[#allocation2 + $0xc] sm:$0xff] %vm10284_vm5, %v2027_v60  ;;  %v2088_v61 = vld [vmem:[#allocation2 + $0x30] sm:$0x11]  ;;  %v10353_v42 = vsel %vm717_vm0, %v8809_v9, 0  ;;  %v8835_v58 = vld [vmem:[#allocation8 + $0x20] ss:$8 sps:$4 sm:$0xff]  }
 0x3a1   : > { %v10325_v63 = vcombine.high %v2088_v61, %v2088_v61  ;;  %v7614_v0 = vcombine.low %v2088_v61, %v2088_v61  ;;  %v8838_v59 = vld [vmem:[#allocation8 + $0x10] ss:$8 sps:$4 sm:$0xff]   ;;  %v8843_v60 = vld [vmem:[#allocation8 + $0x4] ss:$8 sps:$4 sm:$0xff]   ;;  %v8841_v61 = vld [vmem:[#allocation8] ss:$8 sps:$4 sm:$0xff]  }
 0x3a2   : > { %v10359_v11 = vld [vmem:[#allocation2 + $0x20] ss:$12 sps:$4 sm:$0xff]   ;;  %3745 = vst.msk [vmem:[#allocation3 + $0x8] sm:$0xf] %vm11657_vm15, %v10421_v56  ;;  %3747 = vst.msk [vmem:[#allocation3 + $0x14] sm:$0xf] %vm11657_vm15, %v10421_v56 }
 0x3a3   : > { %7617 = vmatprep.subr.msk.bf16.mxu1 %vm717_vm0, %v10325_v63  ;;  %7699 = vmatprep.subr.msk.bf16.mxu0 %vm717_vm0, %v10325_v63  ;;  %v10332_v62 = vsel %vm717_vm0, %v7614_v0, 0  ;;  %v10334_v1 = vld [vmem:[#allocation2 + $0x1c] ss:$12 sps:$4 sm:$0xff]   ;;  %v10338_v2 = vld [vmem:[#allocation2 + $0x18] ss:$12 sps:$4 sm:$0xff]   ;;  %vm11689_vm2 = vcmask 122880  }
 0x3a4   : > { %2161 = vmatpush1.bf16.msra.mxu1 %v10332_v62  ;;  %v8846_v0 = vld [vmem:[#allocation8 + $0xf4] ss:$8 sps:$4 sm:$0xff]   ;;  %v8847_v9 = vld [vmem:[#allocation8 + $0xe0] ss:$8 sps:$4 sm:$0xff]  }
 0x3a5   : > { %2162 = vmatprep.subr.bf16.mxu1 %v10334_v1 }
 0x3a6   : > { %v10363_v12 = vld [vmem:[#allocation2 + $0x8] ss:$12 sps:$4 sm:$0xff]  }
 0x3a7   : > { %v2082_v5 = vld [vmem:[#allocation2 + $0xc] sm:$0xff] }
 0x3a8   : > { %2163 = vmatpush1.bf16.msra.mxu1 %v10338_v2  ;;  %v10341_v7 = vcombine.high %v2049_v3, %v2082_v5  ;;  %v10344_v8 = vcombine.low %v2049_v3, %v2082_v5  ;;  %v8840_v3 = vld [vmem:[#allocation8 + $0x14] ss:$8 sps:$4 sm:$0xff]   ;;  %v8844_v5 = vld [vmem:[#allocation8 + $0xf0] ss:$8 sps:$4 sm:$0xff]  }
 0x3aa   : > { %2164 = vmatprep.subr.bf16.mxu1 %v10341_v7 }
 0x3ac   : > { %2165 = vmatpush1.bf16.msra.mxu1 %v10344_v8 }
 0x3ad   : > { %8405 = vmatprep.subr.bf16.mxu1 %v9635_v10 }
 0x3af   : > { %7618 = vmatmul.mubr.msk.bf16.vlgmr.msra.gmra.mxu1 %vm2137_vm13, %v8808_v41 }
 0x3b0   : > { %8406 = vmatpush3.bf16.msra.mxu1 %v10353_v42  ;;  %8411 = vmatprep.mubr.msk.bf16.mxu1 %vm11659_vm9, %v9635_v10 }
 0x3b1   : > { %8407 = vmatprep.subr.bf16.mxu1 %v9635_v10 }
 0x3b4   : > { %8408 = vmatpush3.bf16.msra.mxu1 %v10359_v11 }
 0x3b5   : > { %8409 = vmatprep.subr.bf16.mxu1 %v9635_v10 }
 0x3b8   : > { %8410 = vmatpush3.bf16.msra.mxu1 %v10363_v12 }
 0x3b9   : > { %7623 = vmatprep.subr.msk.bf16.mxu1 %vm717_vm0, %v10325_v63 }
 0x3bb   : > { %8412 = vmatmul.mubr.msk.bf16.vlgmr.msra.gmra.mxu1 %vm2137_vm13, %v8808_v41  ;;  %v8849_v41 = vld [vmem:[#allocation8 + $0xe4] ss:$8 sps:$4 sm:$0xff]  }
 0x3bc   : > { %2293 = vmatpush1.bf16.msra.mxu1 %v10332_v62  ;;  %2314 = vmatprep.mubr.bf16.mxu1 %v10048_v47 }
 0x3bd   : > { %2294 = vmatprep.subr.bf16.mxu1 %v10334_v1 }
 0x3c0   : > { %2295 = vmatpush1.bf16.msra.mxu1 %v10338_v2 }
 0x3c1   : > { %2296 = vmatprep.subr.bf16.mxu1 %v10341_v7 }
 0x3c4   : > { %2297 = vmatpush1.bf16.msra.mxu1 %v10344_v8 }
 0x3c5   : > { %8415 = vmatprep.subr.bf16.mxu1 %v9635_v10 }
 0x3c7   : > { %7624 = vmatmul.mubr.msk.bf16.vlgmr.msra.gmra.mxu1 %vm2137_vm13, %v8812_v13 }
 0x3c8   : > { %8416 = vmatpush3.bf16.msra.mxu1 %v10353_v42  ;;  %8421 = vmatprep.mubr.msk.bf16.mxu1 %vm11659_vm9, %v9635_v10 }
 0x3c9   : > { %8417 = vmatprep.subr.bf16.mxu1 %v9635_v10 }
 0x3cc   : > { %8418 = vmatpush3.bf16.msra.mxu1 %v10359_v11 }
 0x3cd   : > { %8419 = vmatprep.subr.bf16.mxu1 %v9635_v10 }
 0x3d0   : > { %8420 = vmatpush3.bf16.msra.mxu1 %v10363_v12 }
 0x3d1   : > { %2635 = vmatprep.subr.bf16.mxu1 %v8815_v14  ;;  %v8855_v14 = vld [vmem:[#allocation8 + $0xc4] ss:$8 sps:$4 sm:$0xff]  }
 0x3d3   : > { %8422 = vmatmul.mubr.msk.bf16.vlgmr.msra.gmra.mxu1 %vm2137_vm13, %v8812_v13  ;;  %v8852_v13 = vld [vmem:[#allocation8 + $0xd4] ss:$8 sps:$4 sm:$0xff]  }
 0x3d4   : > { %2653 = vmatprep.mubr.bf16.mxu1 %v10048_v47  ;;  %2636 = vmatpush1.bf16.msra.mxu1 %v8813_v43  ;;  %v8853_v43 = vld [vmem:[#allocation8 + $0xc0] ss:$8 sps:$4 sm:$0xff]  }
 0x3d5   : > { %2837 = vmatprep.subr.bf16.mxu1 %v8818_v15  ;;  %v8858_v15 = vld [vmem:[#allocation8 + $0xb4] ss:$8 sps:$4 sm:$0xff]  }
 0x46f   : > { %v10389_v16 = vpop.f32.mrf.mxu1 }
 0x471   : > { %v2186_v17 = vpop.f32.mrf.mxu1 }
 0x473   : > { %v10391_v18 = vpop.f32.mrf.mxu1 }
 0x474   : > { %v2234_v19 = vpack.c.bf16 %v10391_v18, %v10389_v16  ;;  %v8882_v16 = vld [vmem:[#allocation8 + $0x264] ss:$8 sps:$4 sm:$0xff]   ;;  %v8880_v18 = vld [vmem:[#allocation8 + $0x260] ss:$8 sps:$4 sm:$0xff]  }
 0x475   : > { %v2190_v20 = vpop.f32.mrf.mxu1 }
 0x476   : > { %v2235_v35 = vpack.c.bf16 %v2190_v20, %v2186_v17  ;;  %v8856_v17 = vld [vmem:[#allocation8 + $0xb0] ss:$8 sps:$4 sm:$0xff]   ;;  %v8861_v20 = vld [vmem:[#allocation8 + $0xa4] ss:$8 sps:$4 sm:$0xff]  }
 0x47b   : > { %v10395_v21 = vpop.f32.mrf.mxu1 }
 0x47d   : > { %v8413_v44 = vpop.f32.mrf.mxu1 }
 0x47e   : > { %v8859_v44 = vld [vmem:[#allocation8 + $0xa0] ss:$8 sps:$4 sm:$0xff]  }
 0x47f   : > { %v10397_v22 = vpop.f32.mrf.mxu1 }
 0x480   : > { %v2236_v23 = vpack.c.bf16 %v10397_v22, %v10395_v21  ;;  %v8886_v21 = vld [vmem:[#allocation8 + $0x240] ss:$8 sps:$4 sm:$0xff]   ;;  %v8891_v22 = vld [vmem:[#allocation8 + $0x234] ss:$8 sps:$4 sm:$0xff]  }
 0x481   : > { %v8414_v45 = vpop.f32.mrf.mxu1 }
 0x482   : > { %v8864_v45 = vld [vmem:[#allocation8 + $0x94] ss:$8 sps:$4 sm:$0xff]  }
 0x487   : > { %v2316_v24 = vpop.f32.mrf.mxu1 }
 0x489   : > { %v2318_v25 = vpop.f32.mrf.mxu1 }
 0x48b   : > { %v2320_v26 = vpop.f32.mrf.mxu1 }
 0x48c   : > { %v2366_v28 = vpack.c.bf16 %v2320_v26, %v2316_v24  ;;  %v8862_v24 = vld [vmem:[#allocation8 + $0x90] ss:$8 sps:$4 sm:$0xff]   ;;  %v8865_v26 = vld [vmem:[#allocation8 + $0x80] ss:$8 sps:$4 sm:$0xff]  }
 0x48d   : > { %v2322_v27 = vpop.f32.mrf.mxu1 }
 0x48e   : > { %v2367_v46 = vpack.c.bf16 %v2322_v27, %v2318_v25  ;;  %v8867_v25 = vld [vmem:[#allocation8 + $0x84] ss:$8 sps:$4 sm:$0xff]  }
 0x48f   : > { %v8870_v27 = vld [vmem:[#allocation8 + $0x104] ss:$8 sps:$4 sm:$0xff]  }
 0x490   : > { %2610 = vmatprep.mubr.bf16.mxu0 %v2367_v46  ;;  %v8868_v46 = vld [vmem:[#allocation8 + $0x100] ss:$8 sps:$4 sm:$0xff]  }
 0x491   : > { %2611 = vmatmul.mubr.bf16.vlgmr.msra.gmra.mxu0 %v2366_v28  ;;  %v8873_v28 = vld [vmem:[#allocation8 + $0x294] ss:$8 sps:$4 sm:$0xff]  }
 0x492   : > { %2945 = vmatpush1.bf16.msra.mxu0 %v10332_v62  ;;  %2966 = vmatprep.mubr.bf16.mxu0 %v10048_v47  ;;  %v8820_v47 = vld [vmem:[#allocation8 + $0x60] ss:$8 sps:$4 sm:$0xff]  }
 0x493   : > { %2946 = vmatprep.subr.bf16.mxu0 %v10334_v1  ;;  %v2359_v30 = vpop.f32.mrf.mxu1 }
 0x495   : > { %v8423_v31 = vpop.f32.mrf.mxu1 }
 0x496   : > { %2947 = vmatpush1.bf16.msra.mxu0 %v10338_v2  ;;  %v8876_v31 = vld [vmem:[#allocation8 + $0x284] ss:$8 sps:$4 sm:$0xff]  }
 0x497   : > { %2948 = vmatprep.subr.bf16.mxu0 %v10341_v7  ;;  %v2362_v32 = vpop.f32.mrf.mxu1 }
 0x498   : > { %v2368_v48 = vpack.c.bf16 %v2362_v32, %v2359_v30  ;;  %v8871_v30 = vld [vmem:[#allocation8 + $0x290] ss:$8 sps:$4 sm:$0xff]   ;;  %v8874_v32 = vld [vmem:[#allocation8 + $0x280] ss:$8 sps:$4 sm:$0xff]  }
 0x499   : > { %v8424_v37 = vpop.f32.mrf.mxu1 }
 0x49a   : > { %2949 = vmatpush1.bf16.msra.mxu0 %v10344_v8  ;;  %7660 = vmatmul.mubr.msk.bf16.vlgmr.msra.gmra.mxu1 %vm2574_vm12, %v2368_v48  ;;  %v8877_v48 = vld [vmem:[#allocation8 + $0x270] ss:$8 sps:$4 sm:$0xff]   ;;  %v8892_v37 = vld [vmem:[#allocation8 + $0x220] ss:$8 sps:$4 sm:$0xff]  }
 0x49b   : > { %2838 = vmatpush1.bf16.msra.mxu1 %v8816_v33  ;;  %2869 = vmatprep.mubr.bf16.mxu1 %v2235_v35  ;;  %v8879_v33 = vld [vmem:[#allocation8 + $0x274] ss:$8 sps:$4 sm:$0xff]   ;;  %v8888_v35 = vld [vmem:[#allocation8 + $0x244] ss:$8 sps:$4 sm:$0xff]  }
 0x49c   : > { %8425 = vmatprep.subr.bf16.mxu0 %v9635_v10  ;;  %2839 = vmatprep.subr.bf16.mxu1 %v8822_v34  ;;  %v8883_v34 = vld [vmem:[#allocation8 + $0x250] ss:$8 sps:$4 sm:$0xff]  }
 0x49d   : > { %7700 = vmatmul.mubr.msk.bf16.vlgmr.msra.gmra.mxu0 %vm2137_vm13, %v8819_v36 }
 0x49e   : > { %8426 = vmatpush3.bf16.msra.mxu0 %v10353_v42  ;;  %8431 = vmatprep.mubr.msk.bf16.mxu0 %vm11659_vm9, %v9635_v10 }
 0x49f   : > { %2840 = vmatpush1.bf16.msra.mxu1 %v8820_v47  ;;  %8427 = vmatprep.subr.bf16.mxu0 %v9635_v10  ;;  %v8897_v47 = vld [vmem:[#allocation8 + $0x314] ss:$8 sps:$4 sm:$0xff]  }
 0x4a0   : > { %2841 = vmatprep.subr.bf16.mxu1 %v8825_v39  ;;  %v8895_v39 = vld [vmem:[#allocation8 + $0x310] ss:$8 sps:$4 sm:$0xff]  }
 0x4a2   : > { %8428 = vmatpush3.bf16.msra.mxu0 %v10359_v11 }
 0x4a3   : > { %2842 = vmatpush1.bf16.msra.mxu1 %v8823_v40  ;;  %8429 = vmatprep.subr.bf16.mxu0 %v9635_v10  ;;  %v8900_v40 = vld [vmem:[#allocation8 + $0x304] ss:$8 sps:$4 sm:$0xff]  }
 0x4a4   : > { %2843 = vmatprep.subr.bf16.mxu1 %v8828_v51  ;;  %v8898_v51 = vld [vmem:[#allocation8 + $0x300] ss:$8 sps:$4 sm:$0xff]  }
 0x4a6   : > { %8430 = vmatpush3.bf16.msra.mxu0 %v10363_v12 }
 0x4a7   : > { %2844 = vmatpush1.bf16.msra.mxu1 %v8826_v52  ;;  %3286 = vmatprep.subr.bf16.mxu0 %v8831_v53  ;;  %v8903_v52 = vld [vmem:[#allocation8 + $0x2f4] ss:$8 sps:$4 sm:$0xff]   ;;  %v8901_v53 = vld [vmem:[#allocation8 + $0x2f0] ss:$8 sps:$4 sm:$0xff]  }
 0x4a8   : > { %2845 = vmatprep.subr.bf16.mxu1 %v8834_v54  ;;  %v8906_v54 = vld [vmem:[#allocation8 + $0x2e4] ss:$8 sps:$4 sm:$0xff]  }
 0x4a9   : > { %8432 = vmatmul.mubr.msk.bf16.vlgmr.msra.gmra.mxu0 %vm2137_vm13, %v8819_v36  ;;  %v8894_v36 = vld [vmem:[#allocation8 + $0x224] ss:$8 sps:$4 sm:$0xff]  }
 0x4aa   : > { %3287 = vmatpush1.bf16.msra.mxu0 %v8829_v55  ;;  %3304 = vmatprep.mubr.bf16.mxu0 %v10421_v56  ;;  %v8904_v55 = vld [vmem:[#allocation8 + $0x2e0] ss:$8 sps:$4 sm:$0xff]  }
 0x4ab   : > { %2846 = vmatpush1.bf16.msra.mxu1 %v8832_v49  ;;  %7740 = vmatprep.subr.msk.bf16.mxu0 %vm717_vm0, %v10325_v63  ;;  %v8850_v63 = vld [vmem:[#allocation8 + $0xd0] ss:$8 sps:$4 sm:$0xff]   ;;  %v8909_v49 = vld [vmem:[#allocation8 + $0x2d4] ss:$8 sps:$4 sm:$0xff]  }
 0x4ac   : > { %2847 = vmatprep.subr.bf16.mxu1 %v8837_v50  ;;  %v8907_v50 = vld [vmem:[#allocation8 + $0x2d0] ss:$8 sps:$4 sm:$0xff]  }
 0x4af   : > { %2848 = vmatpush1.bf16.msra.mxu1 %v8835_v58  ;;  %v8912_v58 = vld [vmem:[#allocation8 + $0x2c4] ss:$8 sps:$4 sm:$0xff]  }
 0x4b0   : > { %2849 = vmatprep.subr.bf16.mxu1 %v8840_v3  ;;  %v8910_v3 = vld [vmem:[#allocation8 + $0x2c0] ss:$8 sps:$4 sm:$0xff]  }
 0x4b3   : > { %2850 = vmatpush1.bf16.msra.mxu1 %v8838_v59  ;;  %v8915_v59 = vld [vmem:[#allocation8 + $0x2b4] ss:$8 sps:$4 sm:$0xff]  }
 0x4b4   : > { %2851 = vmatprep.subr.bf16.mxu1 %v8843_v60  ;;  %v8913_v60 = vld [vmem:[#allocation8 + $0x2b0] ss:$8 sps:$4 sm:$0xff]  }
 0x4b7   : > { %2852 = vmatpush1.bf16.msra.mxu1 %v8841_v61  ;;  %v8918_v61 = vld [vmem:[#allocation8 + $0x2a4] ss:$8 sps:$4 sm:$0xff]  }
 0x4b8   : > { %2853 = vmatprep.subr.bf16.mxu1 %v8846_v0  ;;  %v8916_v0 = vld [vmem:[#allocation8 + $0x2a0] ss:$8 sps:$4 sm:$0xff]  }
 0x4bb   : > { %2854 = vmatpush2.bf16.msra.mxu1 %v8844_v5 }
 0x4bc   : > { %2855 = vmatprep.subr.bf16.mxu1 %v8849_v41 }
 0x4bf   : > { %2856 = vmatpush2.bf16.msra.mxu1 %v8847_v9 }
 0x4c0   : > { %2857 = vmatprep.subr.bf16.mxu1 %v8852_v13 }
 0x4c3   : > { %2858 = vmatpush2.bf16.msra.mxu1 %v8850_v63 }
 0x4c4   : > { %2859 = vmatprep.subr.bf16.mxu1 %v8855_v14 }
 0x4c7   : > { %2860 = vmatpush2.bf16.msra.mxu1 %v8853_v43 }
 0x4c8   : > { %2861 = vmatprep.subr.bf16.mxu1 %v8858_v15 }
 0x4cb   : > { %2862 = vmatpush2.bf16.msra.mxu1 %v8856_v17 }
 0x4cc   : > { %2863 = vmatprep.subr.bf16.mxu1 %v8861_v20 }
 0x4cf   : > { %2864 = vmatpush2.bf16.msra.mxu1 %v8859_v44 }
 0x4d0   : > { %2865 = vmatprep.subr.bf16.mxu1 %v8864_v45 }
 0x4d3   : > { %2866 = vmatpush2.bf16.msra.mxu1 %v8862_v24 }
 0x4d4   : > { %2867 = vmatprep.subr.bf16.mxu1 %v8867_v25 }
 0x4d7   : > { %2868 = vmatpush2.bf16.msra.mxu1 %v8865_v26 }
 0x4d8   : > { %2894 = vmatprep.subr.bf16.mxu1 %v8870_v27  ;;  %v8919_v27 = vld [vmem:[%s11640_s5 + $0x18] sm:$0xff]  }
 0x4da   : > { %2870 = vmatmul.mubr.bf16.vlgmr.msra.gmra.mxu1 %v2234_v19  ;;  %v8885_v19 = vld [vmem:[#allocation8 + $0x254] ss:$8 sps:$4 sm:$0xff]  }
 0x4db   : > { %2895 = vmatpush1.bf16.msra.mxu1 %v8868_v46  ;;  %2912 = vmatprep.mubr.bf16.mxu1 %v10421_v56  ;;  %v8931_v46 = vld [vmem:[#allocation8 + $0x374] ss:$8 sps:$4 sm:$0xff]  }
 0x4dc   : > { %3229 = vmatprep.subr.bf16.mxu1 %v8873_v28  ;;  %v8934_v28 = vld [vmem:[#allocation8 + $0x364] ss:$8 sps:$4 sm:$0xff]  }
 0x4e2   : > { %7695 = vmatmul.mubr.msk.bf16.vlgmr.msra.gmra.mxu1 %vm2574_vm12, %v2236_v23  ;;  %v8889_v23 = vld [vmem:[#allocation8 + $0x230] ss:$8 sps:$4 sm:$0xff]  }
 0x4e3   : > { %3230 = vmatpush1.bf16.msra.mxu1 %v8871_v30  ;;  %v8932_v30 = vld [vmem:[#allocation8 + $0x360] ss:$8 sps:$4 sm:$0xff]  }
 0x4e4   : > { %3231 = vmatprep.subr.bf16.mxu1 %v8876_v31  ;;  %v8935_v31 = vld [vmem:[#allocation8 + $0x350] ss:$8 sps:$4 sm:$0xff]  }
 0x4e7   : > { %3232 = vmatpush1.bf16.msra.mxu1 %v8874_v32  ;;  %v8940_v32 = vld [vmem:[#allocation8 + $0x344] ss:$8 sps:$4 sm:$0xff]  }
 0x4e8   : > { %3233 = vmatprep.subr.bf16.mxu1 %v8879_v33  ;;  %v8938_v33 = vld [vmem:[#allocation8 + $0x340] ss:$8 sps:$4 sm:$0xff]  }
 0x4eb   : > { %3234 = vmatpush1.bf16.msra.mxu1 %v8877_v48  ;;  %v8943_v48 = vld [vmem:[#allocation8 + $0x334] ss:$8 sps:$4 sm:$0xff]  }
 0x4ec   : > { %3235 = vmatprep.subr.bf16.mxu1 %v8882_v16  ;;  %v8941_v16 = vld [vmem:[#allocation8 + $0x330] ss:$8 sps:$4 sm:$0xff]  }
 0x4ef   : > { %3236 = vmatpush1.bf16.msra.mxu1 %v8880_v18  ;;  %v8946_v18 = vld [vmem:[#allocation8 + $0x424] ss:$8 sps:$4 sm:$0xff]  }
 0x4f0   : > { %3237 = vmatprep.subr.bf16.mxu1 %v8885_v19  ;;  %v8944_v19 = vld [vmem:[#allocation8 + $0x420] ss:$8 sps:$4 sm:$0xff]  }
 0x4f3   : > { %3238 = vmatpush1.bf16.msra.mxu1 %v8883_v34  ;;  %v8949_v34 = vld [vmem:[#allocation8 + $0x414] ss:$8 sps:$4 sm:$0xff]  }
 0x4f4   : > { %3239 = vmatprep.subr.bf16.mxu1 %v8888_v35  ;;  %v8947_v35 = vld [vmem:[#allocation8 + $0x410] ss:$8 sps:$4 sm:$0xff]  }
 0x4f7   : > { %3240 = vmatpush1.bf16.msra.mxu1 %v8886_v21  ;;  %v8952_v21 = vld [vmem:[#allocation8 + $0x404] ss:$8 sps:$4 sm:$0xff]  }
 0x4f8   : > { %3241 = vmatprep.subr.bf16.mxu1 %v8891_v22  ;;  %v8950_v22 = vld [vmem:[#allocation8 + $0x400] ss:$8 sps:$4 sm:$0xff]  }
 0x4fb   : > { %3242 = vmatpush1.bf16.msra.mxu1 %v8889_v23  ;;  %v8955_v23 = vld [vmem:[#allocation8 + $0x3f4] ss:$8 sps:$4 sm:$0xff]  }
 0x4fc   : > { %3243 = vmatprep.subr.bf16.mxu1 %v8894_v36  ;;  %v8953_v36 = vld [vmem:[#allocation8 + $0x3f0] ss:$8 sps:$4 sm:$0xff]  }
 0x4ff   : > { %3244 = vmatpush1.bf16.msra.mxu1 %v8892_v37  ;;  %v8958_v37 = vld [vmem:[#allocation8 + $0x3e4] ss:$8 sps:$4 sm:$0xff]  }
 0x500   : > { %3245 = vmatprep.subr.bf16.mxu1 %v8897_v47  ;;  %v8956_v47 = vld [vmem:[#allocation8 + $0x3e0] ss:$8 sps:$4 sm:$0xff]  }
 0x503   : > { %3246 = vmatpush2.bf16.msra.mxu1 %v8895_v39  ;;  %v8961_v39 = vld [vmem:[#allocation8 + $0x3d4] ss:$8 sps:$4 sm:$0xff]  }
 0x504   : > { %3247 = vmatprep.subr.bf16.mxu1 %v8900_v40  ;;  %v8959_v40 = vld [vmem:[#allocation8 + $0x3d0] ss:$8 sps:$4 sm:$0xff]  }
 0x507   : > { %3248 = vmatpush2.bf16.msra.mxu1 %v8898_v51  ;;  %v8964_v51 = vld [vmem:[#allocation8 + $0x3c4] ss:$8 sps:$4 sm:$0xff]  }
 0x508   : > { %3249 = vmatprep.subr.bf16.mxu1 %v8903_v52  ;;  %v8962_v52 = vld [vmem:[#allocation8 + $0x3c0] ss:$8 sps:$4 sm:$0xff]  }
 0x50b   : > { %3250 = vmatpush2.bf16.msra.mxu1 %v8901_v53  ;;  %v8967_v53 = vld [vmem:[#allocation8 + $0x3b4] ss:$8 sps:$4 sm:$0xff]  }
 0x50c   : > { %3251 = vmatprep.subr.bf16.mxu1 %v8906_v54  ;;  %v8965_v54 = vld [vmem:[#allocation8 + $0x3b0] ss:$8 sps:$4 sm:$0xff]  }
 0x50f   : > { %3252 = vmatpush2.bf16.msra.mxu1 %v8904_v55  ;;  %v8970_v55 = vld [vmem:[#allocation8 + $0x434] ss:$8 sps:$4 sm:$0xff]  }
 0x510   : > { %3253 = vmatprep.subr.bf16.mxu1 %v8909_v49  ;;  %v8968_v49 = vld [vmem:[#allocation8 + $0x430] ss:$8 sps:$4 sm:$0xff]  }
 0x513   : > { %3254 = vmatpush2.bf16.msra.mxu1 %v8907_v50 }
 0x514   : > { %3255 = vmatprep.subr.bf16.mxu1 %v8912_v58 }
 0x517   : > { %3256 = vmatpush2.bf16.msra.mxu1 %v8910_v3 }
 0x518   : > { %3257 = vmatprep.subr.bf16.mxu1 %v8915_v59 }
 0x51b   : > { %3258 = vmatpush2.bf16.msra.mxu1 %v8913_v60 }
 0x51c   : > { %3259 = vmatprep.subr.bf16.mxu1 %v8918_v61 }
 0x51f   : > { %3260 = vmatpush2.bf16.msra.mxu1 %v8916_v0 }
 0x520   : > { %3682 = vmatprep.subr.bf16.mxu1 %v8970_v55 }
 0x551   : > { %v10434_v5 = vpop.f32.mrf.mxu0 }
 0x553   : > { %v10436_v41 = vpop.f32.mrf.mxu0 }
 0x555   : > { %v10438_v9 = vpop.f32.mrf.mxu0 }
 0x557   : > { %v10440_v13 = vpop.f32.mrf.mxu0 }
 0x55a   : > { %v2655_v50 = vpop.f32.mrf.mxu1 }
 0x55c   : > { %v2657_v58 = vpop.f32.mrf.mxu1 }
 0x55d   : > { %v2968_v63 = vpop.f32.mrf.mxu0 }
 0x55e   : > { %v2659_v3 = vpop.f32.mrf.mxu1 }
 0x55f   : > { %v2970_v14 = vpop.f32.mrf.mxu0 }
 0x560   : > { %v2661_v59 = vpop.f32.mrf.mxu1 }
 0x561   : > { %v2972_v43 = vpop.f32.mrf.mxu0 }
 0x562   : > { %v3018_v20 = vpack.c.bf16 %v2972_v43, %v2968_v63 }
 0x563   : > { %v2974_v15 = vpop.f32.mrf.mxu0 }
 0x564   : > { %v3019_v17 = vpack.c.bf16 %v2974_v15, %v2970_v14 }
 0x566   : > { %3261 = vmatprep.mubr.bf16.mxu1 %v3019_v17 }
 0x567   : > { %3262 = vmatmul.mubr.bf16.vlgmr.msra.gmra.mxu1 %v3018_v20 }
 0x568   : > { %3700 = vmatprep.mubr.bf16.mxu1 %v10421_v56  ;;  %3683 = vmatpush1.bf16.msra.mxu1 %v8968_v49 }
 0x569   : > { %v3011_v44 = vpop.f32.mrf.mxu0 }
 0x56b   : > { %v8433_v45 = vpop.f32.mrf.mxu0 }
 0x56d   : > { %v3014_v24 = vpop.f32.mrf.mxu0 }
 0x56e   : > { %v3020_v25 = vpack.c.bf16 %v3014_v24, %v3011_v44  ;;  %v2656_v44 = vadd.f32 %v2655_v50, %v10434_v5  ;;  %v2658_v24 = vadd.f32 %v2657_v58, %v10436_v41 }
 0x56f   : > { %v8434_v26 = vpop.f32.mrf.mxu0 }
 0x570   : > { %7736 = vmatmul.mubr.msk.bf16.vlgmr.msra.gmra.mxu0 %vm2574_vm12, %v3020_v25 }
 0x571   : > { %3341 = vmatpush1.bf16.msra.mxu0 %v10332_v62  ;;  %3362 = vmatprep.mubr.bf16.mxu0 %v10421_v56  ;;  %v8922_v62 = vld [vmem:[#allocation8 + $0x3a4] ss:$8 sps:$4 sm:$0xff]  }
 0x572   : > { %3342 = vmatprep.subr.bf16.mxu0 %v10334_v1  ;;  %v8920_v1 = vld [vmem:[#allocation8 + $0x3a0] ss:$8 sps:$4 sm:$0xff]  }
 0x575   : > { %3343 = vmatpush1.bf16.msra.mxu0 %v10338_v2  ;;  %v8925_v2 = vld [vmem:[#allocation8 + $0x394] ss:$8 sps:$4 sm:$0xff]  }
 0x576   : > { %3344 = vmatprep.subr.bf16.mxu0 %v10341_v7  ;;  %v8923_v7 = vld [vmem:[#allocation8 + $0x390] ss:$8 sps:$4 sm:$0xff]  }
 0x579   : > { %3345 = vmatpush1.bf16.msra.mxu0 %v10344_v8  ;;  %v8928_v8 = vld [vmem:[#allocation8 + $0x384] ss:$8 sps:$4 sm:$0xff]  }
 0x57a   : > { %8435 = vmatprep.subr.bf16.mxu0 %v9635_v10 }
 0x57c   : > { %7741 = vmatmul.mubr.msk.bf16.vlgmr.msra.gmra.mxu0 %vm2137_vm13, %v8919_v27 }
 0x57d   : > { %8436 = vmatpush3.bf16.msra.mxu0 %v10353_v42  ;;  %8441 = vmatprep.mubr.msk.bf16.mxu0 %vm11659_vm9, %v9635_v10  ;;  %v8926_v42 = vld [vmem:[#allocation8 + $0x380] ss:$8 sps:$4 sm:$0xff]   ;;  %vm3819_vm9 = vmand %vm11689_vm2, %vm1972_vm11  ;;  %vm11690_vm2 = vcmask 125952  }
 0x57e   : > { %8437 = vmatprep.subr.bf16.mxu0 %v9635_v10 }
 0x581   : > { %8438 = vmatpush3.bf16.msra.mxu0 %v10359_v11  ;;  %v8929_v11 = vld [vmem:[#allocation8 + $0x370] ss:$8 sps:$4 sm:$0xff]  }
 0x582   : > { %8439 = vmatprep.subr.bf16.mxu0 %v9635_v10 }
 0x585   : > { %8440 = vmatpush3.bf16.msra.mxu0 %v10363_v12  ;;  %v8937_v12 = vld [vmem:[#allocation8 + $0x354] ss:$8 sps:$4 sm:$0xff]  }
 0x586   : > { %3625 = vmatprep.subr.bf16.mxu0 %v8922_v62 }
 0x588   : > { %8442 = vmatmul.mubr.msk.bf16.vlgmr.msra.gmra.mxu0 %vm2137_vm13, %v8919_v27  ;;  %v2660_v27 = vadd.f32 %v2659_v3, %v10438_v9  ;;  %vm3797_vm13 = vcmask 1043584  }
 0x589   : > { %3626 = vmatpush1.bf16.msra.mxu0 %v8920_v1 }
 0x58a   : > { %3627 = vmatprep.subr.bf16.mxu0 %v8925_v2 }
 0x58d   : > { %3628 = vmatpush1.bf16.msra.mxu0 %v8923_v7  ;;  %v2662_v7 = vadd.f32 %v2661_v59, %v10440_v13 }
 0x58e   : > { %3629 = vmatprep.subr.bf16.mxu0 %v8928_v8 }
 0x591   : > { %3630 = vmatpush1.bf16.msra.mxu0 %v8926_v42 }
 0x592   : > { %3631 = vmatprep.subr.bf16.mxu0 %v8931_v46 }
 0x595   : > { %3632 = vmatpush1.bf16.msra.mxu0 %v8929_v11 }
 0x596   : > { %3633 = vmatprep.subr.bf16.mxu0 %v8934_v28 }
 0x599   : > { %3634 = vmatpush1.bf16.msra.mxu0 %v8932_v30 }
 0x59a   : > { %3635 = vmatprep.subr.bf16.mxu0 %v8937_v12  ;;  %v2871_v60 = vpop.f32.mrf.mxu1 }
 0x59b   : > { %v2872_v25 = vadd.f32 %v2871_v60, %v2656_v44 }
 0x59c   : > { %v2873_v61 = vpop.f32.mrf.mxu1 }
 0x59d   : > { %3636 = vmatpush1.bf16.msra.mxu0 %v8935_v31  ;;  %v2874_v62 = vadd.f32 %v2873_v61, %v2658_v24 }
 0x59e   : > { %3637 = vmatprep.subr.bf16.mxu0 %v8940_v32  ;;  %v2875_v0 = vpop.f32.mrf.mxu1 }
 0x59f   : > { %v2876_v46 = vadd.f32 %v2875_v0, %v2660_v27 }
 0x5a0   : > { %v2877_v63 = vpop.f32.mrf.mxu1 }
 0x5a1   : > { %3638 = vmatpush1.bf16.msra.mxu0 %v8938_v33  ;;  %v2878_v5 = vadd.f32 %v2877_v63, %v2662_v7 }
 0x5a2   : > { %3639 = vmatprep.subr.bf16.mxu0 %v8943_v48  ;;  %v2914_v14 = vpop.f32.mrf.mxu1 }
 0x5a3   : > { %v2915_v1 = vadd.f32 %v2914_v14, %v2872_v25 }
 0x5a4   : > { %v2916_v43 = vpop.f32.mrf.mxu1 }
 0x5a5   : > { %3640 = vmatpush1.bf16.msra.mxu0 %v8941_v16  ;;  %v2917_v11 = vadd.f32 %v2916_v43, %v2874_v62 }
 0x5a6   : > { %3641 = vmatprep.subr.bf16.mxu0 %v8946_v18  ;;  %v2918_v15 = vpop.f32.mrf.mxu1 }
 0x5a7   : > { %v2919_v31 = vadd.f32 %v2918_v15, %v2876_v46 }
 0x5a8   : > { %v2920_v17 = vpop.f32.mrf.mxu1 }
 0x5a9   : > { %3642 = vmatpush2.bf16.msra.mxu0 %v8944_v19  ;;  %v2921_v16 = vadd.f32 %v2920_v17, %v2878_v5 }
 0x5aa   : > { %3643 = vmatprep.subr.bf16.mxu0 %v8949_v34 }
 0x5ad   : > { %3644 = vmatpush2.bf16.msra.mxu0 %v8947_v35 }
 0x5ae   : > { %3645 = vmatprep.subr.bf16.mxu0 %v8952_v21 }
 0x5b1   : > { %3646 = vmatpush2.bf16.msra.mxu0 %v8950_v22 }
 0x5b2   : > { %3647 = vmatprep.subr.bf16.mxu0 %v8955_v23 }
 0x5b5   : > { %3648 = vmatpush2.bf16.msra.mxu0 %v8953_v36 }
 0x5b6   : > { %3649 = vmatprep.subr.bf16.mxu0 %v8958_v37 }
 0x5b9   : > { %3650 = vmatpush2.bf16.msra.mxu0 %v8956_v47 }
 0x5ba   : > { %3651 = vmatprep.subr.bf16.mxu0 %v8961_v39 }
 0x5bd   : > { %3652 = vmatpush2.bf16.msra.mxu0 %v8959_v40 }
 0x5be   : > { %3653 = vmatprep.subr.bf16.mxu0 %v8964_v51 }
 0x5c1   : > { %3654 = vmatpush2.bf16.msra.mxu0 %v8962_v52  ;;  %v3715_v52 = vld [vmem:[%s11642_s7] sm:$0x3] }
 0x5c2   : > { %3655 = vmatprep.subr.bf16.mxu0 %v8967_v53  ;;  %v3720_v49 = vrot.slane %v3715_v52, %v10221_v57  ;;  %v3724_v60 = vrot.slane %v3715_v52, %v10227_v6 }
 0x5c5   : > { %3656 = vmatpush2.bf16.msra.mxu0 %v8965_v54 }
 0x627   : > { %v3263_v20 = vpop.f32.mrf.mxu1 }
 0x629   : > { %v3265_v45 = vpop.f32.mrf.mxu1 }
 0x62b   : > { %v3267_v8 = vpop.f32.mrf.mxu1 }
 0x62d   : > { %v3269_v33 = vpop.f32.mrf.mxu1 }
 0x630   : > { %v3306_v26 = vpop.f32.mrf.mxu0 }
 0x631   : > { %v3307_v2 = vadd.f32 %v3306_v26, %v3263_v20 }
 0x632   : > { %v3308_v42 = vpop.f32.mrf.mxu0 }
 0x633   : > { %v3315_v28 = vadd.f32 %v3307_v2, %v2915_v1  ;;  %v3309_v30 = vadd.f32 %v3308_v42, %v3265_v45 }
 0x634   : > { %v3310_v12 = vpop.f32.mrf.mxu0 }
 0x635   : > { %v3316_v32 = vadd.f32 %v3309_v30, %v2917_v11  ;;  %v3311_v41 = vadd.f32 %v3310_v12, %v3267_v8 }
 0x636   : > { %v3312_v48 = vpop.f32.mrf.mxu0 }
 0x637   : > { %v3317_v9 = vadd.f32 %v3311_v41, %v2919_v31  ;;  %v3313_v18 = vadd.f32 %v3312_v48, %v3269_v33 }
 0x639   : > { %v3318_v19 = vadd.f32 %v3313_v18, %v2921_v16  ;;  %v3805_v18 = vld [vmem:[#allocation3 + $0x8] sm:$0xf] }
 0x63c   : > { %v3364_v34 = vpop.f32.mrf.mxu0 }
 0x63e   : > { %v3366_v35 = vpop.f32.mrf.mxu0 }
 0x640   : > { %v3368_v13 = vpop.f32.mrf.mxu0 }
 0x641   : > { %v3414_v23 = vpack.c.bf16 %v3368_v13, %v3364_v34 }
 0x642   : > { %v3370_v21 = vpop.f32.mrf.mxu0 }
 0x643   : > { %v3415_v22 = vpack.c.bf16 %v3370_v21, %v3366_v35  ;;  %v3820_v21 = vld [vmem:[#allocation3 + $0x20] sm:$0x1] }
 0x645   : > { %3657 = vmatprep.mubr.bf16.mxu0 %v3415_v22 }
 0x646   : > { %3658 = vmatmul.mubr.bf16.vlgmr.msra.gmra.mxu0 %v3414_v23  ;;  %v3815_v23 = vld [vmem:[#allocation3 + $0x18] sm:$0x11] }
 0x647   : > { %4370 = vmatprep.mubr.bf16.mxu0 %v10421_v56 }
 0x648   : > { %v3407_v36 = vpop.f32.mrf.mxu0 }
 0x64a   : > { %v8443_v37 = vpop.f32.mrf.mxu0 }
 0x64c   : > { %v3410_v47 = vpop.f32.mrf.mxu0 }
 0x64d   : > { %v3416_v39 = vpack.c.bf16 %v3410_v47, %v3407_v36 }
 0x64e   : > { %v8444_v40 = vpop.f32.mrf.mxu0 }
 0x64f   : > { %7777 = vmatmul.mubr.msk.bf16.vlgmr.msra.gmra.mxu1 %vm2574_vm12, %v3416_v39 }
 0x650   : > { %3899 = vmatprep.mubr.bf16.mxu1 %v10421_v56 }
 0x706   : > { %v3659_v51 = vpop.f32.mrf.mxu0 }
 0x708   : > { %v3661_v53 = vpop.f32.mrf.mxu0 }
 0x70a   : > { %v3663_v58 = vpop.f32.mrf.mxu0 }
 0x70c   : > { %v3665_v15 = vpop.f32.mrf.mxu0 }
 0x70f   : > { %v3702_v54 = vpop.f32.mrf.mxu1 }
 0x710   : > { %v3703_v55 = vadd.f32 %v3702_v54, %v3659_v51 }
 0x711   : > { %v3704_v50 = vpop.f32.mrf.mxu1 }
 0x712   : > { %v3711_v3 = vadd.f32 %v3703_v55, %v3315_v28  ;;  %v3705_v59 = vadd.f32 %v3704_v50, %v3661_v53 }
 0x713   : > { %v3706_v61 = vpop.f32.mrf.mxu1 }
 0x714   : > { %v3727_v0 = vadd.f32 %v3720_v49, %v3711_v3  ;;  %v3712_v63 = vadd.f32 %v3705_v59, %v3316_v32  ;;  %v3707_v14 = vadd.f32 %v3706_v61, %v3663_v58 }
 0x715   : > { %v3708_v43 = vpop.f32.mrf.mxu1 }
 0x716   : > { %v3735_v17 = vmul.f32 0.05, %v3727_v0  ;;  %v3728_v20 = vadd.f32 %v3724_v60, %v3712_v63  ;;  %v3713_v44 = vadd.f32 %v3707_v14, %v3317_v9  ;;  %vm3731_vm3 = vcmp.ge.f32.partialorder %v3727_v0, 0.0  ;;  %v7789_v63 = vld [vmem:[%s11643_s8 + $0x4] sm:$0xf] }
 0x717   : > { %v3709_v45 = vadd.f32 %v3708_v43, %v3665_v15  ;;  %v8977_v14 = vld [vmem:[%s11644_s9 + $0x194] ss:$8 sps:$4 sm:$0xff]   ;;  %v8975_v43 = vld [vmem:[%s11644_s9 + $0x190] ss:$8 sps:$4 sm:$0xff]   ;;  %v8980_v15 = vld [vmem:[%s11644_s9 + $0x184] ss:$8 sps:$4 sm:$0xff]  }
 0x718   : > { %vm3732_vm5 = vcmp.ge.f32.partialorder %v3728_v20, 0.0  ;;  %v3736_v24 = vmul.f32 0.05, %v3728_v20  ;;  %v3729_v25 = vadd.f32 %v3720_v49, %v3713_v44  ;;  %v3739_v27 = vsel %vm3731_vm3, %v3727_v0, %v3735_v17  ;;  %vm3798_vm3 = vmand %vm3797_vm13, %vm2042_vm14  ;;  %v8978_v17 = vld [vmem:[%s11644_s9 + $0x180] ss:$8 sps:$4 sm:$0xff]  }
 0x719   : > { %v3714_v26 = vadd.f32 %v3709_v45, %v3318_v19  ;;  %vm3799_vm15 = vmor %vm10296_vm8, %vm3798_vm3  ;;  %v8981_v44 = vld [vmem:[%s11644_s9 + $0x170] ss:$8 sps:$4 sm:$0xff]   ;;  %v8986_v45 = vld [vmem:[%s11644_s9 + $0x164] ss:$8 sps:$4 sm:$0xff]  }
 0x71a   : > { %v3740_v62 = vsel %vm3732_vm5, %v3728_v20, %v3736_v24  ;;  %v3737_v1 = vmul.f32 0.05, %v3729_v25  ;;  %vm3733_vm4 = vcmp.ge.f32.partialorder %v3729_v25, 0.0  ;;  %vm11688_vm5 = vcmask 125952   ;;  %v8983_v20 = vld [vmem:[%s11644_s9 + $0x174] ss:$8 sps:$4 sm:$0xff]  }
 0x71b   : > { %v3730_v2 = vadd.f32 %v3724_v60, %v3714_v26  ;;  %v8366_v7 = vpack.c.bf16 %v3740_v62, %v3739_v27  ;;  %v3829_v60 = vld [vmem:[%s11643_s8] sm:$0xf]  ;;  %v8987_v26 = vld [vmem:[%s11644_s9 + $0x150] ss:$8 sps:$4 sm:$0xff]   ;;  %v8992_v27 = vld [vmem:[%s11644_s9 + $0x144] ss:$8 sps:$4 sm:$0xff]  }
 0x71c   : > { %v3741_v46 = vsel %vm3733_vm4, %v3729_v25, %v3737_v1  ;;  %vm3804_vm4 = vmand %vm11688_vm5, %vm2042_vm14  ;;  %v8984_v24 = vld [vmem:[%s11644_s9 + $0x160] ss:$8 sps:$4 sm:$0xff]   ;;  %v8989_v25 = vld [vmem:[%s11644_s9 + $0x154] ss:$8 sps:$4 sm:$0xff]  }
 0x71d   : > { %vm3734_vm6 = vcmp.ge.f32.partialorder %v3730_v2, 0.0  ;;  %v3738_v8 = vmul.f32 0.05, %v3730_v2  ;;  %v3762_v42 = vshrl.u32 %v8366_v7, 16  ;;  %v3765_v30 = vshll.u32 %v8366_v7, 16 }
 0x71e   : > { %v8990_v62 = vld [vmem:[%s11644_s9 + $0x140] ss:$8 sps:$4 sm:$0xff]   ;;  %v8995_v1 = vld [vmem:[%s11644_s9 + $0x134] ss:$8 sps:$4 sm:$0xff]   ;;  %v8998_v7 = vld [vmem:[%s11644_s9 + $0x124] ss:$8 sps:$4 sm:$0xff]  }
 0x71f   : > { %v3742_v11 = vsel %vm3734_vm6, %v3730_v2, %v3738_v8  ;;  %v3764_v28 = vrot.slane %v3762_v42, 7  ;;  %vm3812_vm6 = vcmask 1040512   ;;  %v8993_v2 = vld [vmem:[%s11644_s9 + $0x130] ss:$8 sps:$4 sm:$0xff]   ;;  %v8996_v8 = vld [vmem:[%s11644_s9 + $0x120] ss:$8 sps:$4 sm:$0xff]  }
 0x720   : > { %v8367_v12 = vpack.c.bf16 %v3742_v11, %v3741_v46  ;;  %v9001_v42 = vld [vmem:[%s11644_s9 + $0x214] ss:$8 sps:$4 sm:$0xff]   ;;  %v8999_v46 = vld [vmem:[%s11644_s9 + $0x210] ss:$8 sps:$4 sm:$0xff]   ;;  %v9004_v11 = vld [vmem:[%s11644_s9 + $0x204] ss:$8 sps:$4 sm:$0xff]  }
 0x721   : > { %v3767_v5 = vor.u32 %v3765_v30, %v3764_v28  ;;  %v3768_v48 = vrot.slane %v3764_v28, 4  ;;  %v9002_v28 = vld [vmem:[%s11644_s9 + $0x200] ss:$8 sps:$4 sm:$0xff]   ;;  %v9007_v30 = vld [vmem:[%s11644_s9 + $0x1f4] ss:$8 sps:$4 sm:$0xff]  }
 0x722   : > { %v3770_v31 = vshrl.u32 %v8367_v12, 16  ;;  %v3773_v41 = vshll.u32 %v8367_v12, 16  ;;  %v9005_v12 = vld [vmem:[%s11644_s9 + $0x1f0] ss:$8 sps:$4 sm:$0xff]  }
 0x723   : > { %3778 = vrot.lane.b32.xlu0 %v3767_v5, %s9637_s20  ;;  %v9010_v5 = vld [vmem:[%s11644_s9 + $0x1e4] ss:$8 sps:$4 sm:$0xff]  }
 0x724   : > { %v3772_v32 = vrot.slane %v3770_v31, 7  ;;  %v9008_v31 = vld [vmem:[%s11644_s9 + $0x1e0] ss:$8 sps:$4 sm:$0xff]  }
 0x726   : > { %v3777_v33 = vrot.slane %v3772_v32, 4  ;;  %v3775_v16 = vor.u32 %v3773_v41, %v3772_v32  ;;  %v9013_v32 = vld [vmem:[%s11644_s9 + $0x1d4] ss:$8 sps:$4 sm:$0xff]   ;;  %v9011_v41 = vld [vmem:[%s11644_s9 + $0x1d0] ss:$8 sps:$4 sm:$0xff]  }
 0x728   : > { %3782 = vrot.lane.b32.xlu1 %v3777_v33, %s9637_s20  ;;  %v3776_v9 = vsel %vm10257_vm1, %v3768_v48, %v3775_v16  ;;  %vm3813_vm1 = vmand %vm3812_vm6, %vm1972_vm11  ;;  %v9016_v33 = vld [vmem:[%s11644_s9 + $0x1c4] ss:$8 sps:$4 sm:$0xff]   ;;  %v9014_v48 = vld [vmem:[%s11644_s9 + $0x1c0] ss:$8 sps:$4 sm:$0xff]   ;;  %vm5495_vm6 = vcmask 1040640  }
 0x729   : > { %vm3814_vm5 = vmor %vm10273_vm7, %vm3813_vm1  ;;  %v9019_v16 = vld [vmem:[%s11644_s9 + $0x1b4] ss:$8 sps:$4 sm:$0xff]   ;;  %vm5484_vm1 = vcmask 1043712  }
 0x72c   : > { %3780 = vrot.lane.b32.xlu1 %v3776_v9, %s9637_s20  ;;  %v9017_v9 = vld [vmem:[%s11644_s9 + $0x1b0] ss:$8 sps:$4 sm:$0xff]  }
 0x795   : > { %v3779_v19 = vpop.permute.xlu0 %3778 }
 0x796   : > { %v3784_v34 = vrot.slane %v3779_v19, 4 }
 0x798   : > { %v3788_v35 = vsel %vm2574_vm12, %v3784_v34, %v3779_v19  ;;  %v3806_v13 = vsel %vm3804_vm4, %v3784_v34, %v3805_v18  ;;  %v9022_v18 = vld [vmem:[%s11644_s9 + $0x1a4] ss:$8 sps:$4 sm:$0xff]   ;;  %v9025_v19 = vld [vmem:[%s11644_s9 + $0x234] ss:$8 sps:$4 sm:$0xff]   ;;  %v9020_v34 = vld [vmem:[%s11644_s9 + $0x1a0] ss:$8 sps:$4 sm:$0xff]  }
 0x799   : > { %v3801_v4 = vsel %vm3799_vm15, %v3788_v35, %v10421_v56  ;;  %3807 = vst [vmem:[#allocation3 + $0x8] sm:$0xf] %v3806_v13  ;;  %vm3809_vm15 = vmor %vm2044_vm10, %vm3797_vm13  ;;  %vm3854_vm10 = vcmask 146432   ;;  %v9023_v35 = vld [vmem:[%s11644_s9 + $0x230] ss:$8 sps:$4 sm:$0xff]   ;;  %4350 = vmatprep.subr.bf16.mxu0 %v9025_v19  ;;  %vm5451_vm13 = vcmask 519168  }
 0x79a   : > { %v3783_v22 = vpop.permute.xlu1 %3782  ;;  %4351 = vmatpush1.bf16.msra.mxu0 %v9023_v35  ;;  %v9028_v13 = vld [vmem:[%s11644_s9 + $0x114] ss:$8 sps:$4 sm:$0xff]   ;;  %v9065_v19 = vld [vmem:[%s11644_s9 + $0xd0] ss:$8 sps:$4 sm:$0xff]   ;;  %v9068_v35 = vld [vmem:[%s11644_s9 + $0xc0] ss:$8 sps:$4 sm:$0xff]  }
 0x79b   : > { %v3786_v36 = vrot.slane %v3783_v22, 4  ;;  %5452 = vst.msk [vmem:[#allocation4 + $0x8] sm:$0xf] %vm5451_vm13, %v10421_v56  ;;  %vm11697_vm13 = vcmask 257024  }
 0x79d   : > { %v3790_v37 = vsel %vm2574_vm12, %v3786_v36, %v3783_v22  ;;  %v3821_v47 = vsel %vm3819_vm9, %v3786_v36, %v3820_v21  ;;  %vm11691_vm9 = vmmov 0   ;;  %v9029_v21 = vld [vmem:[%s11644_s9 + $0x220] ss:$8 sps:$4 sm:$0xff]   ;;  %v9037_v22 = vld [vmem:[%s11644_s9 + $0x74] ss:$8 sps:$4 sm:$0xff]  }
 0x79e   : > { %v3816_v39 = vsel %vm3814_vm5, %v3790_v37, %v3815_v23  ;;  %3822 = vst [vmem:[#allocation3 + $0x20] sm:$0x1] %v3821_v47  ;;  %v3781_v40 = vpop.permute.xlu1 %3780  ;;  %vm11044_vm5 = vmand %vm5495_vm6, %vm1972_vm11  ;;  %vm7223_vm6 = vcmask 1043456  }
 0x79f   : > { %3817 = vst [vmem:[#allocation3 + $0x18] sm:$0x11] %v3816_v39  ;;  %v3785_v51 = vrot.slane %v3781_v40, 4 }
 0x7a1   : > { %v3789_v52 = vsel %vm2574_vm12, %v3785_v51, %v3781_v40  ;;  %3811 = vst.msk [vmem:[#allocation3 + $0x14] sm:$0xf] %vm11690_vm2, %v3785_v51  ;;  %vm4293_vm12 = vcmask 261120  }
 0x7a2   : > { %3810 = vst.msk [vmem:[#allocation3 + $0xc] sm:$0xff] %vm3809_vm15, %v3789_v52  ;;  %vm11694_vm15 = vcmask 253952  }
 0x7a3   : > { %vm5502_vm2 = vmand %vm11694_vm15, %vm1972_vm11 }
 0x7a5   : > { %v8973_v59 = vld [vmem:[#allocation3 + $0x20] ss:$0 sps:$4 sm:$0x11]  }
 0x7a6   : > { %v3827_v53 = vld [vmem:[#allocation3 + $0x18] sm:$0x11]  ;;  %v10521_v61 = vsel %vm717_vm0, %v8973_v59, 0 }
 0x7a7   : > { %v10501_v54 = vcombine.high %v3827_v53, %v3827_v53  ;;  %v7783_v55 = vcombine.low %v3827_v53, %v3827_v53  ;;  %v9026_v59 = vld [vmem:[%s11644_s9 + $0x110] ss:$8 sps:$4 sm:$0xff]  }
 0x7a8   : > { %v10527_v0 = vld [vmem:[#allocation3 + $0x8] ss:$12 sps:$4 sm:$0xff]  }
 0x7a9   : > { %7786 = vmatprep.subr.msk.bf16.mxu1 %vm717_vm0, %v10501_v54  ;;  %v10506_v49 = vsel %vm717_vm0, %v7783_v55, 0  ;;  %v3825_v50 = vld [vmem:[#allocation3 + $0xc] sm:$0xff] }
 0x7aa   : > { %3880 = vmatpush1.bf16.msra.mxu1 %v10506_v49  ;;  %v10509_v58 = vcombine.high %v3801_v4, %v3825_v50  ;;  %v10512_v3 = vcombine.low %v3801_v4, %v3825_v50  ;;  %v9031_v4 = vld [vmem:[%s11644_s9 + $0x224] ss:$8 sps:$4 sm:$0xff]  }
 0x7ab   : > { %4352 = vmatprep.subr.bf16.mxu0 %v9031_v4  ;;  %v9071_v4 = vld [vmem:[%s11644_s9 + $0xb0] ss:$8 sps:$4 sm:$0xff]  }
 0x7ac   : > { %3881 = vmatprep.subr.bf16.mxu1 %v10509_v58  ;;  %4353 = vmatpush1.bf16.msra.mxu0 %v9029_v21  ;;  %v9076_v21 = vld [vmem:[%s11644_s9 + $0xa4] ss:$8 sps:$4 sm:$0xff]  }
 0x7ad   : > { %4562 = vmatprep.subr.bf16.mxu0 %v9037_v22  ;;  %v9074_v22 = vld [vmem:[%s11644_s9 + $0xa0] ss:$8 sps:$4 sm:$0xff]  }
 0x7ae   : > { %3882 = vmatpush1.bf16.msra.mxu1 %v10512_v3 }
 0x7af   : > { %8445 = vmatprep.subr.bf16.mxu1 %v9635_v10 }
 0x7b1   : > { %7787 = vmatmul.mubr.msk.bf16.vlgmr.msra.gmra.mxu1 %vm3854_vm10, %v3829_v60 }
 0x7b2   : > { %8446 = vmatpush3.bf16.msra.mxu1 %v10521_v61  ;;  %8449 = vmatprep.mubr.msk.bf16.mxu1 %vm11691_vm9, %v9635_v10 }
 0x7b3   : > { %8447 = vmatprep.subr.bf16.mxu1 %v9635_v10 }
 0x7b6   : > { %8448 = vmatpush3.bf16.msra.mxu1 %v10527_v0 }
 0x7b7   : > { %7790 = vmatprep.subr.msk.bf16.mxu1 %vm717_vm0, %v10501_v54 }
 0x7b9   : > { %8450 = vmatmul.mubr.msk.bf16.vlgmr.msra.gmra.mxu1 %vm3854_vm10, %v3829_v60 }
 0x7ba   : > { %4005 = vmatpush1.bf16.msra.mxu1 %v10506_v49  ;;  %4024 = vmatprep.mubr.bf16.mxu1 %v10421_v56 }
 0x7bb   : > { %4006 = vmatprep.subr.bf16.mxu1 %v10509_v58 }
 0x7be   : > { %4007 = vmatpush1.bf16.msra.mxu1 %v10512_v3 }
 0x7bf   : > { %8453 = vmatprep.subr.bf16.mxu1 %v9635_v10 }
 0x7c1   : > { %7791 = vmatmul.mubr.msk.bf16.vlgmr.msra.gmra.mxu1 %vm3854_vm10, %v7789_v63 }
 0x7c2   : > { %8454 = vmatpush3.bf16.msra.mxu1 %v10521_v61  ;;  %8457 = vmatprep.mubr.msk.bf16.mxu1 %vm11691_vm9, %v9635_v10 }
 0x7c3   : > { %8455 = vmatprep.subr.bf16.mxu1 %v9635_v10 }
 0x7c6   : > { %8456 = vmatpush3.bf16.msra.mxu1 %v10527_v0 }
 0x7c7   : > { %4297 = vmatprep.subr.bf16.mxu1 %v8977_v14  ;;  %v9034_v14 = vld [vmem:[%s11644_s9 + $0x104] ss:$8 sps:$4 sm:$0xff]  }
 0x7c9   : > { %8458 = vmatmul.mubr.msk.bf16.vlgmr.msra.gmra.mxu1 %vm3854_vm10, %v7789_v63 }
 0x7ca   : > { %4298 = vmatpush1.bf16.msra.mxu1 %v8975_v43 }
 0x7cb   : > { %4299 = vmatprep.subr.bf16.mxu1 %v8980_v15  ;;  %v9032_v15 = vld [vmem:[%s11644_s9 + $0x100] ss:$8 sps:$4 sm:$0xff]  }
 0x7ce   : > { %4300 = vmatpush1.bf16.msra.mxu1 %v8978_v17 }
 0x7cf   : > { %4301 = vmatprep.subr.bf16.mxu1 %v8983_v20  ;;  %v9035_v20 = vld [vmem:[%s11644_s9 + $0x70] ss:$8 sps:$4 sm:$0xff]  }
 0x7d2   : > { %4302 = vmatpush1.bf16.msra.mxu1 %v8981_v44 }
 0x7d3   : > { %4303 = vmatprep.subr.bf16.mxu1 %v8986_v45  ;;  %v9040_v45 = vld [vmem:[%s11644_s9 + $0x64] ss:$8 sps:$4 sm:$0xff]  }
 0x7d6   : > { %4304 = vmatpush1.bf16.msra.mxu1 %v8984_v24 }
 0x7d7   : > { %4305 = vmatprep.subr.bf16.mxu1 %v8989_v25 }
 0x7da   : > { %4306 = vmatpush1.bf16.msra.mxu1 %v8987_v26 }
 0x7db   : > { %4307 = vmatprep.subr.bf16.mxu1 %v8992_v27 }
 0x7de   : > { %4308 = vmatpush1.bf16.msra.mxu1 %v8990_v62  ;;  %v9038_v62 = vld [vmem:[%s11644_s9 + $0x60] ss:$8 sps:$4 sm:$0xff]  }
 0x7df   : > { %4309 = vmatprep.subr.bf16.mxu1 %v8995_v1  ;;  %v9043_v1 = vld [vmem:[%s11644_s9 + $0x54] ss:$8 sps:$4 sm:$0xff]  }
 0x7e2   : > { %4310 = vmatpush1.bf16.msra.mxu1 %v8993_v2 }
 0x7e3   : > { %4311 = vmatprep.subr.bf16.mxu1 %v8998_v7  ;;  %v9041_v7 = vld [vmem:[%s11644_s9 + $0x50] ss:$8 sps:$4 sm:$0xff]  }
 0x7e6   : > { %4312 = vmatpush1.bf16.msra.mxu1 %v8996_v8  ;;  %v9046_v8 = vld [vmem:[%s11644_s9 + $0x44] ss:$8 sps:$4 sm:$0xff]  }
 0x7e7   : > { %4313 = vmatprep.subr.bf16.mxu1 %v9001_v42  ;;  %v10703_v42 = vld [vmem:[%s11643_s8 + $0x8] sm:$0xf] }
 0x7ea   : > { %4314 = vmatpush2.bf16.msra.mxu1 %v8999_v46  ;;  %v9044_v46 = vld [vmem:[%s11644_s9 + $0x40] ss:$8 sps:$4 sm:$0xff]  }
 0x7eb   : > { %4315 = vmatprep.subr.bf16.mxu1 %v9004_v11  ;;  %v9049_v11 = vld [vmem:[%s11644_s9 + $0x34] ss:$8 sps:$4 sm:$0xff]  }
 0x7ee   : > { %4316 = vmatpush2.bf16.msra.mxu1 %v9002_v28  ;;  %v9047_v28 = vld [vmem:[%s11644_s9 + $0x30] ss:$8 sps:$4 sm:$0xff]  }
 0x7ef   : > { %4317 = vmatprep.subr.bf16.mxu1 %v9007_v30  ;;  %v9052_v30 = vld [vmem:[%s11644_s9 + $0x24] ss:$8 sps:$4 sm:$0xff]  }
 0x7f2   : > { %4318 = vmatpush2.bf16.msra.mxu1 %v9005_v12  ;;  %v9050_v12 = vld [vmem:[%s11644_s9 + $0x20] ss:$8 sps:$4 sm:$0xff]  }
 0x7f3   : > { %4319 = vmatprep.subr.bf16.mxu1 %v9010_v5  ;;  %v9055_v5 = vld [vmem:[%s11644_s9 + $0x14] ss:$8 sps:$4 sm:$0xff]  }
 0x7f6   : > { %4320 = vmatpush2.bf16.msra.mxu1 %v9008_v31  ;;  %v9053_v31 = vld [vmem:[%s11644_s9 + $0x10] ss:$8 sps:$4 sm:$0xff]  }
 0x7f7   : > { %4321 = vmatprep.subr.bf16.mxu1 %v9013_v32  ;;  %v9058_v32 = vld [vmem:[%s11644_s9 + $0x4] ss:$8 sps:$4 sm:$0xff]  }
 0x7fa   : > { %4322 = vmatpush2.bf16.msra.mxu1 %v9011_v41  ;;  %v9056_v41 = vld [vmem:[%s11644_s9] ss:$8 sps:$4 sm:$0xff]  }
 0x7fb   : > { %4323 = vmatprep.subr.bf16.mxu1 %v9016_v33  ;;  %v9061_v33 = vld [vmem:[%s11644_s9 + $0xf4] ss:$8 sps:$4 sm:$0xff]  }
 0x7fe   : > { %4324 = vmatpush2.bf16.msra.mxu1 %v9014_v48  ;;  %v9059_v48 = vld [vmem:[%s11644_s9 + $0xf0] ss:$8 sps:$4 sm:$0xff]  }
 0x7ff   : > { %4325 = vmatprep.subr.bf16.mxu1 %v9019_v16  ;;  %v9064_v16 = vld [vmem:[%s11644_s9 + $0xe4] ss:$8 sps:$4 sm:$0xff]  }
 0x802   : > { %4326 = vmatpush2.bf16.msra.mxu1 %v9017_v9  ;;  %v9062_v9 = vld [vmem:[%s11644_s9 + $0xe0] ss:$8 sps:$4 sm:$0xff]  }
 0x803   : > { %4327 = vmatprep.subr.bf16.mxu1 %v9022_v18  ;;  %v9067_v18 = vld [vmem:[%s11644_s9 + $0xd4] ss:$8 sps:$4 sm:$0xff]  }
 0x806   : > { %4328 = vmatpush2.bf16.msra.mxu1 %v9020_v34  ;;  %v9070_v34 = vld [vmem:[%s11644_s9 + $0xc4] ss:$8 sps:$4 sm:$0xff]  }
 0x807   : > { %4615 = vmatprep.subr.bf16.mxu1 %v9028_v13  ;;  %v9073_v13 = vld [vmem:[%s11644_s9 + $0xb4] ss:$8 sps:$4 sm:$0xff]  }
 0x871   : > { %v10662_v23 = vpop.f32.mrf.mxu1 }
 0x873   : > { %v3903_v36 = vpop.f32.mrf.mxu1 }
 0x874   : > { %v3949_v25 = vpack.c.bf16 %v3903_v36, %v3903_v36  ;;  %v9079_v36 = vld [vmem:[%s11644_s9 + $0x94] ss:$8 sps:$4 sm:$0xff]  }
 0x875   : > { %v3905_v37 = vpop.f32.mrf.mxu1 }
 0x876   : > { %v9077_v37 = vld [vmem:[%s11644_s9 + $0x90] ss:$8 sps:$4 sm:$0xff]  }
 0x877   : > { %v3906_v47 = vpop.f32.mrf.mxu1 }
 0x878   : > { %v9082_v47 = vld [vmem:[%s11644_s9 + $0x84] ss:$8 sps:$4 sm:$0xff]  }
 0x879   : > { %v3942_v39 = vpop.f32.mrf.mxu1 }
 0x87a   : > { %v3950_v26 = vpack.c.bf16 %v3942_v39, %v3942_v39  ;;  %v9080_v39 = vld [vmem:[%s11644_s9 + $0x80] ss:$8 sps:$4 sm:$0xff]  }
 0x87b   : > { %v8451_v40 = vpop.f32.mrf.mxu1 }
 0x87c   : > { %v3948_v40 = vpack.c.bf16 %v10662_v23, %v10662_v23  ;;  %v9083_v23 = vld [vmem:[%s11644_s9 + $0x350] ss:$8 sps:$4 sm:$0xff]  }
 0x87d   : > { %v3945_v51 = vpop.f32.mrf.mxu1 }
 0x87e   : > { %v9085_v51 = vld [vmem:[%s11644_s9 + $0x354] ss:$8 sps:$4 sm:$0xff]  }
 0x87f   : > { %v8452_v52 = vpop.f32.mrf.mxu1 }
 0x880   : > { %v9088_v52 = vld [vmem:[%s11644_s9 + $0x344] ss:$8 sps:$4 sm:$0xff]  }
 0x881   : > { %v4026_v53 = vpop.f32.mrf.mxu1 }
 0x882   : > { %v4073_v60 = vpack.c.bf16 %v4026_v53, %v4026_v53  ;;  %v9086_v53 = vld [vmem:[%s11644_s9 + $0x340] ss:$8 sps:$4 sm:$0xff]  }
 0x883   : > { %v4028_v55 = vpop.f32.mrf.mxu1 }
 0x884   : > { %v4074_v50 = vpack.c.bf16 %v4028_v55, %v4028_v55  ;;  %v9089_v55 = vld [vmem:[%s11644_s9 + $0x2b0] ss:$8 sps:$4 sm:$0xff]  }
 0x885   : > { %v4030_v63 = vpop.f32.mrf.mxu1 }
 0x886   : > { %4329 = vmatprep.mubr.bf16.mxu1 %v4074_v50  ;;  %v9091_v50 = vld [vmem:[%s11644_s9 + $0x2b4] ss:$8 sps:$4 sm:$0xff]  }
 0x887   : > { %v4031_v43 = vpop.f32.mrf.mxu1  ;;  %4330 = vmatmul.mubr.bf16.vlgmr.msra.gmra.mxu1 %v4073_v60  ;;  %v9092_v60 = vld [vmem:[%s11644_s9 + $0x2a0] ss:$8 sps:$4 sm:$0xff]   ;;  %v9097_v63 = vld [vmem:[%s11644_s9 + $0x294] ss:$8 sps:$4 sm:$0xff]  }
 0x888   : > { %4616 = vmatpush1.bf16.msra.mxu1 %v9026_v59  ;;  %4635 = vmatprep.mubr.bf16.mxu1 %v10421_v56  ;;  %v9094_v59 = vld [vmem:[%s11644_s9 + $0x2a4] ss:$8 sps:$4 sm:$0xff]  }
 0x889   : > { %v4067_v17 = vpop.f32.mrf.mxu1  ;;  %4617 = vmatprep.subr.bf16.mxu1 %v9034_v14  ;;  %v9095_v14 = vld [vmem:[%s11644_s9 + $0x290] ss:$8 sps:$4 sm:$0xff]   ;;  %v9100_v43 = vld [vmem:[%s11644_s9 + $0x284] ss:$8 sps:$4 sm:$0xff]  }
 0x88a   : > { %v4075_v44 = vpack.c.bf16 %v4067_v17, %v4067_v17  ;;  %v9101_v17 = vld [vmem:[%s11644_s9 + $0x270] ss:$8 sps:$4 sm:$0xff]  }
 0x88b   : > { %v8459_v24 = vpop.f32.mrf.mxu1 }
 0x88c   : > { %4618 = vmatpush1.bf16.msra.mxu1 %v9032_v15  ;;  %7865 = vmatmul.mubr.msk.bf16.vlgmr.msra.gmra.mxu0 %vm4293_vm12, %v4075_v44  ;;  %v9098_v15 = vld [vmem:[%s11644_s9 + $0x280] ss:$8 sps:$4 sm:$0xff]   ;;  %v9107_v24 = vld [vmem:[%s11644_s9 + $0x250] ss:$8 sps:$4 sm:$0xff]  }
 0x88d   : > { %4563 = vmatpush1.bf16.msra.mxu0 %v9035_v20  ;;  %7904 = vmatprep.subr.msk.bf16.mxu1 %vm717_vm0, %v10501_v54  ;;  %v4070_v27 = vpop.f32.mrf.mxu1  ;;  %v9106_v20 = vld [vmem:[%s11644_s9 + $0x264] ss:$8 sps:$4 sm:$0xff]   ;;  %v9104_v44 = vld [vmem:[%s11644_s9 + $0x260] ss:$8 sps:$4 sm:$0xff]  }
 0x88e   : > { %4594 = vmatprep.mubr.bf16.mxu0 %v3949_v25  ;;  %4564 = vmatprep.subr.bf16.mxu0 %v9040_v45  ;;  %v9109_v45 = vld [vmem:[%s11644_s9 + $0x254] ss:$8 sps:$4 sm:$0xff]   ;;  %v9112_v25 = vld [vmem:[%s11644_s9 + $0x244] ss:$8 sps:$4 sm:$0xff]  }
 0x88f   : > { %v8460_v2 = vpop.f32.mrf.mxu1  ;;  %7902 = vmatmul.mubr.msk.bf16.vlgmr.msra.gmra.mxu1 %vm4293_vm12, %v3950_v26  ;;  %v9110_v26 = vld [vmem:[%s11644_s9 + $0x240] ss:$8 sps:$4 sm:$0xff]   ;;  %v9115_v27 = vld [vmem:[%s11644_s9 + $0x334] ss:$8 sps:$4 sm:$0xff]  }
 0x890   : > { %4662 = vmatpush1.bf16.msra.mxu1 %v10506_v49  ;;  %4681 = vmatprep.mubr.bf16.mxu1 %v10421_v56  ;;  %v9116_v2 = vld [vmem:[%s11644_s9 + $0x320] ss:$8 sps:$4 sm:$0xff]  }
 0x891   : > { %4565 = vmatpush1.bf16.msra.mxu0 %v9038_v62  ;;  %4663 = vmatprep.subr.bf16.mxu1 %v10509_v58  ;;  %v9113_v62 = vld [vmem:[%s11644_s9 + $0x330] ss:$8 sps:$4 sm:$0xff]  }
 0x892   : > { %4566 = vmatprep.subr.bf16.mxu0 %v9043_v1  ;;  %v9118_v1 = vld [vmem:[%s11644_s9 + $0x324] ss:$8 sps:$4 sm:$0xff]  }
 0x894   : > { %4664 = vmatpush1.bf16.msra.mxu1 %v10512_v3 }
 0x895   : > { %4567 = vmatpush1.bf16.msra.mxu0 %v9041_v7  ;;  %4953 = vmatprep.subr.bf16.mxu1 %v9091_v50  ;;  %v9121_v7 = vld [vmem:[%s11644_s9 + $0x314] ss:$8 sps:$4 sm:$0xff]  }
 0x896   : > { %4568 = vmatprep.subr.bf16.mxu0 %v9046_v8  ;;  %v9119_v8 = vld [vmem:[%s11644_s9 + $0x310] ss:$8 sps:$4 sm:$0xff]  }
 0x897   : > { %7905 = vmatmul.mubr.msk.bf16.vlgmr.msra.gmra.mxu1 %vm3854_vm10, %v10703_v42 }
 0x898   : > { %4954 = vmatpush1.bf16.msra.mxu1 %v9089_v55 }
 0x899   : > { %4569 = vmatpush1.bf16.msra.mxu0 %v9044_v46  ;;  %4955 = vmatprep.subr.bf16.mxu1 %v9094_v59  ;;  %v9122_v46 = vld [vmem:[%s11644_s9 + $0x300] ss:$8 sps:$4 sm:$0xff]  }
 0x89a   : > { %4570 = vmatprep.subr.bf16.mxu0 %v9049_v11  ;;  %v9127_v11 = vld [vmem:[%s11644_s9 + $0x2f4] ss:$8 sps:$4 sm:$0xff]  }
 0x89c   : > { %4956 = vmatpush1.bf16.msra.mxu1 %v9092_v60 }
 0x89d   : > { %4571 = vmatpush1.bf16.msra.mxu0 %v9047_v28  ;;  %4957 = vmatprep.subr.bf16.mxu1 %v9097_v63  ;;  %v9125_v28 = vld [vmem:[%s11644_s9 + $0x2f0] ss:$8 sps:$4 sm:$0xff]  }
 0x89e   : > { %4572 = vmatprep.subr.bf16.mxu0 %v9052_v30  ;;  %v9130_v30 = vld [vmem:[%s11644_s9 + $0x2e4] ss:$8 sps:$4 sm:$0xff]  }
 0x8a0   : > { %4958 = vmatpush1.bf16.msra.mxu1 %v9095_v14 }
 0x8a1   : > { %4573 = vmatpush1.bf16.msra.mxu0 %v9050_v12  ;;  %4959 = vmatprep.subr.bf16.mxu1 %v9100_v43  ;;  %v9128_v12 = vld [vmem:[%s11644_s9 + $0x2e0] ss:$8 sps:$4 sm:$0xff]  }
 0x8a2   : > { %4574 = vmatprep.subr.bf16.mxu0 %v9055_v5  ;;  %v9133_v5 = vld [vmem:[%s11644_s9 + $0x2d4] ss:$8 sps:$4 sm:$0xff]  }
 0x8a4   : > { %4960 = vmatpush1.bf16.msra.mxu1 %v9098_v15 }
 0x8a5   : > { %4575 = vmatpush1.bf16.msra.mxu0 %v9053_v31  ;;  %v9131_v31 = vld [vmem:[%s11644_s9 + $0x2d0] ss:$8 sps:$4 sm:$0xff]  }
 0x8a6   : > { %4576 = vmatprep.subr.bf16.mxu0 %v9058_v32  ;;  %v9136_v32 = vld [vmem:[%s11644_s9 + $0x2c4] ss:$8 sps:$4 sm:$0xff]  }
 0x8a9   : > { %4577 = vmatpush1.bf16.msra.mxu0 %v9056_v41  ;;  %v9134_v41 = vld [vmem:[%s11644_s9 + $0x2c0] ss:$8 sps:$4 sm:$0xff]  }
 0x8aa   : > { %4578 = vmatprep.subr.bf16.mxu0 %v9061_v33 }
 0x8ad   : > { %4579 = vmatpush2.bf16.msra.mxu0 %v9059_v48 }
 0x8ae   : > { %4580 = vmatprep.subr.bf16.mxu0 %v9064_v16 }
 0x8b1   : > { %4581 = vmatpush2.bf16.msra.mxu0 %v9062_v9 }
 0x8b2   : > { %4582 = vmatprep.subr.bf16.mxu0 %v9067_v18 }
 0x8b5   : > { %4583 = vmatpush2.bf16.msra.mxu0 %v9065_v19 }
 0x8b6   : > { %4584 = vmatprep.subr.bf16.mxu0 %v9070_v34 }
 0x8b9   : > { %4585 = vmatpush2.bf16.msra.mxu0 %v9068_v35 }
 0x8ba   : > { %4586 = vmatprep.subr.bf16.mxu0 %v9073_v13 }
 0x8bd   : > { %4587 = vmatpush2.bf16.msra.mxu0 %v9071_v4 }
 0x8be   : > { %4588 = vmatprep.subr.bf16.mxu0 %v9076_v21 }
 0x8c1   : > { %4589 = vmatpush2.bf16.msra.mxu0 %v9074_v22 }
 0x8c2   : > { %4590 = vmatprep.subr.bf16.mxu0 %v9079_v36 }
 0x8c5   : > { %4591 = vmatpush2.bf16.msra.mxu0 %v9077_v37 }
 0x8c6   : > { %4592 = vmatprep.subr.bf16.mxu0 %v9082_v47 }
 0x8c9   : > { %4593 = vmatpush2.bf16.msra.mxu0 %v9080_v39 }
 0x8ca   : > { %8461 = vmatprep.subr.bf16.mxu0 %v9635_v10 }
 0x8cc   : > { %4595 = vmatmul.mubr.bf16.vlgmr.msra.gmra.mxu0 %v3948_v40 }
 0x8cd   : > { %8462 = vmatpush3.bf16.msra.mxu0 %v10521_v61  ;;  %8465 = vmatprep.mubr.msk.bf16.mxu0 %vm11691_vm9, %v9635_v10 }
 0x8ce   : > { %8463 = vmatprep.subr.bf16.mxu0 %v9635_v10 }
 0x8d1   : > { %8464 = vmatpush3.bf16.msra.mxu0 %v10527_v0 }
 0x8d2   : > { %5006 = vmatprep.subr.bf16.mxu0 %v9085_v51 }
 0x8d4   : > { %8466 = vmatmul.mubr.msk.bf16.vlgmr.msra.gmra.mxu0 %vm3854_vm10, %v10703_v42  ;;  %v9124_v42 = vld [vmem:[%s11644_s9 + $0x304] ss:$8 sps:$4 sm:$0xff]  }
 0x8d5   : > { %5007 = vmatpush1.bf16.msra.mxu0 %v9083_v23  ;;  %5026 = vmatprep.mubr.bf16.mxu0 %v10421_v56 }
 0x8d6   : > { %5008 = vmatprep.subr.bf16.mxu0 %v9088_v52 }
 0x8d9   : > { %5009 = vmatpush1.bf16.msra.mxu0 %v9086_v53 }
 0x8da   : > { %7981 = vmatprep.subr.msk.bf16.mxu0 %vm717_vm0, %v10501_v54  ;;  %v9103_v54 = vld [vmem:[%s11644_s9 + $0x274] ss:$8 sps:$4 sm:$0xff]   ;;  %vm5454_vm0 = vcmask 516096  }
 0x8db   : > { %4961 = vmatprep.subr.bf16.mxu1 %v9103_v54  ;;  %5455 = vst.msk [vmem:[#allocation4 + $0x14] sm:$0x1] %vm5454_vm0, %v10421_v56  ;;  %vm5497_vm0 = vmor %vm10273_vm7, %vm11044_vm5  ;;  %vm5528_vm7 = vcmask 1044480  }
 0x8dc   : > { %4962 = vmatpush1.bf16.msra.mxu1 %v9101_v17 }
 0x8dd   : > { %4963 = vmatprep.subr.bf16.mxu1 %v9106_v20 }
 0x8e0   : > { %4964 = vmatpush1.bf16.msra.mxu1 %v9104_v44 }
 0x8e1   : > { %4965 = vmatprep.subr.bf16.mxu1 %v9109_v45  ;;  %v7980_v45 = vld [vmem:[%s11643_s8 + $0xc] sm:$0xf] }
 0x8e4   : > { %4966 = vmatpush1.bf16.msra.mxu1 %v9107_v24  ;;  %v9143_v24 = vld [vmem:[%s11644_s9 + $0x3b0] ss:$8 sps:$4 sm:$0xff]  }
 0x8e5   : > { %4967 = vmatprep.subr.bf16.mxu1 %v9112_v25  ;;  %v9148_v25 = vld [vmem:[%s11644_s9 + $0x3a4] ss:$8 sps:$4 sm:$0xff]  }
 0x8e8   : > { %4968 = vmatpush1.bf16.msra.mxu1 %v9110_v26  ;;  %v9146_v26 = vld [vmem:[%s11644_s9 + $0x3a0] ss:$8 sps:$4 sm:$0xff]  }
 0x8e9   : > { %4969 = vmatprep.subr.bf16.mxu1 %v9115_v27  ;;  %v9151_v27 = vld [vmem:[%s11644_s9 + $0x394] ss:$8 sps:$4 sm:$0xff]  }
 0x8ec   : > { %4970 = vmatpush2.bf16.msra.mxu1 %v9113_v62  ;;  %v9149_v62 = vld [vmem:[%s11644_s9 + $0x390] ss:$8 sps:$4 sm:$0xff]  }
 0x8ed   : > { %4971 = vmatprep.subr.bf16.mxu1 %v9118_v1  ;;  %v9154_v1 = vld [vmem:[%s11644_s9 + $0x384] ss:$8 sps:$4 sm:$0xff]  }
 0x8f0   : > { %4972 = vmatpush2.bf16.msra.mxu1 %v9116_v2  ;;  %v9152_v2 = vld [vmem:[%s11644_s9 + $0x380] ss:$8 sps:$4 sm:$0xff]  }
 0x8f1   : > { %4973 = vmatprep.subr.bf16.mxu1 %v9121_v7  ;;  %v9157_v7 = vld [vmem:[%s11644_s9 + $0x374] ss:$8 sps:$4 sm:$0xff]  }
 0x8f4   : > { %4974 = vmatpush2.bf16.msra.mxu1 %v9119_v8  ;;  %v9155_v8 = vld [vmem:[%s11644_s9 + $0x370] ss:$8 sps:$4 sm:$0xff]  }
 0x8f5   : > { %4975 = vmatprep.subr.bf16.mxu1 %v9124_v42  ;;  %v9160_v42 = vld [vmem:[%s11644_s9 + $0x364] ss:$8 sps:$4 sm:$0xff]  }
 0x8f8   : > { %4976 = vmatpush2.bf16.msra.mxu1 %v9122_v46  ;;  %v9158_v46 = vld [vmem:[%s11644_s9 + $0x360] ss:$8 sps:$4 sm:$0xff]  }
 0x8f9   : > { %4977 = vmatprep.subr.bf16.mxu1 %v9127_v11  ;;  %v9163_v11 = vld [vmem:[%s11644_s9 + $0x454] ss:$8 sps:$4 sm:$0xff]  }
 0x8fc   : > { %4978 = vmatpush2.bf16.msra.mxu1 %v9125_v28  ;;  %v9161_v28 = vld [vmem:[%s11644_s9 + $0x450] ss:$8 sps:$4 sm:$0xff]  }
 0x8fd   : > { %4979 = vmatprep.subr.bf16.mxu1 %v9130_v30  ;;  %v9166_v30 = vld [vmem:[%s11644_s9 + $0x444] ss:$8 sps:$4 sm:$0xff]  }
 0x900   : > { %4980 = vmatpush2.bf16.msra.mxu1 %v9128_v12  ;;  %v9164_v12 = vld [vmem:[%s11644_s9 + $0x440] ss:$8 sps:$4 sm:$0xff]  }
 0x901   : > { %4981 = vmatprep.subr.bf16.mxu1 %v9133_v5  ;;  %v9169_v5 = vld [vmem:[%s11644_s9 + $0x434] ss:$8 sps:$4 sm:$0xff]  }
 0x904   : > { %4982 = vmatpush2.bf16.msra.mxu1 %v9131_v31  ;;  %v9167_v31 = vld [vmem:[%s11644_s9 + $0x430] ss:$8 sps:$4 sm:$0xff]  }
 0x905   : > { %4983 = vmatprep.subr.bf16.mxu1 %v9136_v32  ;;  %v9172_v32 = vld [vmem:[%s11644_s9 + $0x424] ss:$8 sps:$4 sm:$0xff]  }
 0x908   : > { %4984 = vmatpush2.bf16.msra.mxu1 %v9134_v41  ;;  %v9170_v41 = vld [vmem:[%s11644_s9 + $0x420] ss:$8 sps:$4 sm:$0xff]  }
 0x947   : > { %v4331_v33 = vpop.f32.mrf.mxu1 }
 0x949   : > { %v4333_v48 = vpop.f32.mrf.mxu1 }
 0x94b   : > { %v4335_v16 = vpop.f32.mrf.mxu1 }
 0x94c   : > { %v4372_v9 = vpop.f32.mrf.mxu0  ;;  %v9178_v16 = vld [vmem:[%s11644_s9 + $0x404] ss:$8 sps:$4 sm:$0xff]  }
 0x94d   : > { %v4373_v18 = vadd.f32 %v4372_v9, %v4331_v33  ;;  %v4336_v19 = vpop.f32.mrf.mxu1  ;;  %v9175_v33 = vld [vmem:[%s11644_s9 + $0x414] ss:$8 sps:$4 sm:$0xff]   ;;  %v9176_v9 = vld [vmem:[%s11644_s9 + $0x400] ss:$8 sps:$4 sm:$0xff]  }
 0x94e   : > { %v4374_v34 = vpop.f32.mrf.mxu0  ;;  %v9179_v19 = vld [vmem:[%s11644_s9 + $0x3f0] ss:$8 sps:$4 sm:$0xff]  }
 0x94f   : > { %v4375_v35 = vadd.f32 %v4374_v34, %v4333_v48  ;;  %v4637_v13 = vpop.f32.mrf.mxu1  ;;  %v9173_v48 = vld [vmem:[%s11644_s9 + $0x410] ss:$8 sps:$4 sm:$0xff]   ;;  %v9184_v34 = vld [vmem:[%s11644_s9 + $0x3e4] ss:$8 sps:$4 sm:$0xff]  }
 0x950   : > { %v4376_v4 = vpop.f32.mrf.mxu0 }
 0x951   : > { %v4639_v21 = vpop.f32.mrf.mxu1  ;;  %v9185_v4 = vld [vmem:[%s11644_s9 + $0x470] ss:$8 sps:$4 sm:$0xff]  }
 0x952   : > { %v4377_v22 = vpop.f32.mrf.mxu0 }
 0x953   : > { %v4641_v36 = vpop.f32.mrf.mxu1  ;;  %v9190_v22 = vld [vmem:[%s11644_s9 + $0x464] ss:$8 sps:$4 sm:$0xff]  }
 0x955   : > { %v4642_v37 = vpop.f32.mrf.mxu1 }
 0x957   : > { %v4683_v47 = vpop.f32.mrf.mxu1 }
 0x958   : > { %v4730_v39 = vpack.c.bf16 %v4683_v47, %v4683_v47 }
 0x959   : > { %v4685_v40 = vpop.f32.mrf.mxu1 }
 0x95a   : > { %v4731_v51 = vpack.c.bf16 %v4685_v40, %v4685_v40 }
 0x95b   : > { %v4687_v23 = vpop.f32.mrf.mxu1 }
 0x95c   : > { %4985 = vmatprep.mubr.bf16.mxu1 %v4731_v51 }
 0x95d   : > { %4986 = vmatmul.mubr.bf16.vlgmr.msra.gmra.mxu1 %v4730_v39  ;;  %v4688_v52 = vpop.f32.mrf.mxu1 }
 0x95e   : > { %5419 = vmatprep.mubr.bf16.mxu1 %v10421_v56 }
 0x98c   : > { %v4596_v53 = vpop.f32.mrf.mxu0 }
 0x98d   : > { %v4597_v55 = vadd.f32 %v4596_v53, %v4373_v18  ;;  %v9181_v18 = vld [vmem:[%s11644_s9 + $0x3f4] ss:$8 sps:$4 sm:$0xff]  }
 0x98e   : > { %v4598_v50 = vpop.f32.mrf.mxu0 }
 0x98f   : > { %v10904_v59 = vadd.f32 %v4637_v13, %v4597_v55  ;;  %v4599_v60 = vadd.f32 %v4598_v50, %v4375_v35  ;;  %v9182_v35 = vld [vmem:[%s11644_s9 + $0x3e0] ss:$8 sps:$4 sm:$0xff]   ;;  %v9187_v13 = vld [vmem:[%s11644_s9 + $0x474] ss:$8 sps:$4 sm:$0xff]  }
 0x990   : > { %v4600_v63 = vpop.f32.mrf.mxu0  ;;  %5399 = vmatprep.subr.bf16.mxu1 %v9187_v13  ;;  %v5492_v13 = vld [vmem:[#allocation4 + $0x8] sm:$0xf] }
 0x991   : > { %v10906_v14 = vadd.f32 %v4639_v21, %v4599_v60  ;;  %5400 = vmatpush1.bf16.msra.mxu1 %v9185_v4  ;;  %v9188_v21 = vld [vmem:[%s11644_s9 + $0x460] ss:$8 sps:$4 sm:$0xff]  }
 0x992   : > { %v4601_v43 = vpop.f32.mrf.mxu0  ;;  %5401 = vmatprep.subr.bf16.mxu1 %v9190_v22 }
 0x994   : > { %v4724_v15 = vpop.f32.mrf.mxu0 }
 0x995   : > { %v4732_v54 = vpack.c.bf16 %v4724_v15, %v4724_v15  ;;  %5402 = vmatpush1.bf16.msra.mxu1 %v9188_v21  ;;  %v5498_v21 = vld [vmem:[#allocation4 + $0xc] sm:$0x11] }
 0x996   : > { %v8467_v17 = vpop.f32.mrf.mxu0 }
 0x997   : > { %7979 = vmatmul.mubr.msk.bf16.vlgmr.msra.gmra.mxu0 %vm4293_vm12, %v4732_v54 }
 0x998   : > { %5055 = vmatpush1.bf16.msra.mxu0 %v10506_v49  ;;  %v4727_v20 = vpop.f32.mrf.mxu0  ;;  %5074 = vmatprep.mubr.bf16.mxu0 %v10421_v56  ;;  %v9139_v49 = vld [vmem:[%s11644_s9 + $0x3d4] ss:$8 sps:$4 sm:$0xff]  }
 0x999   : > { %5056 = vmatprep.subr.bf16.mxu0 %v10509_v58  ;;  %v9137_v58 = vld [vmem:[%s11644_s9 + $0x3d0] ss:$8 sps:$4 sm:$0xff]  }
 0x99a   : > { %v8468_v44 = vpop.f32.mrf.mxu0 }
 0x99c   : > { %5057 = vmatpush1.bf16.msra.mxu0 %v10512_v3  ;;  %v9142_v3 = vld [vmem:[%s11644_s9 + $0x3c4] ss:$8 sps:$4 sm:$0xff]  }
 0x99d   : > { %8469 = vmatprep.subr.bf16.mxu0 %v9635_v10 }
 0x99f   : > { %7982 = vmatmul.mubr.msk.bf16.vlgmr.msra.gmra.mxu0 %vm3854_vm10, %v7980_v45 }
 0x9a0   : > { %8470 = vmatpush3.bf16.msra.mxu0 %v10521_v61  ;;  %8473 = vmatprep.mubr.msk.bf16.mxu0 %vm11691_vm9, %v9635_v10  ;;  %v9140_v61 = vld [vmem:[%s11644_s9 + $0x3c0] ss:$8 sps:$4 sm:$0xff]  }
 0x9a1   : > { %8471 = vmatprep.subr.bf16.mxu0 %v9635_v10 }
 0x9a4   : > { %8472 = vmatpush3.bf16.msra.mxu0 %v10527_v0  ;;  %v9145_v0 = vld [vmem:[%s11644_s9 + $0x3b4] ss:$8 sps:$4 sm:$0xff]  }
 0x9a5   : > { %5346 = vmatprep.subr.bf16.mxu0 %v9139_v49 }
 0x9a7   : > { %8474 = vmatmul.mubr.msk.bf16.vlgmr.msra.gmra.mxu0 %vm3854_vm10, %v7980_v45  ;;  %vm11051_vm10 = vmand %vm5484_vm1, %vm2042_vm14  ;;  %vm7246_vm1 = vcmask 0  }
 0x9a8   : > { %5347 = vmatpush1.bf16.msra.mxu0 %v9137_v58  ;;  %vm5486_vm11 = vmor %vm10296_vm8, %vm11051_vm10  ;;  %vm5992_vm8 = vcmask 523264  }
 0x9a9   : > { %5348 = vmatprep.subr.bf16.mxu0 %v9142_v3 }
 0x9ac   : > { %5349 = vmatpush1.bf16.msra.mxu0 %v9140_v61  ;;  %v5430_v61 = vld [vmem:[#allocation10] sm:$0x3] }
 0x9ad   : > { %5350 = vmatprep.subr.bf16.mxu0 %v9145_v0 }
 0x9b0   : > { %5351 = vmatpush1.bf16.msra.mxu0 %v9143_v24 }
 0x9b1   : > { %5352 = vmatprep.subr.bf16.mxu0 %v9148_v25 }
 0x9b4   : > { %5353 = vmatpush1.bf16.msra.mxu0 %v9146_v26  ;;  %v5435_v26 = vrot.slane %v5430_v61, %v10221_v57 }
 0x9b5   : > { %5354 = vmatprep.subr.bf16.mxu0 %v9151_v27 }
 0x9b8   : > { %5355 = vmatpush1.bf16.msra.mxu0 %v9149_v62 }
 0x9b9   : > { %5356 = vmatprep.subr.bf16.mxu0 %v9154_v1 }
 0x9bc   : > { %5357 = vmatpush1.bf16.msra.mxu0 %v9152_v2 }
 0x9bd   : > { %5358 = vmatprep.subr.bf16.mxu0 %v9157_v7  ;;  %v5439_v7 = vrot.slane %v5430_v61, %v10227_v6  ;;  %v9200_v61 = vld [vmem:[%s11647_s12 + $0x194] ss:$8 sps:$4 sm:$0xff]  }
 0x9c0   : > { %5359 = vmatpush1.bf16.msra.mxu0 %v9155_v8 }
 0x9c1   : > { %5360 = vmatprep.subr.bf16.mxu0 %v9160_v42 }
 0x9c4   : > { %5361 = vmatpush1.bf16.msra.mxu0 %v9158_v46 }
 0x9c5   : > { %5362 = vmatprep.subr.bf16.mxu0 %v9163_v11 }
 0x9c8   : > { %5363 = vmatpush2.bf16.msra.mxu0 %v9161_v28 }
 0x9c9   : > { %5364 = vmatprep.subr.bf16.mxu0 %v9166_v30 }
 0x9cc   : > { %5365 = vmatpush2.bf16.msra.mxu0 %v9164_v12 }
 0x9cd   : > { %5366 = vmatprep.subr.bf16.mxu0 %v9169_v5 }
 0x9d0   : > { %5367 = vmatpush2.bf16.msra.mxu0 %v9167_v31 }
 0x9d1   : > { %5368 = vmatprep.subr.bf16.mxu0 %v9172_v32 }
 0x9d4   : > { %5369 = vmatpush2.bf16.msra.mxu0 %v9170_v41 }
 0x9d5   : > { %5370 = vmatprep.subr.bf16.mxu0 %v9175_v33 }
 0x9d8   : > { %5371 = vmatpush2.bf16.msra.mxu0 %v9173_v48 }
 0x9d9   : > { %5372 = vmatprep.subr.bf16.mxu0 %v9178_v16 }
 0x9dc   : > { %5373 = vmatpush2.bf16.msra.mxu0 %v9176_v9 }
 0x9dd   : > { %5374 = vmatprep.subr.bf16.mxu0 %v9181_v18  ;;  %v9255_v18 = vld [vmem:[%s11647_s12 + $0x1d0] ss:$8 sps:$4 sm:$0xff]  }
 0x9e0   : > { %5375 = vmatpush2.bf16.msra.mxu0 %v9179_v19  ;;  %v9257_v19 = vld [vmem:[%s11647_s12 + $0x1d4] ss:$8 sps:$4 sm:$0xff]  }
 0x9e1   : > { %5376 = vmatprep.subr.bf16.mxu0 %v9184_v34  ;;  %v5503_v34 = vld [vmem:[#allocation4 + $0x14] sm:$0x1] }
 0x9e4   : > { %5377 = vmatpush2.bf16.msra.mxu0 %v9182_v35 }
 0x9e5   : > { %8483 = vmatprep.subr.bf16.mxu0 %v9635_v10 }
 0xa1d   : > { %v4987_v36 = vpop.f32.mrf.mxu1 }
 0xa1f   : > { %v4989_v37 = vpop.f32.mrf.mxu1 }
 0xa21   : > { %v4991_v47 = vpop.f32.mrf.mxu1 }
 0xa23   : > { %v4992_v39 = vpop.f32.mrf.mxu1 }
 0xa57   : > { %v5028_v40 = vpop.f32.mrf.mxu0 }
 0xa58   : > { %v5029_v51 = vadd.f32 %v5028_v40, %v4987_v36 }
 0xa59   : > { %v5030_v23 = vpop.f32.mrf.mxu0 }
 0xa5a   : > { %v5035_v52 = vadd.f32 %v5029_v51, %v10904_v59  ;;  %v5031_v53 = vadd.f32 %v5030_v23, %v4989_v37  ;;  %v9218_v23 = vld [vmem:[%s11647_s12 + $0x274] ss:$8 sps:$4 sm:$0xff]  }
 0xa5b   : > { %v5032_v55 = vpop.f32.mrf.mxu0 }
 0xa5c   : > { %v5036_v50 = vadd.f32 %v5031_v53, %v10906_v14 }
 0xa5d   : > { %v5033_v60 = vpop.f32.mrf.mxu0 }
 0xa5f   : > { %v5076_v63 = vpop.f32.mrf.mxu0 }
 0xa60   : > { %v5123_v54 = vpack.c.bf16 %v5076_v63, %v5076_v63  ;;  %v8064_v63 = vld [vmem:[%s11646_s11 + $0x2] sm:$0x3] }
 0xa61   : > { %v5078_v43 = vpop.f32.mrf.mxu0 }
 0xa62   : > { %v5124_v15 = vpack.c.bf16 %v5078_v43, %v5078_v43  ;;  %v9216_v43 = vld [vmem:[%s11647_s12 + $0x270] ss:$8 sps:$4 sm:$0xff]  }
 0xa63   : > { %v5080_v17 = vpop.f32.mrf.mxu0 }
 0xa64   : > { %5378 = vmatprep.mubr.bf16.mxu0 %v5124_v15  ;;  %v5510_v15 = vld [vmem:[%s11646_s11] sm:$0x3] }
 0xa65   : > { %v5081_v20 = vpop.f32.mrf.mxu0  ;;  %5379 = vmatmul.mubr.bf16.vlgmr.msra.gmra.mxu0 %v5123_v54  ;;  %v9224_v54 = vld [vmem:[%s11647_s12 + $0x264] ss:$8 sps:$4 sm:$0xff]   ;;  %v9222_v17 = vld [vmem:[%s11647_s12 + $0x260] ss:$8 sps:$4 sm:$0xff]  }
 0xa66   : > { %8485 = vmatprep.mubr.msk.bf16.mxu0 %vm11691_vm9, %v9635_v10  ;;  %v9230_v20 = vld [vmem:[%s11647_s12 + $0x254] ss:$8 sps:$4 sm:$0xff]  }
 0xa67   : > { %v5117_v44 = vpop.f32.mrf.mxu0 }
 0xa68   : > { %v5125_v45 = vpack.c.bf16 %v5117_v44, %v5117_v44  ;;  %v9228_v44 = vld [vmem:[%s11647_s12 + $0x250] ss:$8 sps:$4 sm:$0xff]  }
 0xa69   : > { %v8475_v49 = vpop.f32.mrf.mxu0 }
 0xa6a   : > { %8056 = vmatmul.mubr.msk.bf16.vlgmr.msra.gmra.mxu1 %vm4293_vm12, %v5125_v45  ;;  %v9194_v45 = vld [vmem:[%s11647_s12 + $0x1b4] ss:$8 sps:$4 sm:$0xff]   ;;  %v9236_v49 = vld [vmem:[%s11647_s12 + $0x244] ss:$8 sps:$4 sm:$0xff]  }
 0xa6b   : > { %v5120_v59 = vpop.f32.mrf.mxu0  ;;  %5570 = vmatprep.mubr.bf16.mxu1 %v10421_v56 }
 0xa6c   : > { %v9234_v59 = vld [vmem:[%s11647_s12 + $0x240] ss:$8 sps:$4 sm:$0xff]  }
 0xa6d   : > { %v8476_v14 = vpop.f32.mrf.mxu0 }
 0xa6e   : > { %v9192_v14 = vld [vmem:[%s11647_s12 + $0x1b0] ss:$8 sps:$4 sm:$0xff]  }
 0xb25   : > { %v5380_v58 = vpop.f32.mrf.mxu0 }
 0xb27   : > { %v5382_v3 = vpop.f32.mrf.mxu0 }
 0xb29   : > { %v5384_v0 = vpop.f32.mrf.mxu0 }
 0xb2a   : > { %v5421_v24 = vpop.f32.mrf.mxu1  ;;  %v9198_v0 = vld [vmem:[%s11647_s12 + $0x190] ss:$8 sps:$4 sm:$0xff]  }
 0xb2b   : > { %v5422_v25 = vadd.f32 %v5421_v24, %v5380_v58  ;;  %v5385_v27 = vpop.f32.mrf.mxu0  ;;  %v9197_v58 = vld [vmem:[%s11647_s12 + $0x1a4] ss:$8 sps:$4 sm:$0xff]  }
 0xb2c   : > { %v5423_v62 = vpop.f32.mrf.mxu1  ;;  %v9203_v24 = vld [vmem:[%s11647_s12 + $0x184] ss:$8 sps:$4 sm:$0xff]   ;;  %v9204_v27 = vld [vmem:[%s11647_s12 + $0x170] ss:$8 sps:$4 sm:$0xff]  }
 0xb2d   : > { %v5428_v1 = vadd.f32 %v5422_v25, %v5035_v52  ;;  %v5424_v2 = vadd.f32 %v5423_v62, %v5382_v3  ;;  %v9195_v3 = vld [vmem:[%s11647_s12 + $0x1a0] ss:$8 sps:$4 sm:$0xff]   ;;  %v9209_v62 = vld [vmem:[%s11647_s12 + $0x164] ss:$8 sps:$4 sm:$0xff]  }
 0xb2e   : > { %v5425_v8 = vpop.f32.mrf.mxu1  ;;  %v9201_v25 = vld [vmem:[%s11647_s12 + $0x180] ss:$8 sps:$4 sm:$0xff]  }
 0xb2f   : > { %v5442_v42 = vadd.f32 %v5435_v26, %v5428_v1  ;;  %v5429_v46 = vadd.f32 %v5424_v2, %v5036_v50  ;;  %v9206_v26 = vld [vmem:[%s11647_s12 + $0x174] ss:$8 sps:$4 sm:$0xff]   ;;  %v9207_v1 = vld [vmem:[%s11647_s12 + $0x160] ss:$8 sps:$4 sm:$0xff]   ;;  %v9215_v8 = vld [vmem:[%s11647_s12 + $0x144] ss:$8 sps:$4 sm:$0xff]  }
 0xb30   : > { %v5426_v11 = vpop.f32.mrf.mxu1  ;;  %v9212_v2 = vld [vmem:[%s11647_s12 + $0x154] ss:$8 sps:$4 sm:$0xff]  }
 0xb31   : > { %v5446_v28 = vmul.f32 0.05, %v5442_v42  ;;  %v5443_v30 = vadd.f32 %v5439_v7, %v5429_v46  ;;  %vm5444_vm3 = vcmp.ge.f32.partialorder %v5442_v42, 0.0  ;;  %v9210_v7 = vld [vmem:[%s11647_s12 + $0x150] ss:$8 sps:$4 sm:$0xff]  }
 0xb32   : > { %v9221_v46 = vld [vmem:[%s11647_s12 + $0x234] ss:$8 sps:$4 sm:$0xff]   ;;  %v9219_v11 = vld [vmem:[%s11647_s12 + $0x230] ss:$8 sps:$4 sm:$0xff]  }
 0xb33   : > { %vm5445_vm4 = vcmp.ge.f32.partialorder %v5443_v30, 0.0  ;;  %v5447_v12 = vmul.f32 0.05, %v5443_v30  ;;  %v5448_v5 = vsel %vm5444_vm3, %v5442_v42, %v5446_v28  ;;  %vm5491_vm3 = vmand %vm11697_vm13, %vm2042_vm14  ;;  %vm5524_vm14 = vcmask 80896   ;;  %v9213_v42 = vld [vmem:[%s11647_s12 + $0x140] ss:$8 sps:$4 sm:$0xff]  }
 0xb34   : > { %v9227_v28 = vld [vmem:[%s11647_s12 + $0x224] ss:$8 sps:$4 sm:$0xff]  }
 0xb35   : > { %v5449_v31 = vsel %vm5445_vm4, %v5443_v30, %v5447_v12  ;;  %v9225_v30 = vld [vmem:[%s11647_s12 + $0x220] ss:$8 sps:$4 sm:$0xff]   ;;  %v9233_v12 = vld [vmem:[%s11647_s12 + $0x214] ss:$8 sps:$4 sm:$0xff]  }
 0xb36   : > { %v8368_v32 = vpack.c.bf16 %v5449_v31, %v5448_v5  ;;  %v9231_v5 = vld [vmem:[%s11647_s12 + $0x210] ss:$8 sps:$4 sm:$0xff]   ;;  %v9242_v31 = vld [vmem:[%s11647_s12 + $0x74] ss:$8 sps:$4 sm:$0xff]  }
 0xb38   : > { %v5464_v41 = vshrl.u32 %v8368_v32, 16  ;;  %v5467_v48 = vshll.u32 %v8368_v32, 16  ;;  %v9239_v32 = vld [vmem:[%s11647_s12 + $0x204] ss:$8 sps:$4 sm:$0xff]  }
 0xb3a   : > { %v5466_v33 = vrot.slane %v5464_v41, 7  ;;  %v9237_v41 = vld [vmem:[%s11647_s12 + $0x200] ss:$8 sps:$4 sm:$0xff]  }
 0xb3c   : > { %v5470_v16 = vrot.slane %v5466_v33, 4  ;;  %v5469_v9 = vor.u32 %v5467_v48, %v5466_v33  ;;  %v9243_v33 = vld [vmem:[%s11647_s12 + $0x1f0] ss:$8 sps:$4 sm:$0xff]   ;;  %v9245_v48 = vld [vmem:[%s11647_s12 + $0x1f4] ss:$8 sps:$4 sm:$0xff]  }
 0xb3e   : > { %5473 = vrot.lane.b32.xlu1 %v5470_v16, %s9638_s22  ;;  %5471 = vrot.lane.b32.xlu0 %v5469_v9, %s9638_s22  ;;  %v9249_v16 = vld [vmem:[%s11647_s12 + $0x1e0] ss:$8 sps:$4 sm:$0xff]   ;;  %v9251_v9 = vld [vmem:[%s11647_s12 + $0x1e4] ss:$8 sps:$4 sm:$0xff]  }
 0xbb0   : > { %v5474_v35 = vpop.permute.xlu1 %5473  ;;  %v5472_v4 = vpop.permute.xlu0 %5471 }
 0xbb1   : > { %v5476_v22 = vrot.slane %v5474_v35, 4  ;;  %v5475_v36 = vrot.slane %v5472_v4, 4 }
 0xbb3   : > { %v5479_v37 = vsel %vm4293_vm12, %v5476_v22, %v5474_v35  ;;  %v5504_v47 = vsel %vm5502_vm2, %v5476_v22, %v5503_v34  ;;  %v5478_v29 = vsel %vm4293_vm12, %v5475_v36, %v5472_v4  ;;  %v5493_v39 = vsel %vm5491_vm3, %v5475_v36, %v5492_v13  ;;  %v9261_v34 = vld [vmem:[%s11647_s12 + $0x1c0] ss:$8 sps:$4 sm:$0xff]   ;;  %v9263_v35 = vld [vmem:[%s11647_s12 + $0x1c4] ss:$8 sps:$4 sm:$0xff]   ;;  %v9272_v13 = vld [vmem:[%s11647_s12 + $0x134] ss:$8 sps:$4 sm:$0xff]  }
 0xbb4   : > { %v5499_v40 = vsel %vm5497_vm0, %v5479_v37, %v5498_v21  ;;  %5505 = vst [vmem:[#allocation4 + $0x14] sm:$0x1] %v5504_v47  ;;  %v5488_v51 = vsel %vm5486_vm11, %v5478_v29, %v10421_v56  ;;  %5494 = vst [vmem:[#allocation4 + $0x8] sm:$0xf] %v5493_v39  ;;  %v9240_v21 = vld [vmem:[%s11647_s12 + $0x70] ss:$8 sps:$4 sm:$0xff]  }
 0xbb5   : > { %5500 = vst [vmem:[#allocation4 + $0xc] sm:$0x11] %v5499_v40  ;;  %v9248_v37 = vld [vmem:[%s11647_s12 + $0x64] ss:$8 sps:$4 sm:$0xff]  }
 0xbbb   : > { %v9191_v52 = vld [vmem:[#allocation4 + $0x8] ss:$12 sps:$4 sm:$0x1f]  }
 0xbbc   : > { %v5508_v38 = vld [vmem:[#allocation4 + $0xc] sm:$0x11]  ;;  %v11074_v50 = vsel %vm5528_vm7, %v9191_v52, 0 }
 0xbbd   : > { %v11071_v53 = vcombine.high %v5488_v51, %v5508_v38  ;;  %v8058_v55 = vcombine.low %v5488_v51, %v5508_v38  ;;  %8484 = vmatpush3.bf16.msra.mxu0 %v11074_v50  ;;  %v9246_v51 = vld [vmem:[%s11647_s12 + $0x60] ss:$8 sps:$4 sm:$0xff]   ;;  %v9254_v38 = vld [vmem:[%s11647_s12 + $0x54] ss:$8 sps:$4 sm:$0xff]  }
 0xbbe   : > { %6045 = vmatprep.subr.bf16.mxu0 %v9218_v23 }
 0xbbf   : > { %8061 = vmatprep.subr.msk.bf16.mxu1 %vm5528_vm7, %v11071_v53  ;;  %v11080_v60 = vsel %vm5528_vm7, %v8058_v55, 0 }
 0xbc0   : > { %5553 = vmatpush1.bf16.msra.mxu1 %v11080_v60  ;;  %8486 = vmatmul.mubr.msk.bf16.vlgmr.msra.gmra.mxu0 %vm5524_vm14, %v8064_v63 }
 0xbc1   : > { %8477 = vmatprep.subr.bf16.mxu1 %v9635_v10  ;;  %6046 = vmatpush1.bf16.msra.mxu0 %v9216_v43 }
 0xbc2   : > { %6047 = vmatprep.subr.bf16.mxu0 %v9224_v54  ;;  %6069 = vmatprep.mubr.bf16.mxu0 %v10421_v56 }
 0xbc3   : > { %8062 = vmatmul.mubr.msk.bf16.vlgmr.msra.gmra.mxu1 %vm5524_vm14, %v5510_v15 }
 0xbc4   : > { %8478 = vmatpush3.bf16.msra.mxu1 %v11074_v50  ;;  %8479 = vmatprep.mubr.msk.bf16.mxu1 %vm11691_vm9, %v9635_v10 }
 0xbc5   : > { %8065 = vmatprep.subr.msk.bf16.mxu1 %vm5528_vm7, %v11071_v53  ;;  %6048 = vmatpush1.bf16.msra.mxu0 %v9222_v17  ;;  %v9258_v17 = vld [vmem:[%s11647_s12 + $0x40] ss:$8 sps:$4 sm:$0xff]  }
 0xbc6   : > { %6049 = vmatprep.subr.bf16.mxu0 %v9230_v20 }
 0xbc9   : > { %6050 = vmatpush1.bf16.msra.mxu0 %v9228_v44  ;;  %v9266_v44 = vld [vmem:[%s11647_s12 + $0x34] ss:$8 sps:$4 sm:$0xff]  }
 0xbca   : > { %6051 = vmatprep.subr.bf16.mxu0 %v9236_v49  ;;  %v9264_v49 = vld [vmem:[%s11647_s12 + $0x30] ss:$8 sps:$4 sm:$0xff]  }
 0xbcb   : > { %8480 = vmatmul.mubr.msk.bf16.vlgmr.msra.gmra.mxu1 %vm5524_vm14, %v5510_v15  ;;  %v9260_v15 = vld [vmem:[%s11647_s12 + $0x44] ss:$8 sps:$4 sm:$0xff]  }
 0xbcc   : > { %5682 = vmatpush1.bf16.msra.mxu1 %v11080_v60  ;;  %5699 = vmatprep.mubr.bf16.mxu1 %v10421_v56 }
 0xbcd   : > { %5996 = vmatprep.subr.bf16.mxu1 %v9194_v45  ;;  %6052 = vmatpush1.bf16.msra.mxu0 %v9234_v59 }
 0xbce   : > { %6281 = vmatprep.subr.bf16.mxu0 %v9242_v31 }
 0xbd3   : > { %8066 = vmatmul.mubr.msk.bf16.vlgmr.msra.gmra.mxu1 %vm5524_vm14, %v8064_v63  ;;  %v9252_v63 = vld [vmem:[%s11647_s12 + $0x50] ss:$8 sps:$4 sm:$0xff]  }
 0xbd4   : > { %5997 = vmatpush1.bf16.msra.mxu1 %v9192_v14  ;;  %v9269_v14 = vld [vmem:[%s11647_s12 + $0x24] ss:$8 sps:$4 sm:$0xff]  }
 0xbd5   : > { %5998 = vmatprep.subr.bf16.mxu1 %v9197_v58 }
 0xbd8   : > { %5999 = vmatpush1.bf16.msra.mxu1 %v9195_v3 }
 0xbd9   : > { %6000 = vmatprep.subr.bf16.mxu1 %v9200_v61 }
 0xbdc   : > { %6001 = vmatpush1.bf16.msra.mxu1 %v9198_v0  ;;  %v9267_v0 = vld [vmem:[%s11647_s12 + $0x20] ss:$8 sps:$4 sm:$0xff]  }
 0xbdd   : > { %6002 = vmatprep.subr.bf16.mxu1 %v9203_v24  ;;  %v9270_v24 = vld [vmem:[%s11647_s12 + $0x130] ss:$8 sps:$4 sm:$0xff]  }
 0xbe0   : > { %6003 = vmatpush1.bf16.msra.mxu1 %v9201_v25  ;;  %v9275_v25 = vld [vmem:[%s11647_s12 + $0x14] ss:$8 sps:$4 sm:$0xff]  }
 0xbe1   : > { %6004 = vmatprep.subr.bf16.mxu1 %v9206_v26  ;;  %v9278_v26 = vld [vmem:[%s11647_s12 + $0x124] ss:$8 sps:$4 sm:$0xff]  }
 0xbe4   : > { %6005 = vmatpush1.bf16.msra.mxu1 %v9204_v27 }
 0xbe5   : > { %6006 = vmatprep.subr.bf16.mxu1 %v9209_v62 }
 0xbe8   : > { %6007 = vmatpush1.bf16.msra.mxu1 %v9207_v1  ;;  %v9273_v1 = vld [vmem:[%s11647_s12 + $0x10] ss:$8 sps:$4 sm:$0xff]  }
 0xbe9   : > { %6008 = vmatprep.subr.bf16.mxu1 %v9212_v2  ;;  %v9276_v2 = vld [vmem:[%s11647_s12 + $0x120] ss:$8 sps:$4 sm:$0xff]  }
 0xbec   : > { %6009 = vmatpush1.bf16.msra.mxu1 %v9210_v7  ;;  %v9281_v7 = vld [vmem:[%s11647_s12 + $0x4] ss:$8 sps:$4 sm:$0xff]  }
 0xbed   : > { %6010 = vmatprep.subr.bf16.mxu1 %v9215_v8  ;;  %v9284_v8 = vld [vmem:[%s11647_s12 + $0x114] ss:$8 sps:$4 sm:$0xff]  }
 0xbf0   : > { %6011 = vmatpush1.bf16.msra.mxu1 %v9213_v42  ;;  %v9279_v42 = vld [vmem:[%s11647_s12] ss:$8 sps:$4 sm:$0xff]  }
 0xbf1   : > { %6012 = vmatprep.subr.bf16.mxu1 %v9221_v46  ;;  %v9282_v46 = vld [vmem:[%s11647_s12 + $0x110] ss:$8 sps:$4 sm:$0xff]  }
 0xbf4   : > { %6013 = vmatpush2.bf16.msra.mxu1 %v9219_v11  ;;  %v9287_v11 = vld [vmem:[%s11647_s12 + $0xf4] ss:$8 sps:$4 sm:$0xff]  }
 0xbf5   : > { %6014 = vmatprep.subr.bf16.mxu1 %v9227_v28  ;;  %v9290_v28 = vld [vmem:[%s11647_s12 + $0x104] ss:$8 sps:$4 sm:$0xff]  }
 0xbf8   : > { %6015 = vmatpush2.bf16.msra.mxu1 %v9225_v30  ;;  %v9285_v30 = vld [vmem:[%s11647_s12 + $0xf0] ss:$8 sps:$4 sm:$0xff]  }
 0xbf9   : > { %6016 = vmatprep.subr.bf16.mxu1 %v9233_v12  ;;  %v9288_v12 = vld [vmem:[%s11647_s12 + $0x100] ss:$8 sps:$4 sm:$0xff]  }
 0xbfc   : > { %6017 = vmatpush2.bf16.msra.mxu1 %v9231_v5  ;;  %v9293_v5 = vld [vmem:[%s11647_s12 + $0xe4] ss:$8 sps:$4 sm:$0xff]  }
 0xbfd   : > { %6018 = vmatprep.subr.bf16.mxu1 %v9239_v32  ;;  %v9291_v32 = vld [vmem:[%s11647_s12 + $0xe0] ss:$8 sps:$4 sm:$0xff]  }
 0xc00   : > { %6019 = vmatpush2.bf16.msra.mxu1 %v9237_v41  ;;  %v9296_v41 = vld [vmem:[%s11647_s12 + $0xd4] ss:$8 sps:$4 sm:$0xff]  }
 0xc01   : > { %6020 = vmatprep.subr.bf16.mxu1 %v9245_v48  ;;  %v9299_v48 = vld [vmem:[%s11647_s12 + $0xc4] ss:$8 sps:$4 sm:$0xff]  }
 0xc04   : > { %6021 = vmatpush2.bf16.msra.mxu1 %v9243_v33  ;;  %v9294_v33 = vld [vmem:[%s11647_s12 + $0xd0] ss:$8 sps:$4 sm:$0xff]  }
 0xc05   : > { %6022 = vmatprep.subr.bf16.mxu1 %v9251_v9  ;;  %v8190_v9 = vld [vmem:[%s11646_s11 + $0x4] sm:$0x3] }
 0xc08   : > { %6023 = vmatpush2.bf16.msra.mxu1 %v9249_v16  ;;  %v9297_v16 = vld [vmem:[%s11647_s12 + $0xc0] ss:$8 sps:$4 sm:$0xff]  }
 0xc09   : > { %6024 = vmatprep.subr.bf16.mxu1 %v9257_v19  ;;  %v9300_v19 = vld [vmem:[%s11647_s12 + $0xb0] ss:$8 sps:$4 sm:$0xff]  }
 0xc0c   : > { %6025 = vmatpush2.bf16.msra.mxu1 %v9255_v18  ;;  %v9302_v18 = vld [vmem:[%s11647_s12 + $0xb4] ss:$8 sps:$4 sm:$0xff]  }
 0xc0d   : > { %6026 = vmatprep.subr.bf16.mxu1 %v9263_v35  ;;  %v9303_v35 = vld [vmem:[%s11647_s12 + $0xa0] ss:$8 sps:$4 sm:$0xff]  }
 0xc10   : > { %6027 = vmatpush2.bf16.msra.mxu1 %v9261_v34  ;;  %v9305_v34 = vld [vmem:[%s11647_s12 + $0xa4] ss:$8 sps:$4 sm:$0xff]  }
 0xc11   : > { %6330 = vmatprep.subr.bf16.mxu1 %v9272_v13  ;;  %v9308_v13 = vld [vmem:[%s11647_s12 + $0x94] ss:$8 sps:$4 sm:$0xff]  }
 0xc80   : > { %v5742_v4 = vpop.f32.mrf.mxu0 }
 0xc81   : > { %v5750_v22 = vpack.c.bf16 %v5742_v4, %v5742_v4  ;;  %v9306_v4 = vld [vmem:[%s11647_s12 + $0x90] ss:$8 sps:$4 sm:$0xff]  }
 0xc82   : > { %v8487_v47 = vpop.f32.mrf.mxu0 }
 0xc83   : > { %v11228_v36 = vpop.f32.mrf.mxu1  ;;  %8148 = vmatmul.mubr.msk.bf16.vlgmr.msra.gmra.mxu0 %vm5992_vm8, %v5750_v22  ;;  %v9309_v22 = vld [vmem:[%s11647_s12 + $0x80] ss:$8 sps:$4 sm:$0xff]   ;;  %v9314_v47 = vld [vmem:[%s11647_s12 + $0x3b4] ss:$8 sps:$4 sm:$0xff]  }
 0xc84   : > { %6282 = vmatpush1.bf16.msra.mxu0 %v9240_v21  ;;  %v5745_v40 = vpop.f32.mrf.mxu0  ;;  %v9311_v21 = vld [vmem:[%s11647_s12 + $0x84] ss:$8 sps:$4 sm:$0xff]  }
 0xc85   : > { %v5574_v29 = vpop.f32.mrf.mxu1  ;;  %6283 = vmatprep.subr.bf16.mxu0 %v9248_v37  ;;  %v5619_v37 = vpack.c.bf16 %v11228_v36, %v11228_v36  ;;  %v9317_v36 = vld [vmem:[%s11647_s12 + $0x3a4] ss:$8 sps:$4 sm:$0xff]   ;;  %v9326_v40 = vld [vmem:[%s11647_s12 + $0x2f4] ss:$8 sps:$4 sm:$0xff]  }
 0xc86   : > { %v5620_v39 = vpack.c.bf16 %v5574_v29, %v5574_v29  ;;  %v8488_v52 = vpop.f32.mrf.mxu0  ;;  %v9312_v29 = vld [vmem:[%s11647_s12 + $0x3b0] ss:$8 sps:$4 sm:$0xff]  }
 0xc87   : > { %v5576_v23 = vpop.f32.mrf.mxu1  ;;  %v9320_v52 = vld [vmem:[%s11647_s12 + $0x394] ss:$8 sps:$4 sm:$0xff]  }
 0xc88   : > { %6313 = vmatprep.mubr.bf16.mxu0 %v5620_v39  ;;  %6284 = vmatpush1.bf16.msra.mxu0 %v9246_v51  ;;  %v9324_v39 = vld [vmem:[%s11647_s12 + $0x2f0] ss:$8 sps:$4 sm:$0xff]   ;;  %v9329_v51 = vld [vmem:[%s11647_s12 + $0x2e4] ss:$8 sps:$4 sm:$0xff]   ;;  %v9315_v23 = vld [vmem:[%s11647_s12 + $0x3a0] ss:$8 sps:$4 sm:$0xff]  }
 0xc89   : > { %v5577_v55 = vpop.f32.mrf.mxu1  ;;  %6285 = vmatprep.subr.bf16.mxu0 %v9254_v38  ;;  %v9327_v38 = vld [vmem:[%s11647_s12 + $0x2e0] ss:$8 sps:$4 sm:$0xff]  }
 0xc8a   : > { %v9332_v55 = vld [vmem:[%s11647_s12 + $0x2d4] ss:$8 sps:$4 sm:$0xff]  }
 0xc8b   : > { %v5613_v43 = vpop.f32.mrf.mxu1 }
 0xc8c   : > { %6286 = vmatpush1.bf16.msra.mxu0 %v9252_v63  ;;  %v5621_v31 = vpack.c.bf16 %v5613_v43, %v5613_v43  ;;  %v9318_v63 = vld [vmem:[%s11647_s12 + $0x390] ss:$8 sps:$4 sm:$0xff]  }
 0xc8d   : > { %v8481_v54 = vpop.f32.mrf.mxu1  ;;  %6287 = vmatprep.subr.bf16.mxu0 %v9260_v15  ;;  %v9330_v43 = vld [vmem:[%s11647_s12 + $0x2d0] ss:$8 sps:$4 sm:$0xff]   ;;  %v9323_v15 = vld [vmem:[%s11647_s12 + $0x384] ss:$8 sps:$4 sm:$0xff]  }
 0xc8e   : > { %v9321_v54 = vld [vmem:[%s11647_s12 + $0x380] ss:$8 sps:$4 sm:$0xff]  }
 0xc8f   : > { %v5616_v20 = vpop.f32.mrf.mxu1 }
 0xc90   : > { %6288 = vmatpush1.bf16.msra.mxu0 %v9258_v17  ;;  %v9335_v17 = vld [vmem:[%s11647_s12 + $0x2c4] ss:$8 sps:$4 sm:$0xff]   ;;  %v9333_v20 = vld [vmem:[%s11647_s12 + $0x2c0] ss:$8 sps:$4 sm:$0xff]  }
 0xc91   : > { %v8482_v45 = vpop.f32.mrf.mxu1  ;;  %6289 = vmatprep.subr.bf16.mxu0 %v9266_v44  ;;  %v9338_v44 = vld [vmem:[%s11647_s12 + $0x2b4] ss:$8 sps:$4 sm:$0xff]  }
 0xc92   : > { %v9336_v45 = vld [vmem:[%s11647_s12 + $0x2b0] ss:$8 sps:$4 sm:$0xff]  }
 0xc93   : > { %v5701_v59 = vpop.f32.mrf.mxu1 }
 0xc94   : > { %v5748_v58 = vpack.c.bf16 %v5701_v59, %v5701_v59  ;;  %6290 = vmatpush1.bf16.msra.mxu0 %v9264_v49  ;;  %v9339_v49 = vld [vmem:[%s11647_s12 + $0x2a0] ss:$8 sps:$4 sm:$0xff]   ;;  %v9344_v59 = vld [vmem:[%s11647_s12 + $0x294] ss:$8 sps:$4 sm:$0xff]  }
 0xc95   : > { %v5703_v3 = vpop.f32.mrf.mxu1  ;;  %6291 = vmatprep.subr.bf16.mxu0 %v9269_v14  ;;  %v9342_v14 = vld [vmem:[%s11647_s12 + $0x290] ss:$8 sps:$4 sm:$0xff]  }
 0xc96   : > { %v5749_v61 = vpack.c.bf16 %v5703_v3, %v5703_v3  ;;  %v9345_v3 = vld [vmem:[%s11647_s12 + $0x280] ss:$8 sps:$4 sm:$0xff]  }
 0xc97   : > { %v5705_v27 = vpop.f32.mrf.mxu1 }
 0xc98   : > { %6028 = vmatprep.mubr.bf16.mxu1 %v5749_v61  ;;  %6292 = vmatpush1.bf16.msra.mxu0 %v9267_v0  ;;  %v9350_v61 = vld [vmem:[%s11647_s12 + $0x374] ss:$8 sps:$4 sm:$0xff]   ;;  %v9348_v0 = vld [vmem:[%s11647_s12 + $0x370] ss:$8 sps:$4 sm:$0xff]  }
 0xc99   : > { %6029 = vmatmul.mubr.bf16.vlgmr.msra.gmra.mxu1 %v5748_v58  ;;  %v5706_v62 = vpop.f32.mrf.mxu1  ;;  %6293 = vmatprep.subr.bf16.mxu0 %v9275_v25  ;;  %v9347_v58 = vld [vmem:[%s11647_s12 + $0x284] ss:$8 sps:$4 sm:$0xff]   ;;  %v9351_v25 = vld [vmem:[%s11647_s12 + $0x360] ss:$8 sps:$4 sm:$0xff]   ;;  %v9354_v27 = vld [vmem:[%s11647_s12 + $0x350] ss:$8 sps:$4 sm:$0xff]  }
 0xc9a   : > { %6331 = vmatpush1.bf16.msra.mxu1 %v9270_v24  ;;  %6354 = vmatprep.mubr.bf16.mxu1 %v10421_v56  ;;  %v9353_v24 = vld [vmem:[%s11647_s12 + $0x364] ss:$8 sps:$4 sm:$0xff]  }
 0xc9b   : > { %6332 = vmatprep.subr.bf16.mxu1 %v9278_v26  ;;  %v9356_v26 = vld [vmem:[%s11647_s12 + $0x354] ss:$8 sps:$4 sm:$0xff]   ;;  %v9359_v62 = vld [vmem:[%s11647_s12 + $0x344] ss:$8 sps:$4 sm:$0xff]  }
 0xc9c   : > { %6294 = vmatpush1.bf16.msra.mxu0 %v9273_v1  ;;  %v9357_v1 = vld [vmem:[%s11647_s12 + $0x340] ss:$8 sps:$4 sm:$0xff]  }
 0xc9d   : > { %6295 = vmatprep.subr.bf16.mxu0 %v9281_v7  ;;  %v9360_v7 = vld [vmem:[%s11647_s12 + $0x330] ss:$8 sps:$4 sm:$0xff]  }
 0xc9e   : > { %6333 = vmatpush1.bf16.msra.mxu1 %v9276_v2  ;;  %v9362_v2 = vld [vmem:[%s11647_s12 + $0x334] ss:$8 sps:$4 sm:$0xff]  }
 0xc9f   : > { %6334 = vmatprep.subr.bf16.mxu1 %v9284_v8  ;;  %v9365_v8 = vld [vmem:[%s11647_s12 + $0x324] ss:$8 sps:$4 sm:$0xff]  }
 0xca0   : > { %6296 = vmatpush1.bf16.msra.mxu0 %v9279_v42  ;;  %v9363_v42 = vld [vmem:[%s11647_s12 + $0x320] ss:$8 sps:$4 sm:$0xff]  }
 0xca1   : > { %6297 = vmatprep.subr.bf16.mxu0 %v9287_v11  ;;  %v9366_v11 = vld [vmem:[%s11647_s12 + $0x310] ss:$8 sps:$4 sm:$0xff]  }
 0xca2   : > { %6335 = vmatpush1.bf16.msra.mxu1 %v9282_v46  ;;  %v9368_v46 = vld [vmem:[%s11647_s12 + $0x314] ss:$8 sps:$4 sm:$0xff]  }
 0xca3   : > { %6336 = vmatprep.subr.bf16.mxu1 %v9290_v28  ;;  %v9369_v28 = vld [vmem:[%s11647_s12 + $0x300] ss:$8 sps:$4 sm:$0xff]  }
 0xca4   : > { %6298 = vmatpush2.bf16.msra.mxu0 %v9285_v30  ;;  %v9371_v30 = vld [vmem:[%s11647_s12 + $0x304] ss:$8 sps:$4 sm:$0xff]  }
 0xca5   : > { %6299 = vmatprep.subr.bf16.mxu0 %v9293_v5 }
 0xca6   : > { %6337 = vmatpush1.bf16.msra.mxu1 %v9288_v12 }
 0xca7   : > { %8191 = vmatprep.subr.msk.bf16.mxu1 %vm5528_vm7, %v11071_v53 }
 0xca8   : > { %6300 = vmatpush2.bf16.msra.mxu0 %v9291_v32 }
 0xca9   : > { %8189 = vmatmul.mubr.msk.bf16.vlgmr.msra.gmra.mxu1 %vm5992_vm8, %v5621_v31  ;;  %6301 = vmatprep.subr.bf16.mxu0 %v9296_v41 }
 0xcaa   : > { %6383 = vmatpush1.bf16.msra.mxu1 %v11080_v60  ;;  %6400 = vmatprep.mubr.bf16.mxu1 %v10421_v56 }
 0xcab   : > { %6696 = vmatprep.subr.bf16.mxu1 %v9326_v40 }
 0xcac   : > { %6302 = vmatpush2.bf16.msra.mxu0 %v9294_v33 }
 0xcad   : > { %6303 = vmatprep.subr.bf16.mxu0 %v9299_v48 }
 0xcb0   : > { %6304 = vmatpush2.bf16.msra.mxu0 %v9297_v16 }
 0xcb1   : > { %8192 = vmatmul.mubr.msk.bf16.vlgmr.msra.gmra.mxu1 %vm5524_vm14, %v8190_v9  ;;  %6305 = vmatprep.subr.bf16.mxu0 %v9302_v18 }
 0xcb2   : > { %6697 = vmatpush1.bf16.msra.mxu1 %v9324_v39 }
 0xcb3   : > { %6698 = vmatprep.subr.bf16.mxu1 %v9329_v51 }
 0xcb4   : > { %6306 = vmatpush2.bf16.msra.mxu0 %v9300_v19 }
 0xcb5   : > { %6307 = vmatprep.subr.bf16.mxu0 %v9305_v34 }
 0xcb6   : > { %6699 = vmatpush1.bf16.msra.mxu1 %v9327_v38 }
 0xcb7   : > { %6700 = vmatprep.subr.bf16.mxu1 %v9332_v55 }
 0xcb8   : > { %6308 = vmatpush2.bf16.msra.mxu0 %v9303_v35 }
 0xcb9   : > { %6309 = vmatprep.subr.bf16.mxu0 %v9308_v13 }
 0xcba   : > { %6701 = vmatpush1.bf16.msra.mxu1 %v9330_v43 }
 0xcbb   : > { %6702 = vmatprep.subr.bf16.mxu1 %v9335_v17 }
 0xcbc   : > { %6310 = vmatpush2.bf16.msra.mxu0 %v9306_v4 }
 0xcbd   : > { %6311 = vmatprep.subr.bf16.mxu0 %v9311_v21 }
 0xcbe   : > { %6703 = vmatpush1.bf16.msra.mxu1 %v9333_v20  ;;  %v8275_v20 = vld [vmem:[%s11646_s11 + $0x6] sm:$0x3] }
 0xcbf   : > { %6704 = vmatprep.subr.bf16.mxu1 %v9338_v44  ;;  %v9374_v44 = vld [vmem:[%s11647_s12 + $0x434] ss:$8 sps:$4 sm:$0xff]  }
 0xcc0   : > { %6312 = vmatpush2.bf16.msra.mxu0 %v9309_v22 }
 0xcc1   : > { %8489 = vmatprep.subr.bf16.mxu0 %v9635_v10 }
 0xcc2   : > { %6705 = vmatpush1.bf16.msra.mxu1 %v9336_v45  ;;  %v9375_v45 = vld [vmem:[%s11647_s12 + $0x420] ss:$8 sps:$4 sm:$0xff]  }
 0xcc3   : > { %6314 = vmatmul.mubr.bf16.vlgmr.msra.gmra.mxu0 %v5619_v37 }
 0xcc4   : > { %8490 = vmatpush3.bf16.msra.mxu0 %v11074_v50  ;;  %8491 = vmatprep.mubr.msk.bf16.mxu0 %vm11691_vm9, %v9635_v10 }
 0xcc5   : > { %6745 = vmatprep.subr.bf16.mxu0 %v9314_v47 }
 0xccb   : > { %8492 = vmatmul.mubr.msk.bf16.vlgmr.msra.gmra.mxu0 %vm5524_vm14, %v8190_v9 }
 0xccc   : > { %6746 = vmatpush1.bf16.msra.mxu0 %v9312_v29  ;;  %6769 = vmatprep.mubr.bf16.mxu0 %v10421_v56 }
 0xccd   : > { %6747 = vmatprep.subr.bf16.mxu0 %v9317_v36 }
 0xcd0   : > { %6748 = vmatpush1.bf16.msra.mxu0 %v9315_v23 }
 0xcd1   : > { %6749 = vmatprep.subr.bf16.mxu0 %v9320_v52 }
 0xcd4   : > { %6750 = vmatpush1.bf16.msra.mxu0 %v9318_v63 }
 0xcd5   : > { %6751 = vmatprep.subr.bf16.mxu0 %v9323_v15 }
 0xcd8   : > { %6752 = vmatpush1.bf16.msra.mxu0 %v9321_v54 }
 0xcd9   : > { %8276 = vmatprep.subr.msk.bf16.mxu0 %vm5528_vm7, %v11071_v53  ;;  %v9341_v53 = vld [vmem:[%s11647_s12 + $0x2a4] ss:$8 sps:$4 sm:$0xff]  }
 0xcda   : > { %6706 = vmatprep.subr.bf16.mxu1 %v9341_v53  ;;  %v9383_v53 = vld [vmem:[%s11647_s12 + $0x404] ss:$8 sps:$4 sm:$0xff]  }
 0xcdb   : > { %6707 = vmatpush1.bf16.msra.mxu1 %v9339_v49  ;;  %v9381_v49 = vld [vmem:[%s11647_s12 + $0x400] ss:$8 sps:$4 sm:$0xff]  }
 0xcdc   : > { %6708 = vmatprep.subr.bf16.mxu1 %v9344_v59  ;;  %v9386_v59 = vld [vmem:[%s11647_s12 + $0x3f4] ss:$8 sps:$4 sm:$0xff]  }
 0xcdf   : > { %6709 = vmatpush1.bf16.msra.mxu1 %v9342_v14  ;;  %v9384_v14 = vld [vmem:[%s11647_s12 + $0x3f0] ss:$8 sps:$4 sm:$0xff]  }
 0xce0   : > { %6710 = vmatprep.subr.bf16.mxu1 %v9347_v58  ;;  %v9389_v58 = vld [vmem:[%s11647_s12 + $0x3e4] ss:$8 sps:$4 sm:$0xff]  }
 0xce3   : > { %6711 = vmatpush1.bf16.msra.mxu1 %v9345_v3  ;;  %v9387_v3 = vld [vmem:[%s11647_s12 + $0x3e0] ss:$8 sps:$4 sm:$0xff]  }
 0xce4   : > { %6712 = vmatprep.subr.bf16.mxu1 %v9350_v61  ;;  %v9392_v61 = vld [vmem:[%s11647_s12 + $0x3d4] ss:$8 sps:$4 sm:$0xff]  }
 0xce7   : > { %6713 = vmatpush2.bf16.msra.mxu1 %v9348_v0  ;;  %v9390_v0 = vld [vmem:[%s11647_s12 + $0x3d0] ss:$8 sps:$4 sm:$0xff]  }
 0xce8   : > { %6714 = vmatprep.subr.bf16.mxu1 %v9353_v24  ;;  %v9395_v24 = vld [vmem:[%s11647_s12 + $0x3c4] ss:$8 sps:$4 sm:$0xff]  }
 0xceb   : > { %6715 = vmatpush2.bf16.msra.mxu1 %v9351_v25  ;;  %v9393_v25 = vld [vmem:[%s11647_s12 + $0x3c0] ss:$8 sps:$4 sm:$0xff]  }
 0xcec   : > { %6716 = vmatprep.subr.bf16.mxu1 %v9356_v26  ;;  %v9398_v26 = vld [vmem:[%s11647_s12 + $0x4b4] ss:$8 sps:$4 sm:$0xff]  }
 0xcef   : > { %6717 = vmatpush2.bf16.msra.mxu1 %v9354_v27  ;;  %v9396_v27 = vld [vmem:[%s11647_s12 + $0x4b0] ss:$8 sps:$4 sm:$0xff]  }
 0xcf0   : > { %6718 = vmatprep.subr.bf16.mxu1 %v9359_v62  ;;  %v9401_v62 = vld [vmem:[%s11647_s12 + $0x4a4] ss:$8 sps:$4 sm:$0xff]  }
 0xcf3   : > { %6719 = vmatpush2.bf16.msra.mxu1 %v9357_v1  ;;  %v9399_v1 = vld [vmem:[%s11647_s12 + $0x4a0] ss:$8 sps:$4 sm:$0xff]  }
 0xcf4   : > { %6720 = vmatprep.subr.bf16.mxu1 %v9362_v2  ;;  %v9404_v2 = vld [vmem:[%s11647_s12 + $0x494] ss:$8 sps:$4 sm:$0xff]  }
 0xcf7   : > { %6721 = vmatpush2.bf16.msra.mxu1 %v9360_v7  ;;  %v9402_v7 = vld [vmem:[%s11647_s12 + $0x490] ss:$8 sps:$4 sm:$0xff]  }
 0xcf8   : > { %6722 = vmatprep.subr.bf16.mxu1 %v9365_v8  ;;  %v9407_v8 = vld [vmem:[%s11647_s12 + $0x484] ss:$8 sps:$4 sm:$0xff]  }
 0xcfb   : > { %6723 = vmatpush2.bf16.msra.mxu1 %v9363_v42  ;;  %v9405_v42 = vld [vmem:[%s11647_s12 + $0x480] ss:$8 sps:$4 sm:$0xff]  }
 0xcfc   : > { %6724 = vmatprep.subr.bf16.mxu1 %v9368_v46  ;;  %v9410_v46 = vld [vmem:[%s11647_s12 + $0x474] ss:$8 sps:$4 sm:$0xff]  }
 0xcff   : > { %6725 = vmatpush2.bf16.msra.mxu1 %v9366_v11  ;;  %v9408_v11 = vld [vmem:[%s11647_s12 + $0x470] ss:$8 sps:$4 sm:$0xff]  }
 0xd00   : > { %6726 = vmatprep.subr.bf16.mxu1 %v9371_v30  ;;  %v9411_v30 = vld [vmem:[%s11647_s12 + $0x460] ss:$8 sps:$4 sm:$0xff]  }
 0xd03   : > { %6727 = vmatpush2.bf16.msra.mxu1 %v9369_v28  ;;  %v9413_v28 = vld [vmem:[%s11647_s12 + $0x464] ss:$8 sps:$4 sm:$0xff]  }
 0xd43   : > { %v6071_v12 = vpop.f32.mrf.mxu0 }
 0xd45   : > { %v6073_v5 = vpop.f32.mrf.mxu0 }
 0xd47   : > { %v6075_v31 = vpop.f32.mrf.mxu0 }
 0xd48   : > { %v9419_v31 = vld [vmem:[%s11647_s12 + $0x454] ss:$8 sps:$4 sm:$0xff]  }
 0xd49   : > { %v6076_v32 = vpop.f32.mrf.mxu0 }
 0xd4a   : > { %v9417_v32 = vld [vmem:[%s11647_s12 + $0x450] ss:$8 sps:$4 sm:$0xff]  }
 0xd59   : > { %v6030_v41 = vpop.f32.mrf.mxu1 }
 0xd5a   : > { %v6072_v33 = vadd.f32 %v6071_v12, %v6030_v41  ;;  %v9416_v12 = vld [vmem:[%s11647_s12 + $0x4f4] ss:$8 sps:$4 sm:$0xff]   ;;  %v9420_v41 = vld [vmem:[%s11647_s12 + $0x4e0] ss:$8 sps:$4 sm:$0xff]  }
 0xd5b   : > { %v6032_v48 = vpop.f32.mrf.mxu1  ;;  %7162 = vmatprep.subr.bf16.mxu1 %v9416_v12 }
 0xd5c   : > { %v6074_v16 = vadd.f32 %v6073_v5, %v6032_v48  ;;  %v9414_v5 = vld [vmem:[%s11647_s12 + $0x4f0] ss:$8 sps:$4 sm:$0xff]   ;;  %v9425_v48 = vld [vmem:[%s11647_s12 + $0x444] ss:$8 sps:$4 sm:$0xff]  }
 0xd5d   : > { %v6034_v9 = vpop.f32.mrf.mxu1 }
 0xd5e   : > { %v9428_v9 = vld [vmem:[%s11647_s12 + $0x4d4] ss:$8 sps:$4 sm:$0xff]  }
 0xd5f   : > { %v6035_v18 = vpop.f32.mrf.mxu1 }
 0xd60   : > { %v9426_v18 = vld [vmem:[%s11647_s12 + $0x4d0] ss:$8 sps:$4 sm:$0xff]  }
 0xd69   : > { %v6356_v19 = vpop.f32.mrf.mxu1 }
 0xd6b   : > { %v6358_v34 = vpop.f32.mrf.mxu1 }
 0xd6d   : > { %v6360_v35 = vpop.f32.mrf.mxu1 }
 0xd6f   : > { %v6361_v13 = vpop.f32.mrf.mxu1 }
 0xd71   : > { %v6402_v4 = vpop.f32.mrf.mxu1 }
 0xd72   : > { %v6449_v21 = vpack.c.bf16 %v6402_v4, %v6402_v4 }
 0xd73   : > { %v6404_v22 = vpop.f32.mrf.mxu1 }
 0xd74   : > { %v6450_v37 = vpack.c.bf16 %v6404_v22, %v6404_v22 }
 0xd75   : > { %v6406_v47 = vpop.f32.mrf.mxu1 }
 0xd76   : > { %6728 = vmatprep.mubr.bf16.mxu1 %v6450_v37 }
 0xd77   : > { %6729 = vmatmul.mubr.bf16.vlgmr.msra.gmra.mxu1 %v6449_v21  ;;  %v6407_v29 = vpop.f32.mrf.mxu1 }
 0xd78   : > { %7186 = vmatprep.mubr.bf16.mxu1 %v10421_v56  ;;  %7163 = vmatpush1.bf16.msra.mxu1 %v9414_v5 }
 0xd83   : > { %v6315_v36 = vpop.f32.mrf.mxu0 }
 0xd84   : > { %v6316_v39 = vadd.f32 %v6315_v36, %v6072_v33  ;;  %v9422_v33 = vld [vmem:[%s11647_s12 + $0x4e4] ss:$8 sps:$4 sm:$0xff]  }
 0xd85   : > { %v6317_v40 = vpop.f32.mrf.mxu0  ;;  %7164 = vmatprep.subr.bf16.mxu1 %v9422_v33 }
 0xd86   : > { %v11483_v51 = vadd.f32 %v6356_v19, %v6316_v39  ;;  %v6318_v23 = vadd.f32 %v6317_v40, %v6074_v16  ;;  %7165 = vmatpush1.bf16.msra.mxu1 %v9420_v41  ;;  %v9423_v16 = vld [vmem:[%s11647_s12 + $0x440] ss:$8 sps:$4 sm:$0xff]  }
 0xd87   : > { %v6319_v38 = vpop.f32.mrf.mxu0  ;;  %7166 = vmatprep.subr.bf16.mxu1 %v9428_v9  ;;  %v9429_v19 = vld [vmem:[%s11647_s12 + $0x4c0] ss:$8 sps:$4 sm:$0xff]  }
 0xd88   : > { %v11485_v52 = vadd.f32 %v6358_v34, %v6318_v23  ;;  %v9431_v34 = vld [vmem:[%s11647_s12 + $0x4c4] ss:$8 sps:$4 sm:$0xff]  }
 0xd89   : > { %v6320_v55 = vpop.f32.mrf.mxu0 }
 0xd8a   : > { %7167 = vmatpush1.bf16.msra.mxu1 %v9426_v18 }
 0xd8b   : > { %v6443_v63 = vpop.f32.mrf.mxu0  ;;  %7168 = vmatprep.subr.bf16.mxu1 %v9431_v34 }
 0xd8c   : > { %v6451_v43 = vpack.c.bf16 %v6443_v63, %v6443_v63 }
 0xd8d   : > { %v8493_v15 = vpop.f32.mrf.mxu0 }
 0xd8e   : > { %8274 = vmatmul.mubr.msk.bf16.vlgmr.msra.gmra.mxu0 %vm5992_vm8, %v6451_v43  ;;  %7169 = vmatpush1.bf16.msra.mxu1 %v9429_v19 }
 0xd8f   : > { %6800 = vmatpush1.bf16.msra.mxu0 %v11080_v60  ;;  %v6446_v54 = vpop.f32.mrf.mxu0  ;;  %6817 = vmatprep.mubr.bf16.mxu0 %v10421_v56  ;;  %v9372_v56 = vld [vmem:[%s11647_s12 + $0x430] ss:$8 sps:$4 sm:$0xff]   ;;  %v9377_v60 = vld [vmem:[%s11647_s12 + $0x424] ss:$8 sps:$4 sm:$0xff]  }
 0xd90   : > { %8495 = vmatprep.subr.bf16.mxu0 %v9635_v10 }
 0xd91   : > { %v8494_v17 = vpop.f32.mrf.mxu0 }
 0xd96   : > { %8277 = vmatmul.mubr.msk.bf16.vlgmr.msra.gmra.mxu0 %vm5524_vm14, %v8275_v20 }
 0xd97   : > { %8496 = vmatpush3.bf16.msra.mxu0 %v11074_v50  ;;  %8497 = vmatprep.mubr.msk.bf16.mxu0 %vm11691_vm9, %v9635_v10  ;;  %v9380_v10 = vld [vmem:[%s11647_s12 + $0x414] ss:$8 sps:$4 sm:$0xff]   ;;  %v9378_v50 = vld [vmem:[%s11647_s12 + $0x410] ss:$8 sps:$4 sm:$0xff]   ;;  %vm7239_vm9 = vcmask 32768  }
 0xd98   : > { %7113 = vmatprep.subr.bf16.mxu0 %v9374_v44 }
 0xd9e   : > { %8498 = vmatmul.mubr.msk.bf16.vlgmr.msra.gmra.mxu0 %vm5524_vm14, %v8275_v20 }
 0xd9f   : > { %7114 = vmatpush1.bf16.msra.mxu0 %v9372_v56 }
 0xda0   : > { %7115 = vmatprep.subr.bf16.mxu0 %v9377_v60  ;;  %v7236_v60 = vld [vmem:[%s637_s18] sm:$0x1] }
 0xda3   : > { %7116 = vmatpush1.bf16.msra.mxu0 %v9375_v45 }
 0xda4   : > { %7117 = vmatprep.subr.bf16.mxu0 %v9380_v10 }
 0xda7   : > { %7118 = vmatpush1.bf16.msra.mxu0 %v9378_v50 }
 0xda8   : > { %7119 = vmatprep.subr.bf16.mxu0 %v9383_v53 }
 0xdab   : > { %7120 = vmatpush1.bf16.msra.mxu0 %v9381_v49  ;;  %v7197_v49 = vld [vmem:[#allocation11] sm:$0x3] }
 0xdac   : > { %7121 = vmatprep.subr.bf16.mxu0 %v9386_v59 }
 0xdaf   : > { %7122 = vmatpush1.bf16.msra.mxu0 %v9384_v14 }
 0xdb0   : > { %7123 = vmatprep.subr.bf16.mxu0 %v9389_v58 }
 0xdb3   : > { %7124 = vmatpush1.bf16.msra.mxu0 %v9387_v3  ;;  %v7202_v3 = vrot.slane %v7197_v49, %v10221_v57 }
 0xdb4   : > { %7125 = vmatprep.subr.bf16.mxu0 %v9392_v61 }
 0xdb7   : > { %7126 = vmatpush1.bf16.msra.mxu0 %v9390_v0 }
 0xdb8   : > { %7127 = vmatprep.subr.bf16.mxu0 %v9395_v24 }
 0xdbb   : > { %7128 = vmatpush1.bf16.msra.mxu0 %v9393_v25 }
 0xdbc   : > { %7129 = vmatprep.subr.bf16.mxu0 %v9398_v26  ;;  %v7206_v26 = vrot.slane %v7197_v49, %v10227_v6 }
 0xdbf   : > { %7130 = vmatpush2.bf16.msra.mxu0 %v9396_v27 }
 0xdc0   : > { %7131 = vmatprep.subr.bf16.mxu0 %v9401_v62 }
 0xdc3   : > { %7132 = vmatpush2.bf16.msra.mxu0 %v9399_v1 }
 0xdc4   : > { %7133 = vmatprep.subr.bf16.mxu0 %v9404_v2  ;;  %v7217_v2 = vld [vmem:[#allocation13] sm:$0xff] }
 0xdc7   : > { %7134 = vmatpush2.bf16.msra.mxu0 %v9402_v7 }
 0xdc8   : > { %7135 = vmatprep.subr.bf16.mxu0 %v9407_v8 }
 0xdcb   : > { %7136 = vmatpush2.bf16.msra.mxu0 %v9405_v42 }
 0xdcc   : > { %7137 = vmatprep.subr.bf16.mxu0 %v9410_v46  ;;  %v7219_v46 = vcombine.high %v7217_v2, %v7217_v2 }
 0xdcf   : > { %7138 = vmatpush2.bf16.msra.mxu0 %v9408_v11 }
 0xdd0   : > { %7139 = vmatprep.subr.bf16.mxu0 %v9413_v28 }
 0xdd3   : > { %7140 = vmatpush2.bf16.msra.mxu0 %v9411_v30 }
 0xdd4   : > { %7141 = vmatprep.subr.bf16.mxu0 %v9419_v31 }
 0xdd7   : > { %7142 = vmatpush2.bf16.msra.mxu0 %v9417_v32 }
 0xdd8   : > { %7143 = vmatprep.subr.bf16.mxu0 %v9425_v48 }
 0xddb   : > { %7144 = vmatpush2.bf16.msra.mxu0 %v9423_v16 }
 0xe37   : > { %v6730_v35 = vpop.f32.mrf.mxu1 }
 0xe39   : > { %v6732_v13 = vpop.f32.mrf.mxu1 }
 0xe3b   : > { %v6734_v4 = vpop.f32.mrf.mxu1 }
 0xe3d   : > { %v6735_v21 = vpop.f32.mrf.mxu1 }
 0xe4e   : > { %v6771_v22 = vpop.f32.mrf.mxu0 }
 0xe4f   : > { %v6772_v37 = vadd.f32 %v6771_v22, %v6730_v35  ;;  %v7244_v35 = vld [vmem:[#allocation5] sm:$0x1] }
 0xe50   : > { %v6773_v47 = vpop.f32.mrf.mxu0 }
 0xe51   : > { %v6778_v29 = vadd.f32 %v6772_v37, %v11483_v51  ;;  %v6774_v36 = vadd.f32 %v6773_v47, %v6732_v13 }
 0xe52   : > { %v6775_v39 = vpop.f32.mrf.mxu0 }
 0xe53   : > { %v6779_v40 = vadd.f32 %v6774_v36, %v11485_v52  ;;  %v7237_v52 = vld [vmem:[#allocation14] sm:$0x1] }
 0xe54   : > { %v6776_v23 = vpop.f32.mrf.mxu0  ;;  %v7238_v45 = vmul.f32 %v7237_v52, %v7236_v60 }
 0xe56   : > { %v6819_v38 = vpop.f32.mrf.mxu0  ;;  %v7240_v10 = vsel %vm7239_vm9, %v7238_v45, 0.0 }
 0xe57   : > { %v6866_v43 = vpack.c.bf16 %v6819_v38, %v6819_v38  ;;  %7241 = vadd.xlane.f32.xlu1 %v7240_v10 }
 0xe58   : > { %v6821_v55 = vpop.f32.mrf.mxu0 }
 0xe59   : > { %v6867_v63 = vpack.c.bf16 %v6821_v55, %v6821_v55 }
 0xe5a   : > { %v6823_v15 = vpop.f32.mrf.mxu0 }
 0xe5b   : > { %7145 = vmatprep.mubr.bf16.mxu0 %v6867_v63 }
 0xe5c   : > { %v6824_v54 = vpop.f32.mrf.mxu0  ;;  %7146 = vmatmul.mubr.bf16.vlgmr.msra.gmra.mxu0 %v6866_v43 }
 0xe5e   : > { %v6860_v17 = vpop.f32.mrf.mxu0 }
 0xe5f   : > { %v6868_v20 = vpack.c.bf16 %v6860_v17, %v6860_v17 }
 0xe60   : > { %v8499_v44 = vpop.f32.mrf.mxu0 }
 0xe61   : > { %8359 = vmatmul.mubr.msk.bf16.vlgmr.msra.gmra.mxu1 %vm5992_vm8, %v6868_v20 }
 0xe62   : > { %v6863_v51 = vpop.f32.mrf.mxu0 }
 0xe64   : > { %v8500_v56 = vpop.f32.mrf.mxu0 }
 0xee0   : > { %v7242_v19 = vpop.xlane.xlu1 %7241 }
 0xf1c   : > { %v7147_v50 = vpop.f32.mrf.mxu0 }
 0xf1e   : > { %v7149_v53 = vpop.f32.mrf.mxu0 }
 0xf20   : > { %v7151_v59 = vpop.f32.mrf.mxu0 }
 0xf21   : > { %v7188_v14 = vpop.f32.mrf.mxu1 }
 0xf22   : > { %v7189_v58 = vadd.f32 %v7188_v14, %v7147_v50  ;;  %v7152_v61 = vpop.f32.mrf.mxu0 }
 0xf23   : > { %v7190_v0 = vpop.f32.mrf.mxu1 }
 0xf24   : > { %v7195_v24 = vadd.f32 %v7189_v58, %v6778_v29  ;;  %v7191_v25 = vadd.f32 %v7190_v0, %v7149_v53 }
 0xf25   : > { %v7192_v27 = vpop.f32.mrf.mxu1 }
 0xf26   : > { %v7209_v62 = vadd.f32 %v7202_v3, %v7195_v24  ;;  %v7196_v1 = vadd.f32 %v7191_v25, %v6779_v40 }
 0xf27   : > { %v7193_v7 = vpop.f32.mrf.mxu1 }
 0xf28   : > { %v7213_v8 = vmul.f32 0.05, %v7209_v62  ;;  %v7210_v42 = vadd.f32 %v7206_v26, %v7196_v1  ;;  %vm7211_vm12 = vcmp.ge.f32.partialorder %v7209_v62, 0.0 }
 0xf2a   : > { %v7214_v11 = vmul.f32 0.05, %v7210_v42  ;;  %vm7212_vm4 = vcmp.ge.f32.partialorder %v7210_v42, 0.0  ;;  %v7215_v28 = vsel %vm7211_vm12, %v7209_v62, %v7213_v8 }
 0xf2b   : > { %v7221_v30 = vmul.f32 %v7217_v2, %v7215_v28 }
 0xf2c   : > { %v7216_v57 = vsel %vm7212_vm4, %v7210_v42, %v7214_v11 }
 0xf2d   : > { %v7222_v12 = vmul.f32 %v7219_v46, %v7216_v57  ;;  %v7224_v5 = vsel %vm7223_vm6, %v7221_v30, 0.0 }
 0xf2f   : > { %v7225_v31 = vsel %vm7223_vm6, %v7222_v12, 0.0 }
 0xf30   : > { %v7226_v6 = vadd.f32 %v7225_v31, %v7224_v5 }
 0xf32   : > { %7227 = vadd.xlane.f32.xlu0 %v7226_v6 }
 0xfbb   : > { %v7228_v32 = vpop.xlane.xlu0 %7227 }
 0xfbc   : > { %v7229_v41 = vsel %vm7223_vm6, %v7228_v32, 0.0 }
 0xfbd   : > { %v7230_v33 = vrot.slane %v7229_v41, 4 }
 0xfbf   : > { %v7231_v48 = vadd.f32 %v7230_v33, %v7229_v41 }
 0xfc1   : > { %v7232_v16 = vrot.slane %v7231_v48, 2 }
 0xfc3   : > { %v7233_v9 = vadd.f32 %v7232_v16, %v7231_v48 }
 0xfc5   : > { %v7234_v18 = vrot.slane %v7233_v9, 1 }
 0xfc7   : > { %v7235_v34 = vadd.f32 %v7234_v18, %v7233_v9 }
 0xfc9   : > { %v7243_v13 = vadd.f32 %v7242_v19, %v7235_v34 }
 0xfcb   : > { %v7245_v4 = vadd.f32 %v7244_v35, %v7243_v13 }
 0xfcd   : > { %7247 = vst.msk [vmem:[%s640_s21] sm:$0x1] %vm7246_vm1, %v7245_v4 }
 0xfce PF: > { %s33_s26 = sadd.s32 1, %s9621_s26  }
 0xfcf   : > { %p30_p11 = scmp.ge.s32.totalorder %s33_s26, 4  }
 0xfd1   :  { %32 = sbr.rel (!%p30_p11) target bundleno = 7 (0x7), region = 170 }
 0xfd6   :  { %7265 = vsyncpa [#allocation7], 1 }
 0xfd7   :  { %7267 = vsyncpa [#allocation7 + $0x1], 1 }
 0xfd8   :  { %7268 = vsyncpa [#allocation9], 1 }
 0xfd9   :  { %7269 = vsyncpa [#allocation12], 1 }
 0xfda   :  { %7270 = vsyncpa [#allocation15], 1 }

</bundles_post_ra>
